<compile_context>
chip_gen: v7x
topology: tpu7x:2x2x1
jax: 0.10.0
libtpu: 0.0.40
codegen_flags: <defaults>
</compile_context>

<pallas_src>
import math

import numpy as np
import jax
import jax.numpy as jnp
from jax import lax
from jax.experimental import pallas as pl
from jax.experimental.pallas import tpu as pltpu

# ------------------------- scaled-down config -------------------------------
HIDDEN = 128          # stands in for EMBEDDING_DIM = 768
NUM_HEADS = 2
HEAD_DIM = HIDDEN // NUM_HEADS
INTER = 4 * HIDDEN    # BERT intermediate size
VOCAB = 512
MAX_POS = 64
FC_DIM = 256
NUM_CLASSES = 5
LANE = 128            # TPU lane width; class-head output is lane-padded to this

BATCH = 2
S_URL = 8             # url token sequence length
NUM_SEQ = 3           # number of text snippets per example
S_TEXT = 8            # text token sequence length
NPROG = 2             # grid width: keeps both v7x TensorCores busy; 2 cheap steps on v5e/v6e

ATTN_SCALE = 1.0 / math.sqrt(HEAD_DIM)
LN_EPS = 1e-12
MASK_VALUE = -1e9     # additive attention-mask bias (padding keys / cross-sequence)

LAYER_KEYS = ('wq', 'bq', 'wk', 'bk', 'wv', 'bv', 'wo', 'bo',
              'ln1g', 'ln1b', 'wi', 'bi', 'wo2', 'bo2', 'ln2g', 'ln2b')


# ------------------------- shared math (used in-kernel and in reference) ----
def _layer_norm(x, g, b, eps=LN_EPS):
    mu = jnp.mean(x, axis=-1, keepdims=True)
    var = jnp.mean((x - mu) ** 2, axis=-1, keepdims=True)
    return (x - mu) * lax.rsqrt(var + eps) * g + b


def _gelu(x):
    # TODO(synk): HF BERT uses exact erf-GELU; tanh approximation used here for
    # guaranteed Mosaic lowering of the elementwise path.
    return 0.5 * x * (1.0 + jnp.tanh(0.7978845608028654 * (x + 0.044715 * x * x * x)))


def _encoder_layer(x, attn_bias, wq, bq, wk, bk, wv, bv, wo, bo,
                   ln1g, ln1b, wi, bi, wo2, bo2, ln2g, ln2b):
    """One BERT encoder layer on a folded (M, H) block of rows.

    attn_bias: additive score bias broadcastable to (M, M). It combines the
    key-padding mask and (when several sequences are folded into M) a
    block-diagonal mask forbidding cross-sequence attention.
    Q/K/V and the output projection use un-split (H, H) weights (full 128-wide
    MXU contractions); heads are sliced from the 128-lane results.
    """
    q = jnp.dot(x, wq, preferred_element_type=jnp.float32) + bq      # (M, H)
    k = jnp.dot(x, wk, preferred_element_type=jnp.float32) + bk
    v = jnp.dot(x, wv, preferred_element_type=jnp.float32) + bv
    ctx = []
    for h in range(NUM_HEADS):                                        # static unroll over heads
        sl = slice(h * HEAD_DIM, (h + 1) * HEAD_DIM)
        qh, kh, vh = q[:, sl], k[:, sl], v[:, sl]
        s = lax.dot_general(qh, kh, (((1,), (1,)), ((), ())),
                            preferred_element_type=jnp.float32)       # (M, M)
        s = s * ATTN_SCALE + attn_bias
        s = s - jnp.max(s, axis=-1, keepdims=True)
        p = jnp.exp(s)
        p = p / jnp.sum(p, axis=-1, keepdims=True)                    # softmax over keys
        ctx.append(jnp.dot(p, vh, preferred_element_type=jnp.float32))
    ctx = jnp.concatenate(ctx, axis=-1)                               # (M, H) lane-concat
    attn = jnp.dot(ctx, wo, preferred_element_type=jnp.float32) + bo  # fused output projection
    h1 = _layer_norm(attn + x, ln1g, ln1b)                            # BertSelfOutput
    inter = _gelu(jnp.dot(h1, wi, preferred_element_type=jnp.float32) + bi)
    ffn = jnp.dot(inter, wo2, preferred_element_type=jnp.float32) + bo2
    return _layer_norm(ffn + h1, ln2g, ln2b)                          # BertOutput


# ------------------------- Pallas kernels -----------------------------------
def fused_bert_kernel(x_ref, bias_ref, *rest):
    """emb-LayerNorm -> encoder layer -> pooler for one chunk of sequences.

    x_ref:    (chunk*S, H) embedded tokens (pre-LayerNorm), chunk sequences folded on M.
    bias_ref: (chunk*S, chunk*S) additive attention bias (key padding + block-diagonal).
    output:   (chunk, H) pooled CLS embeddings, tanh(cls @ pool_w + pool_b).
    """
    eg, eb, *layer_refs, pw, pb, pooled_ref = rest
    num_seq = pooled_ref.shape[0]
    seq_len = x_ref.shape[0] // num_seq

    x = _layer_norm(x_ref[...], eg[...], eb[...])                     # embedding LayerNorm
    y = _encoder_layer(x, bias_ref[...], *[r[...] for r in layer_refs])
    # CLS (first token) row of each folded sequence; rows land on 8-row tile boundaries.
    cls = jnp.concatenate([y[i * seq_len:i * seq_len + 1, :]
                           for i in range(num_seq)], axis=0)          # (num_seq, H)
    pooled_ref[...] = jnp.tanh(
        jnp.dot(cls, pw[...], preferred_element_type=jnp.float32) + pb[...])


def combine_fc_kernel(x_ref, pe_ref, *rest):
    """PE add -> emb-LayerNorm -> encoder layer (no mask) -> mean(seq) -> FC head."""
    eg, eb, *layer_refs, w1, b1, w2p, b2p, out5_ref, out256_ref = rest
    x = _layer_norm(x_ref[...] + pe_ref[...], eg[...], eb[...])       # (Sc, H)
    y = _encoder_layer(x, 0.0, *[r[...] for r in layer_refs])         # encoder called with no mask
    pooled = jnp.mean(y, axis=0, keepdims=True)                       # average_embeddings=True
    h = jnp.dot(pooled, w1[...], preferred_element_type=jnp.float32) + b1[...]
    out256_ref[...] = h                                               # captured at idx==0 (pre-ReLU)
    out5_ref[...] = (jnp.dot(jnp.maximum(h, 0.0), w2p[...],           # lane-padded (1, 128) output
                             preferred_element_type=jnp.float32) + b2p[...])


# ------------------------- Pallas wrappers -----------------------------------
def _const_spec(a):
    nd = a.ndim
    return pl.BlockSpec(a.shape, lambda i, _n=nd: (0,) * _n)


def _embed(tokens, p):
    s = tokens.shape[-1]
    return (p['word_emb'][tokens]
            + p['pos_emb'][:s][None, :, :]
            + p['type_emb'][0][None, None, :])


def bert_forward(tokens, p, nprog=NPROG):
    """Mini BertModel (embeddings -> 1 encoder layer -> pooler) for NS sequences at once.

    One pallas_call; grid=(nprog,), each program handles NS/nprog sequences folded
    into a (chunk*S, H) matrix with a block-diagonal attention mask.
    """
    ns, s = tokens.shape
    if ns % nprog != 0:
        nprog = 1
    chunk = ns // nprog
    m = chunk * s

    x = _embed(tokens, p).reshape(nprog, m, HIDDEN)
    # Additive attention bias: HF-style key padding mask + block-diagonal fold mask.
    key_bias = ((tokens == 0).astype(jnp.float32) * MASK_VALUE).reshape(nprog, 1, m)
    blk = jnp.arange(m, dtype=jnp.int32) // s
    block_mask = jnp.where(blk[:, None] == blk[None, :], 0.0, MASK_VALUE)   # (m, m)
    bias = key_bias + block_mask[None, :, :]                                # (nprog, m, m)

    weights = ([p['emb_ln_g'], p['emb_ln_b']]
               + [p['layer'][k] for k in LAYER_KEYS]
               + [p['pool_w'], p['pool_b']])

    pooled = pl.pallas_call(
        fused_bert_kernel,
        out_shape=jax.ShapeDtypeStruct((nprog, chunk, HIDDEN), jnp.float32),
        grid=(nprog,),
        in_specs=[pl.BlockSpec((None, m, HIDDEN), lambda i: (i, 0, 0)),
                  pl.BlockSpec((None, m, m), lambda i: (i, 0, 0))]
                 + [_const_spec(w) for w in weights],
        out_specs=pl.BlockSpec((None, chunk, HIDDEN), lambda i: (i, 0, 0)),
        compiler_params=pltpu.CompilerParams(dimension_semantics=("parallel",)),
    )(x, bias, *weights)
    return pooled.reshape(ns, HIDDEN)


def combine_fc_forward(full_emb, cp, fc):
    """Fused combine encoder + mean + FC head. One pallas_call, grid over batch."""
    b, sc, _ = full_emb.shape
    # Lane-pad the 5-class head so the kernel's final store is lane-dense (128 wide).
    w2p = jnp.pad(fc['w2'], ((0, 0), (0, LANE - NUM_CLASSES)))
    b2p = jnp.pad(fc['b2'], ((0, 0), (0, LANE - NUM_CLASSES)))
    weights = ([cp['emb_ln_g'], cp['emb_ln_b']]
               + [cp['layer'][k] for k in LAYER_KEYS]
               + [fc['w1'], fc['b1'], w2p, b2p])

    out5p, out256 = pl.pallas_call(
        combine_fc_kernel,
        out_shape=(jax.ShapeDtypeStruct((b, 1, LANE), jnp.float32),
                   jax.ShapeDtypeStruct((b, 1, FC_DIM), jnp.float32)),
        grid=(b,),
        in_specs=[pl.BlockSpec((None, sc, HIDDEN), lambda i: (i, 0, 0)),
                  _const_spec(cp['pe'])]
                 + [_const_spec(w) for w in weights],
        out_specs=(pl.BlockSpec((None, 1, LANE), lambda i: (i, 0, 0)),
                   pl.BlockSpec((None, 1, FC_DIM), lambda i: (i, 0, 0))),
        compiler_params=pltpu.CompilerParams(dimension_semantics=("parallel",)),
    )(full_emb, cp['pe'], *weights)
    return out5p[:, 0, :NUM_CLASSES], out256[:, 0, :]


def teacher_forward(url_tokens, text_tokens, params):
    b, nseq, s_text = text_tokens.shape
    url_emb = bert_forward(url_tokens, params['url'])                        # (B, H)
    # all B*NUM_SEQ text snippets in a single batched BERT call
    text_emb = bert_forward(text_tokens.reshape(b * nseq, s_text),
                            params['text']).reshape(b, nseq, HIDDEN)         # (B, NUM_SEQ, H)
    full_emb = jnp.concatenate([url_emb[:, None, :], text_emb], axis=1)      # (B, NUM_SEQ+1, H)
    # dropout: eval-mode identity
    return combine_fc_forward(full_emb, params['combine'], params['fc'])


# ------------------------- pure-JAX reference (for validation) ---------------
def _bert_forward_ref(tokens, p):
    """Per-sequence reference: validates the fat-M / block-diagonal folding."""
    x = _layer_norm(_embed(tokens, p), p['emb_ln_g'], p['emb_ln_b'])
    bias = ((tokens == 0).astype(jnp.float32) * MASK_VALUE)[:, None, :]      # (NS, 1, S)
    w = [p['layer'][k] for k in LAYER_KEYS]
    y = jax.vmap(lambda xi, bi: _encoder_layer(xi, bi, *w))(x, bias)
    return jnp.tanh(y[:, 0, :] @ p['pool_w'] + p['pool_b'])


def teacher_forward_ref(url_tokens, text_tokens, params):
    b, nseq, s_text = text_tokens.shape
    url_emb = _bert_forward_ref(url_tokens, params['url'])
    text_emb = _bert_forward_ref(text_tokens.reshape(b * nseq, s_text),
                                 params['text']).reshape(b, nseq, HIDDEN)
    full = jnp.concatenate([url_emb[:, None, :], text_emb], axis=1)
    full = full + params['combine']['pe'][None]
    full = _layer_norm(full, params['combine']['emb_ln_g'], params['combine']['emb_ln_b'])
    w = [params['combine']['layer'][k] for k in LAYER_KEYS]
    full = jax.vmap(lambda xi: _encoder_layer(xi, 0.0, *w))(full)
    out = jnp.mean(full, axis=1)
    h = out @ params['fc']['w1'] + params['fc']['b1']
    out5 = jnp.maximum(h, 0.0) @ params['fc']['w2'] + params['fc']['b2']
    return out5, h


# ------------------------- deterministic parameter init ----------------------
def make_positional_encoding(seq_len, dim):
    pos = np.arange(seq_len, dtype=np.float32)[:, None]
    div = np.exp(np.arange(0, dim, 2, dtype=np.float32) * (-math.log(10000.0) / dim))
    pe = np.zeros((seq_len, dim), dtype=np.float32)
    pe[:, 0::2] = np.sin(pos * div)
    pe[:, 1::2] = np.cos(pos * div)
    return jnp.asarray(pe)


def init_params(key):
    kit = iter(jax.random.split(key, 64))

    def nrm(shape):  # matches torch.nn.init.normal_(std=0.02)
        return 0.02 * jax.random.normal(next(kit), shape, dtype=jnp.float32)

    def zeros(shape):
        return jnp.zeros(shape, jnp.float32)

    def ones(shape):
        return jnp.ones(shape, jnp.float32)

    def layer_params():
        return {
            'wq': nrm((HIDDEN, HIDDEN)), 'bq': zeros((1, HIDDEN)),
            'wk': nrm((HIDDEN, HIDDEN)), 'bk': zeros((1, HIDDEN)),
            'wv': nrm((HIDDEN, HIDDEN)), 'bv': zeros((1, HIDDEN)),
            'wo': nrm((HIDDEN, HIDDEN)), 'bo': zeros((1, HIDDEN)),
            'ln1g': ones((1, HIDDEN)), 'ln1b': zeros((1, HIDDEN)),
            'wi': nrm((HIDDEN, INTER)), 'bi': zeros((1, INTER)),
            'wo2': nrm((INTER, HIDDEN)), 'bo2': zeros((1, HIDDEN)),
            'ln2g': ones((1, HIDDEN)), 'ln2b': zeros((1, HIDDEN)),
        }

    def bert_params():
        return {
            'word_emb': nrm((VOCAB, HIDDEN)),
            'pos_emb': nrm((MAX_POS, HIDDEN)),
            'type_emb': nrm((2, HIDDEN)),
            'emb_ln_g': ones((1, HIDDEN)), 'emb_ln_b': zeros((1, HIDDEN)),
            'layer': layer_params(),
            'pool_w': nrm((HIDDEN, HIDDEN)), 'pool_b': zeros((1, HIDDEN)),
        }

    return {
        'url': bert_params(),
        'text': bert_params(),
        'combine': {
            'emb_ln_g': ones((1, HIDDEN)), 'emb_ln_b': zeros((1, HIDDEN)),
            'pe': make_positional_encoding(NUM_SEQ + 1, HIDDEN),
            'layer': layer_params(),
        },
        'fc': {
            'w1': nrm((HIDDEN, FC_DIM)), 'b1': zeros((1, FC_DIM)),
            'w2': nrm((FC_DIM, NUM_CLASSES)), 'b2': zeros((1, NUM_CLASSES)),
        },
    }


# ------------------------- main ----------------------------------------------
if __name__ == "__main__":
    key = jax.random.PRNGKey(0)
    pkey, ukey, tkey = jax.random.split(key, 3)
    params = init_params(pkey)

    # nonzero token ids (0 is BERT padding); zero the last position of each
    # sequence to exercise the attention key-padding mask.
    url_tokens = jax.random.randint(ukey, (BATCH, S_URL), 1, VOCAB)
    text_tokens = jax.random.randint(tkey, (BATCH, NUM_SEQ, S_TEXT), 1, VOCAB)
    url_tokens = url_tokens.at[:, -1].set(0)
    text_tokens = text_tokens.at[:, :, -1].set(0)

    fwd = jax.jit(teacher_forward)
    out5, out256 = fwd(url_tokens, text_tokens, params)
    jax.block_until_ready((out5, out256))

    assert out5.shape == (BATCH, NUM_CLASSES) and out5.dtype == jnp.float32
    assert out256.shape == (BATCH, FC_DIM) and out256.dtype == jnp.float32

    # validate against a pure-JAX per-sequence reference of the same math
    ref5, ref256 = jax.jit(teacher_forward_ref)(url_tokens, text_tokens, params)
    assert bool(jnp.all(jnp.isfinite(out5))) and bool(jnp.all(jnp.isfinite(out256)))
    assert jnp.allclose(out5, ref5, atol=2e-3, rtol=2e-3)
    assert jnp.allclose(out256, ref256, atol=2e-3, rtol=2e-3)

    print("KERNEL_OK")
</pallas_src>

<mosaic_0001>
module attributes {stable_mosaic.version = 11 : i64} {
  func.func @fused_bert_kernel(%arg0: i32, %arg1: memref<1x24x128xf32, #tpu.memory_space<vmem>>, %arg2: memref<1x24x24xf32, #tpu.memory_space<vmem>>, %arg3: memref<1x128xf32, #tpu.memory_space<vmem>>, %arg4: memref<1x128xf32, #tpu.memory_space<vmem>>, %arg5: memref<128x128xf32, #tpu.memory_space<vmem>>, %arg6: memref<1x128xf32, #tpu.memory_space<vmem>>, %arg7: memref<128x128xf32, #tpu.memory_space<vmem>>, %arg8: memref<1x128xf32, #tpu.memory_space<vmem>>, %arg9: memref<128x128xf32, #tpu.memory_space<vmem>>, %arg10: memref<1x128xf32, #tpu.memory_space<vmem>>, %arg11: memref<128x128xf32, #tpu.memory_space<vmem>>, %arg12: memref<1x128xf32, #tpu.memory_space<vmem>>, %arg13: memref<1x128xf32, #tpu.memory_space<vmem>>, %arg14: memref<1x128xf32, #tpu.memory_space<vmem>>, %arg15: memref<128x512xf32, #tpu.memory_space<vmem>>, %arg16: memref<1x512xf32, #tpu.memory_space<vmem>>, %arg17: memref<512x128xf32, #tpu.memory_space<vmem>>, %arg18: memref<1x128xf32, #tpu.memory_space<vmem>>, %arg19: memref<1x128xf32, #tpu.memory_space<vmem>>, %arg20: memref<1x128xf32, #tpu.memory_space<vmem>>, %arg21: memref<128x128xf32, #tpu.memory_space<vmem>>, %arg22: memref<1x128xf32, #tpu.memory_space<vmem>>, %arg23: memref<1x3x128xf32, #tpu.memory_space<vmem>>) attributes {dimension_semantics = [#tpu.dimension_semantics<parallel>], iteration_bounds = array<i64: 2>, scalar_prefetch = 0 : i64, scratch_operands = 0 : i64, tpu.core_type = #tpu.core_type<tc>, window_params = [{transform_indices = @transform_0, window_bounds = array<i64: 1, 24, 128>}, {transform_indices = @transform_1, window_bounds = array<i64: 1, 24, 24>}, {pipeline_mode = #tpu.pipeline_mode<synchronous>, transform_indices = @transform_2, window_bounds = array<i64: 1, 128>}, {pipeline_mode = #tpu.pipeline_mode<synchronous>, transform_indices = @transform_3, window_bounds = array<i64: 1, 128>}, {pipeline_mode = #tpu.pipeline_mode<synchronous>, transform_indices = @transform_4, window_bounds = array<i64: 128, 128>}, {pipeline_mode = #tpu.pipeline_mode<synchronous>, transform_indices = @transform_5, window_bounds = array<i64: 1, 128>}, {pipeline_mode = #tpu.pipeline_mode<synchronous>, transform_indices = @transform_6, window_bounds = array<i64: 128, 128>}, {pipeline_mode = #tpu.pipeline_mode<synchronous>, transform_indices = @transform_7, window_bounds = array<i64: 1, 128>}, {pipeline_mode = #tpu.pipeline_mode<synchronous>, transform_indices = @transform_8, window_bounds = array<i64: 128, 128>}, {pipeline_mode = #tpu.pipeline_mode<synchronous>, transform_indices = @transform_9, window_bounds = array<i64: 1, 128>}, {pipeline_mode = #tpu.pipeline_mode<synchronous>, transform_indices = @transform_10, window_bounds = array<i64: 128, 128>}, {pipeline_mode = #tpu.pipeline_mode<synchronous>, transform_indices = @transform_11, window_bounds = array<i64: 1, 128>}, {pipeline_mode = #tpu.pipeline_mode<synchronous>, transform_indices = @transform_12, window_bounds = array<i64: 1, 128>}, {pipeline_mode = #tpu.pipeline_mode<synchronous>, transform_indices = @transform_13, window_bounds = array<i64: 1, 128>}, {pipeline_mode = #tpu.pipeline_mode<synchronous>, transform_indices = @transform_14, window_bounds = array<i64: 128, 512>}, {pipeline_mode = #tpu.pipeline_mode<synchronous>, transform_indices = @transform_15, window_bounds = array<i64: 1, 512>}, {pipeline_mode = #tpu.pipeline_mode<synchronous>, transform_indices = @transform_16, window_bounds = array<i64: 512, 128>}, {pipeline_mode = #tpu.pipeline_mode<synchronous>, transform_indices = @transform_17, window_bounds = array<i64: 1, 128>}, {pipeline_mode = #tpu.pipeline_mode<synchronous>, transform_indices = @transform_18, window_bounds = array<i64: 1, 128>}, {pipeline_mode = #tpu.pipeline_mode<synchronous>, transform_indices = @transform_19, window_bounds = array<i64: 1, 128>}, {pipeline_mode = #tpu.pipeline_mode<synchronous>, transform_indices = @transform_20, window_bounds = array<i64: 128, 128>}, {pipeline_mode = #tpu.pipeline_mode<synchronous>, transform_indices = @transform_21, window_bounds = array<i64: 1, 128>}, {transform_indices = @transform_22, window_bounds = array<i64: 1, 3, 128>}]} {
    %c0 = arith.constant 0 : index
    %c0_0 = arith.constant 0 : index
    %c0_1 = arith.constant 0 : index
    %0 = vector.load %arg1[%c0, %c0_0, %c0_1] : memref<1x24x128xf32, #tpu.memory_space<vmem>>, vector<1x24x128xf32>
    %1 = vector.shape_cast %0 : vector<1x24x128xf32> to vector<24x128xf32>
    %c0_2 = arith.constant 0 : index
    %c0_3 = arith.constant 0 : index
    %2 = vector.load %arg3[%c0_2, %c0_3] : memref<1x128xf32, #tpu.memory_space<vmem>>, vector<1x128xf32>
    %c0_4 = arith.constant 0 : index
    %c0_5 = arith.constant 0 : index
    %3 = vector.load %arg4[%c0_4, %c0_5] : memref<1x128xf32, #tpu.memory_space<vmem>>, vector<1x128xf32>
    %cst = arith.constant dense<0.000000e+00> : vector<24xf32>
    %4 = vector.multi_reduction <add>, %1, %cst [1] : vector<24x128xf32> to vector<24xf32>
    %5 = vector.shape_cast %4 : vector<24xf32> to vector<24x1xf32>
    %cst_6 = arith.constant 1.280000e+02 : f32
    %6 = vector.broadcast %cst_6 : f32 to vector<24x1xf32>
    %7 = arith.divf %5, %6 : vector<24x1xf32>
    %8 = vector.broadcast %7 : vector<24x1xf32> to vector<24x128xf32>
    %9 = arith.subf %1, %8 : vector<24x128xf32>
    %10 = arith.mulf %9, %9 : vector<24x128xf32>
    %cst_7 = arith.constant dense<0.000000e+00> : vector<24xf32>
    %11 = vector.multi_reduction <add>, %10, %cst_7 [1] : vector<24x128xf32> to vector<24xf32>
    %12 = vector.shape_cast %11 : vector<24xf32> to vector<24x1xf32>
    %cst_8 = arith.constant 1.280000e+02 : f32
    %13 = vector.broadcast %cst_8 : f32 to vector<24x1xf32>
    %14 = arith.divf %12, %13 : vector<24x1xf32>
    %15 = vector.broadcast %7 : vector<24x1xf32> to vector<24x128xf32>
    %16 = arith.subf %1, %15 : vector<24x128xf32>
    %cst_9 = arith.constant 9.99999996E-13 : f32
    %17 = vector.broadcast %cst_9 : f32 to vector<24x1xf32>
    %18 = arith.addf %14, %17 : vector<24x1xf32>
    %19 = math.rsqrt %18 : vector<24x1xf32>
    %20 = vector.broadcast %19 : vector<24x1xf32> to vector<24x128xf32>
    %21 = arith.mulf %16, %20 : vector<24x128xf32>
    %22 = vector.broadcast %2 : vector<1x128xf32> to vector<24x128xf32>
    %23 = arith.mulf %21, %22 : vector<24x128xf32>
    %24 = vector.broadcast %3 : vector<1x128xf32> to vector<24x128xf32>
    %25 = arith.addf %23, %24 : vector<24x128xf32>
    %c0_10 = arith.constant 0 : index
    %c0_11 = arith.constant 0 : index
    %c0_12 = arith.constant 0 : index
    %26 = vector.load %arg2[%c0_10, %c0_11, %c0_12] : memref<1x24x24xf32, #tpu.memory_space<vmem>>, vector<1x24x24xf32>
    %27 = vector.shape_cast %26 : vector<1x24x24xf32> to vector<24x24xf32>
    %c0_13 = arith.constant 0 : index
    %c0_14 = arith.constant 0 : index
    %28 = vector.load %arg5[%c0_13, %c0_14] : memref<128x128xf32, #tpu.memory_space<vmem>>, vector<128x128xf32>
    %c0_15 = arith.constant 0 : index
    %c0_16 = arith.constant 0 : index
    %29 = vector.load %arg6[%c0_15, %c0_16] : memref<1x128xf32, #tpu.memory_space<vmem>>, vector<1x128xf32>
    %c0_17 = arith.constant 0 : index
    %c0_18 = arith.constant 0 : index
    %30 = vector.load %arg7[%c0_17, %c0_18] : memref<128x128xf32, #tpu.memory_space<vmem>>, vector<128x128xf32>
    %c0_19 = arith.constant 0 : index
    %c0_20 = arith.constant 0 : index
    %31 = vector.load %arg8[%c0_19, %c0_20] : memref<1x128xf32, #tpu.memory_space<vmem>>, vector<1x128xf32>
    %c0_21 = arith.constant 0 : index
    %c0_22 = arith.constant 0 : index
    %32 = vector.load %arg9[%c0_21, %c0_22] : memref<128x128xf32, #tpu.memory_space<vmem>>, vector<128x128xf32>
    %c0_23 = arith.constant 0 : index
    %c0_24 = arith.constant 0 : index
    %33 = vector.load %arg10[%c0_23, %c0_24] : memref<1x128xf32, #tpu.memory_space<vmem>>, vector<1x128xf32>
    %c0_25 = arith.constant 0 : index
    %c0_26 = arith.constant 0 : index
    %34 = vector.load %arg11[%c0_25, %c0_26] : memref<128x128xf32, #tpu.memory_space<vmem>>, vector<128x128xf32>
    %c0_27 = arith.constant 0 : index
    %c0_28 = arith.constant 0 : index
    %35 = vector.load %arg12[%c0_27, %c0_28] : memref<1x128xf32, #tpu.memory_space<vmem>>, vector<1x128xf32>
    %c0_29 = arith.constant 0 : index
    %c0_30 = arith.constant 0 : index
    %36 = vector.load %arg13[%c0_29, %c0_30] : memref<1x128xf32, #tpu.memory_space<vmem>>, vector<1x128xf32>
    %c0_31 = arith.constant 0 : index
    %c0_32 = arith.constant 0 : index
    %37 = vector.load %arg14[%c0_31, %c0_32] : memref<1x128xf32, #tpu.memory_space<vmem>>, vector<1x128xf32>
    %c0_33 = arith.constant 0 : index
    %c0_34 = arith.constant 0 : index
    %38 = vector.load %arg15[%c0_33, %c0_34] : memref<128x512xf32, #tpu.memory_space<vmem>>, vector<128x512xf32>
    %c0_35 = arith.constant 0 : index
    %c0_36 = arith.constant 0 : index
    %39 = vector.load %arg16[%c0_35, %c0_36] : memref<1x512xf32, #tpu.memory_space<vmem>>, vector<1x512xf32>
    %c0_37 = arith.constant 0 : index
    %c0_38 = arith.constant 0 : index
    %40 = vector.load %arg17[%c0_37, %c0_38] : memref<512x128xf32, #tpu.memory_space<vmem>>, vector<512x128xf32>
    %c0_39 = arith.constant 0 : index
    %c0_40 = arith.constant 0 : index
    %41 = vector.load %arg18[%c0_39, %c0_40] : memref<1x128xf32, #tpu.memory_space<vmem>>, vector<1x128xf32>
    %c0_41 = arith.constant 0 : index
    %c0_42 = arith.constant 0 : index
    %42 = vector.load %arg19[%c0_41, %c0_42] : memref<1x128xf32, #tpu.memory_space<vmem>>, vector<1x128xf32>
    %c0_43 = arith.constant 0 : index
    %c0_44 = arith.constant 0 : index
    %43 = vector.load %arg20[%c0_43, %c0_44] : memref<1x128xf32, #tpu.memory_space<vmem>>, vector<1x128xf32>
    %cst_45 = arith.constant dense<0.000000e+00> : vector<24x128xf32>
    %44 = tpu.matmul %25, %28, %cst_45 {dimension_numbers = #tpu.dot_dimension_numbers<[1], [0], [0], [1], [0, 0, 1, 1], [], []>} : vector<24x128xf32>, vector<128x128xf32>, vector<24x128xf32> -> vector<24x128xf32>
    %45 = vector.broadcast %29 : vector<1x128xf32> to vector<24x128xf32>
    %46 = arith.addf %44, %45 : vector<24x128xf32>
    %cst_46 = arith.constant dense<0.000000e+00> : vector<24x128xf32>
    %47 = tpu.matmul %25, %30, %cst_46 {dimension_numbers = #tpu.dot_dimension_numbers<[1], [0], [0], [1], [0, 0, 1, 1], [], []>} : vector<24x128xf32>, vector<128x128xf32>, vector<24x128xf32> -> vector<24x128xf32>
    %48 = vector.broadcast %31 : vector<1x128xf32> to vector<24x128xf32>
    %49 = arith.addf %47, %48 : vector<24x128xf32>
    %cst_47 = arith.constant dense<0.000000e+00> : vector<24x128xf32>
    %50 = tpu.matmul %25, %32, %cst_47 {dimension_numbers = #tpu.dot_dimension_numbers<[1], [0], [0], [1], [0, 0, 1, 1], [], []>} : vector<24x128xf32>, vector<128x128xf32>, vector<24x128xf32> -> vector<24x128xf32>
    %51 = vector.broadcast %33 : vector<1x128xf32> to vector<24x128xf32>
    %52 = arith.addf %50, %51 : vector<24x128xf32>
    %53 = vector.extract_strided_slice %46 {offsets = [0, 0], sizes = [24, 64], strides = [1, 1]} : vector<24x128xf32> to vector<24x64xf32>
    %54 = vector.extract_strided_slice %49 {offsets = [0, 0], sizes = [24, 64], strides = [1, 1]} : vector<24x128xf32> to vector<24x64xf32>
    %55 = vector.extract_strided_slice %52 {offsets = [0, 0], sizes = [24, 64], strides = [1, 1]} : vector<24x128xf32> to vector<24x64xf32>
    %cst_48 = arith.constant dense<0.000000e+00> : vector<24x24xf32>
    %56 = tpu.matmul %53, %54, %cst_48 {dimension_numbers = #tpu.dot_dimension_numbers<[1], [1], [0], [0], [0, 0, 1, 0], [], []>} : vector<24x64xf32>, vector<24x64xf32>, vector<24x24xf32> -> vector<24x24xf32>
    %cst_49 = arith.constant 1.250000e-01 : f32
    %57 = vector.broadcast %cst_49 : f32 to vector<24x24xf32>
    %58 = arith.mulf %56, %57 : vector<24x24xf32>
    %59 = arith.addf %58, %27 : vector<24x24xf32>
    %cst_50 = arith.constant dense<0xFF800000> : vector<24xf32>
    %60 = vector.multi_reduction <maximumf>, %59, %cst_50 [1] : vector<24x24xf32> to vector<24xf32>
    %61 = vector.shape_cast %60 : vector<24xf32> to vector<24x1xf32>
    %62 = vector.broadcast %61 : vector<24x1xf32> to vector<24x24xf32>
    %63 = arith.subf %59, %62 : vector<24x24xf32>
    %64 = math.exp %63 : vector<24x24xf32>
    %cst_51 = arith.constant dense<0.000000e+00> : vector<24xf32>
    %65 = vector.multi_reduction <add>, %64, %cst_51 [1] : vector<24x24xf32> to vector<24xf32>
    %66 = vector.shape_cast %65 : vector<24xf32> to vector<24x1xf32>
    %67 = vector.broadcast %66 : vector<24x1xf32> to vector<24x24xf32>
    %68 = arith.divf %64, %67 : vector<24x24xf32>
    %cst_52 = arith.constant dense<0.000000e+00> : vector<24x64xf32>
    %69 = tpu.matmul %68, %55, %cst_52 {dimension_numbers = #tpu.dot_dimension_numbers<[1], [0], [0], [1], [0, 0, 1, 1], [], []>} : vector<24x24xf32>, vector<24x64xf32>, vector<24x64xf32> -> vector<24x64xf32>
    %70 = vector.extract_strided_slice %46 {offsets = [0, 64], sizes = [24, 64], strides = [1, 1]} : vector<24x128xf32> to vector<24x64xf32>
    %71 = vector.extract_strided_slice %49 {offsets = [0, 64], sizes = [24, 64], strides = [1, 1]} : vector<24x128xf32> to vector<24x64xf32>
    %72 = vector.extract_strided_slice %52 {offsets = [0, 64], sizes = [24, 64], strides = [1, 1]} : vector<24x128xf32> to vector<24x64xf32>
    %cst_53 = arith.constant dense<0.000000e+00> : vector<24x24xf32>
    %73 = tpu.matmul %70, %71, %cst_53 {dimension_numbers = #tpu.dot_dimension_numbers<[1], [1], [0], [0], [0, 0, 1, 0], [], []>} : vector<24x64xf32>, vector<24x64xf32>, vector<24x24xf32> -> vector<24x24xf32>
    %cst_54 = arith.constant 1.250000e-01 : f32
    %74 = vector.broadcast %cst_54 : f32 to vector<24x24xf32>
    %75 = arith.mulf %73, %74 : vector<24x24xf32>
    %76 = arith.addf %75, %27 : vector<24x24xf32>
    %cst_55 = arith.constant dense<0xFF800000> : vector<24xf32>
    %77 = vector.multi_reduction <maximumf>, %76, %cst_55 [1] : vector<24x24xf32> to vector<24xf32>
    %78 = vector.shape_cast %77 : vector<24xf32> to vector<24x1xf32>
    %79 = vector.broadcast %78 : vector<24x1xf32> to vector<24x24xf32>
    %80 = arith.subf %76, %79 : vector<24x24xf32>
    %81 = math.exp %80 : vector<24x24xf32>
    %cst_56 = arith.constant dense<0.000000e+00> : vector<24xf32>
    %82 = vector.multi_reduction <add>, %81, %cst_56 [1] : vector<24x24xf32> to vector<24xf32>
    %83 = vector.shape_cast %82 : vector<24xf32> to vector<24x1xf32>
    %84 = vector.broadcast %83 : vector<24x1xf32> to vector<24x24xf32>
    %85 = arith.divf %81, %84 : vector<24x24xf32>
    %cst_57 = arith.constant dense<0.000000e+00> : vector<24x64xf32>
    %86 = tpu.matmul %85, %72, %cst_57 {dimension_numbers = #tpu.dot_dimension_numbers<[1], [0], [0], [1], [0, 0, 1, 1], [], []>} : vector<24x24xf32>, vector<24x64xf32>, vector<24x64xf32> -> vector<24x64xf32>
    %87 = tpu.concatenate %69, %86 in 1 : vector<24x64xf32>, vector<24x64xf32> -> vector<24x128xf32>
    %cst_58 = arith.constant dense<0.000000e+00> : vector<24x128xf32>
    %88 = tpu.matmul %87, %34, %cst_58 {dimension_numbers = #tpu.dot_dimension_numbers<[1], [0], [0], [1], [0, 0, 1, 1], [], []>} : vector<24x128xf32>, vector<128x128xf32>, vector<24x128xf32> -> vector<24x128xf32>
    %89 = vector.broadcast %35 : vector<1x128xf32> to vector<24x128xf32>
    %90 = arith.addf %88, %89 : vector<24x128xf32>
    %91 = arith.addf %90, %25 : vector<24x128xf32>
    %cst_59 = arith.constant dense<0.000000e+00> : vector<24xf32>
    %92 = vector.multi_reduction <add>, %91, %cst_59 [1] : vector<24x128xf32> to vector<24xf32>
    %93 = vector.shape_cast %92 : vector<24xf32> to vector<24x1xf32>
    %cst_60 = arith.constant 1.280000e+02 : f32
    %94 = vector.broadcast %cst_60 : f32 to vector<24x1xf32>
    %95 = arith.divf %93, %94 : vector<24x1xf32>
    %96 = vector.broadcast %95 : vector<24x1xf32> to vector<24x128xf32>
    %97 = arith.subf %91, %96 : vector<24x128xf32>
    %98 = arith.mulf %97, %97 : vector<24x128xf32>
    %cst_61 = arith.constant dense<0.000000e+00> : vector<24xf32>
    %99 = vector.multi_reduction <add>, %98, %cst_61 [1] : vector<24x128xf32> to vector<24xf32>
    %100 = vector.shape_cast %99 : vector<24xf32> to vector<24x1xf32>
    %cst_62 = arith.constant 1.280000e+02 : f32
    %101 = vector.broadcast %cst_62 : f32 to vector<24x1xf32>
    %102 = arith.divf %100, %101 : vector<24x1xf32>
    %103 = vector.broadcast %95 : vector<24x1xf32> to vector<24x128xf32>
    %104 = arith.subf %91, %103 : vector<24x128xf32>
    %cst_63 = arith.constant 9.99999996E-13 : f32
    %105 = vector.broadcast %cst_63 : f32 to vector<24x1xf32>
    %106 = arith.addf %102, %105 : vector<24x1xf32>
    %107 = math.rsqrt %106 : vector<24x1xf32>
    %108 = vector.broadcast %107 : vector<24x1xf32> to vector<24x128xf32>
    %109 = arith.mulf %104, %108 : vector<24x128xf32>
    %110 = vector.broadcast %36 : vector<1x128xf32> to vector<24x128xf32>
    %111 = arith.mulf %109, %110 : vector<24x128xf32>
    %112 = vector.broadcast %37 : vector<1x128xf32> to vector<24x128xf32>
    %113 = arith.addf %111, %112 : vector<24x128xf32>
    %cst_64 = arith.constant dense<0.000000e+00> : vector<24x512xf32>
    %114 = tpu.matmul %113, %38, %cst_64 {dimension_numbers = #tpu.dot_dimension_numbers<[1], [0], [0], [1], [0, 0, 1, 1], [], []>} : vector<24x128xf32>, vector<128x512xf32>, vector<24x512xf32> -> vector<24x512xf32>
    %115 = vector.broadcast %39 : vector<1x512xf32> to vector<24x512xf32>
    %116 = arith.addf %114, %115 : vector<24x512xf32>
    %cst_65 = arith.constant 5.000000e-01 : f32
    %117 = vector.broadcast %cst_65 : f32 to vector<24x512xf32>
    %118 = arith.mulf %117, %116 : vector<24x512xf32>
    %cst_66 = arith.constant 4.471500e-02 : f32
    %119 = vector.broadcast %cst_66 : f32 to vector<24x512xf32>
    %120 = arith.mulf %119, %116 : vector<24x512xf32>
    %121 = arith.mulf %120, %116 : vector<24x512xf32>
    %122 = arith.mulf %121, %116 : vector<24x512xf32>
    %123 = arith.addf %116, %122 : vector<24x512xf32>
    %cst_67 = arith.constant 0.797884583 : f32
    %124 = vector.broadcast %cst_67 : f32 to vector<24x512xf32>
    %125 = arith.mulf %124, %123 : vector<24x512xf32>
    %126 = math.tanh %125 : vector<24x512xf32>
    %cst_68 = arith.constant 1.000000e+00 : f32
    %127 = vector.broadcast %cst_68 : f32 to vector<24x512xf32>
    %128 = arith.addf %127, %126 : vector<24x512xf32>
    %129 = arith.mulf %118, %128 : vector<24x512xf32>
    %cst_69 = arith.constant dense<0.000000e+00> : vector<24x128xf32>
    %130 = tpu.matmul %129, %40, %cst_69 {dimension_numbers = #tpu.dot_dimension_numbers<[1], [0], [0], [1], [0, 0, 1, 1], [], []>} : vector<24x512xf32>, vector<512x128xf32>, vector<24x128xf32> -> vector<24x128xf32>
    %131 = vector.broadcast %41 : vector<1x128xf32> to vector<24x128xf32>
    %132 = arith.addf %130, %131 : vector<24x128xf32>
    %133 = arith.addf %132, %113 : vector<24x128xf32>
    %cst_70 = arith.constant dense<0.000000e+00> : vector<24xf32>
    %134 = vector.multi_reduction <add>, %133, %cst_70 [1] : vector<24x128xf32> to vector<24xf32>
    %135 = vector.shape_cast %134 : vector<24xf32> to vector<24x1xf32>
    %cst_71 = arith.constant 1.280000e+02 : f32
    %136 = vector.broadcast %cst_71 : f32 to vector<24x1xf32>
    %137 = arith.divf %135, %136 : vector<24x1xf32>
    %138 = vector.broadcast %137 : vector<24x1xf32> to vector<24x128xf32>
    %139 = arith.subf %133, %138 : vector<24x128xf32>
    %140 = arith.mulf %139, %139 : vector<24x128xf32>
    %cst_72 = arith.constant dense<0.000000e+00> : vector<24xf32>
    %141 = vector.multi_reduction <add>, %140, %cst_72 [1] : vector<24x128xf32> to vector<24xf32>
    %142 = vector.shape_cast %141 : vector<24xf32> to vector<24x1xf32>
    %cst_73 = arith.constant 1.280000e+02 : f32
    %143 = vector.broadcast %cst_73 : f32 to vector<24x1xf32>
    %144 = arith.divf %142, %143 : vector<24x1xf32>
    %145 = vector.broadcast %137 : vector<24x1xf32> to vector<24x128xf32>
    %146 = arith.subf %133, %145 : vector<24x128xf32>
    %cst_74 = arith.constant 9.99999996E-13 : f32
    %147 = vector.broadcast %cst_74 : f32 to vector<24x1xf32>
    %148 = arith.addf %144, %147 : vector<24x1xf32>
    %149 = math.rsqrt %148 : vector<24x1xf32>
    %150 = vector.broadcast %149 : vector<24x1xf32> to vector<24x128xf32>
    %151 = arith.mulf %146, %150 : vector<24x128xf32>
    %152 = vector.broadcast %42 : vector<1x128xf32> to vector<24x128xf32>
    %153 = arith.mulf %151, %152 : vector<24x128xf32>
    %154 = vector.broadcast %43 : vector<1x128xf32> to vector<24x128xf32>
    %155 = arith.addf %153, %154 : vector<24x128xf32>
    %156 = vector.extract_strided_slice %155 {offsets = [0, 0], sizes = [1, 128], strides = [1, 1]} : vector<24x128xf32> to vector<1x128xf32>
    %157 = vector.extract_strided_slice %155 {offsets = [8, 0], sizes = [1, 128], strides = [1, 1]} : vector<24x128xf32> to vector<1x128xf32>
    %158 = vector.extract_strided_slice %155 {offsets = [16, 0], sizes = [1, 128], strides = [1, 1]} : vector<24x128xf32> to vector<1x128xf32>
    %159 = tpu.concatenate %156, %157, %158 in 0 : vector<1x128xf32>, vector<1x128xf32>, vector<1x128xf32> -> vector<3x128xf32>
    %c0_75 = arith.constant 0 : index
    %c0_76 = arith.constant 0 : index
    %160 = vector.load %arg21[%c0_75, %c0_76] : memref<128x128xf32, #tpu.memory_space<vmem>>, vector<128x128xf32>
    %cst_77 = arith.constant dense<0.000000e+00> : vector<3x128xf32>
    %161 = tpu.matmul %159, %160, %cst_77 {dimension_numbers = #tpu.dot_dimension_numbers<[1], [0], [0], [1], [0, 0, 1, 1], [], []>} : vector<3x128xf32>, vector<128x128xf32>, vector<3x128xf32> -> vector<3x128xf32>
    %c0_78 = arith.constant 0 : index
    %c0_79 = arith.constant 0 : index
    %162 = vector.load %arg22[%c0_78, %c0_79] : memref<1x128xf32, #tpu.memory_space<vmem>>, vector<1x128xf32>
    %163 = vector.broadcast %162 : vector<1x128xf32> to vector<3x128xf32>
    %164 = arith.addf %161, %163 : vector<3x128xf32>
    %165 = math.tanh %164 : vector<3x128xf32>
    %c0_80 = arith.constant 0 : index
    %c0_81 = arith.constant 0 : index
    %c0_82 = arith.constant 0 : index
    %166 = vector.load %arg23[%c0_80, %c0_81, %c0_82] : memref<1x3x128xf32, #tpu.memory_space<vmem>>, vector<1x3x128xf32>
    %167 = vector.shape_cast %166 : vector<1x3x128xf32> to vector<3x128xf32>
    %168 = vector.shape_cast %165 : vector<3x128xf32> to vector<1x3x128xf32>
    tpu.vector_store %arg23[%c0_80, %c0_81, %c0_82], %168 {strides = array<i32>} : memref<1x3x128xf32, #tpu.memory_space<vmem>>, vector<1x3x128xf32>,
    return
  }
  func.func @transform_0(%arg0: i32) -> (i32, i32, i32) {
    %c0_i32 = arith.constant 0 : i32
    %c0_i32_0 = arith.constant 0 : i32
    %c0_i32_1 = arith.constant 0 : i32
    return %arg0, %c0_i32, %c0_i32_0 : i32, i32, i32
  }
  func.func @transform_1(%arg0: i32) -> (i32, i32, i32) {
    %c0_i32 = arith.constant 0 : i32
    %c0_i32_0 = arith.constant 0 : i32
    %c0_i32_1 = arith.constant 0 : i32
    return %arg0, %c0_i32, %c0_i32_0 : i32, i32, i32
  }
  func.func @transform_2(%arg0: i32) -> (i32, i32) {
    %c0_i32 = arith.constant 0 : i32
    %c0_i32_0 = arith.constant 0 : i32
    %c0_i32_1 = arith.constant 0 : i32
    return %c0_i32, %c0_i32_0 : i32, i32
  }
  func.func @transform_3(%arg0: i32) -> (i32, i32) {
    %c0_i32 = arith.constant 0 : i32
    %c0_i32_0 = arith.constant 0 : i32
    %c0_i32_1 = arith.constant 0 : i32
    return %c0_i32, %c0_i32_0 : i32, i32
  }
  func.func @transform_4(%arg0: i32) -> (i32, i32) {
    %c0_i32 = arith.constant 0 : i32
    %c0_i32_0 = arith.constant 0 : i32
    %c0_i32_1 = arith.constant 0 : i32
    return %c0_i32, %c0_i32_0 : i32, i32
  }
  func.func @transform_5(%arg0: i32) -> (i32, i32) {
    %c0_i32 = arith.constant 0 : i32
    %c0_i32_0 = arith.constant 0 : i32
    %c0_i32_1 = arith.constant 0 : i32
    return %c0_i32, %c0_i32_0 : i32, i32
  }
  func.func @transform_6(%arg0: i32) -> (i32, i32) {
    %c0_i32 = arith.constant 0 : i32
    %c0_i32_0 = arith.constant 0 : i32
    %c0_i32_1 = arith.constant 0 : i32
    return %c0_i32, %c0_i32_0 : i32, i32
  }
  func.func @transform_7(%arg0: i32) -> (i32, i32) {
    %c0_i32 = arith.constant 0 : i32
    %c0_i32_0 = arith.constant 0 : i32
    %c0_i32_1 = arith.constant 0 : i32
    return %c0_i32, %c0_i32_0 : i32, i32
  }
  func.func @transform_8(%arg0: i32) -> (i32, i32) {
    %c0_i32 = arith.constant 0 : i32
    %c0_i32_0 = arith.constant 0 : i32
    %c0_i32_1 = arith.constant 0 : i32
    return %c0_i32, %c0_i32_0 : i32, i32
  }
  func.func @transform_9(%arg0: i32) -> (i32, i32) {
    %c0_i32 = arith.constant 0 : i32
    %c0_i32_0 = arith.constant 0 : i32
    %c0_i32_1 = arith.constant 0 : i32
    return %c0_i32, %c0_i32_0 : i32, i32
  }
  func.func @transform_10(%arg0: i32) -> (i32, i32) {
    %c0_i32 = arith.constant 0 : i32
    %c0_i32_0 = arith.constant 0 : i32
    %c0_i32_1 = arith.constant 0 : i32
    return %c0_i32, %c0_i32_0 : i32, i32
  }
  func.func @transform_11(%arg0: i32) -> (i32, i32) {
    %c0_i32 = arith.constant 0 : i32
    %c0_i32_0 = arith.constant 0 : i32
    %c0_i32_1 = arith.constant 0 : i32
    return %c0_i32, %c0_i32_0 : i32, i32
  }
  func.func @transform_12(%arg0: i32) -> (i32, i32) {
    %c0_i32 = arith.constant 0 : i32
    %c0_i32_0 = arith.constant 0 : i32
    %c0_i32_1 = arith.constant 0 : i32
    return %c0_i32, %c0_i32_0 : i32, i32
  }
  func.func @transform_13(%arg0: i32) -> (i32, i32) {
    %c0_i32 = arith.constant 0 : i32
    %c0_i32_0 = arith.constant 0 : i32
    %c0_i32_1 = arith.constant 0 : i32
    return %c0_i32, %c0_i32_0 : i32, i32
  }
  func.func @transform_14(%arg0: i32) -> (i32, i32) {
    %c0_i32 = arith.constant 0 : i32
    %c0_i32_0 = arith.constant 0 : i32
    %c0_i32_1 = arith.constant 0 : i32
    return %c0_i32, %c0_i32_0 : i32, i32
  }
  func.func @transform_15(%arg0: i32) -> (i32, i32) {
    %c0_i32 = arith.constant 0 : i32
    %c0_i32_0 = arith.constant 0 : i32
    %c0_i32_1 = arith.constant 0 : i32
    return %c0_i32, %c0_i32_0 : i32, i32
  }
  func.func @transform_16(%arg0: i32) -> (i32, i32) {
    %c0_i32 = arith.constant 0 : i32
    %c0_i32_0 = arith.constant 0 : i32
    %c0_i32_1 = arith.constant 0 : i32
    return %c0_i32, %c0_i32_0 : i32, i32
  }
  func.func @transform_17(%arg0: i32) -> (i32, i32) {
    %c0_i32 = arith.constant 0 : i32
    %c0_i32_0 = arith.constant 0 : i32
    %c0_i32_1 = arith.constant 0 : i32
    return %c0_i32, %c0_i32_0 : i32, i32
  }
  func.func @transform_18(%arg0: i32) -> (i32, i32) {
    %c0_i32 = arith.constant 0 : i32
    %c0_i32_0 = arith.constant 0 : i32
    %c0_i32_1 = arith.constant 0 : i32
    return %c0_i32, %c0_i32_0 : i32, i32
  }
  func.func @transform_19(%arg0: i32) -> (i32, i32) {
    %c0_i32 = arith.constant 0 : i32
    %c0_i32_0 = arith.constant 0 : i32
    %c0_i32_1 = arith.constant 0 : i32
    return %c0_i32, %c0_i32_0 : i32, i32
  }
  func.func @transform_20(%arg0: i32) -> (i32, i32) {
    %c0_i32 = arith.constant 0 : i32
    %c0_i32_0 = arith.constant 0 : i32
    %c0_i32_1 = arith.constant 0 : i32
    return %c0_i32, %c0_i32_0 : i32, i32
  }
  func.func @transform_21(%arg0: i32) -> (i32, i32) {
    %c0_i32 = arith.constant 0 : i32
    %c0_i32_0 = arith.constant 0 : i32
    %c0_i32_1 = arith.constant 0 : i32
    return %c0_i32, %c0_i32_0 : i32, i32
  }
  func.func @transform_22(%arg0: i32) -> (i32, i32, i32) {
    %c0_i32 = arith.constant 0 : i32
    %c0_i32_0 = arith.constant 0 : i32
    %c0_i32_1 = arith.constant 0 : i32
    return %arg0, %c0_i32, %c0_i32_0 : i32, i32, i32
  }
}

module attributes {stable_mosaic.version = 11 : i64} {
  func.func @fused_bert_kernel(%arg0: i32, %arg1: memref<1x8x128xf32, #tpu.memory_space<vmem>>, %arg2: memref<1x8x8xf32, #tpu.memory_space<vmem>>, %arg3: memref<1x128xf32, #tpu.memory_space<vmem>>, %arg4: memref<1x128xf32, #tpu.memory_space<vmem>>, %arg5: memref<128x128xf32, #tpu.memory_space<vmem>>, %arg6: memref<1x128xf32, #tpu.memory_space<vmem>>, %arg7: memref<128x128xf32, #tpu.memory_space<vmem>>, %arg8: memref<1x128xf32, #tpu.memory_space<vmem>>, %arg9: memref<128x128xf32, #tpu.memory_space<vmem>>, %arg10: memref<1x128xf32, #tpu.memory_space<vmem>>, %arg11: memref<128x128xf32, #tpu.memory_space<vmem>>, %arg12: memref<1x128xf32, #tpu.memory_space<vmem>>, %arg13: memref<1x128xf32, #tpu.memory_space<vmem>>, %arg14: memref<1x128xf32, #tpu.memory_space<vmem>>, %arg15: memref<128x512xf32, #tpu.memory_space<vmem>>, %arg16: memref<1x512xf32, #tpu.memory_space<vmem>>, %arg17: memref<512x128xf32, #tpu.memory_space<vmem>>, %arg18: memref<1x128xf32, #tpu.memory_space<vmem>>, %arg19: memref<1x128xf32, #tpu.memory_space<vmem>>, %arg20: memref<1x128xf32, #tpu.memory_space<vmem>>, %arg21: memref<128x128xf32, #tpu.memory_space<vmem>>, %arg22: memref<1x128xf32, #tpu.memory_space<vmem>>, %arg23: memref<1x1x128xf32, #tpu.memory_space<vmem>>) attributes {dimension_semantics = [#tpu.dimension_semantics<parallel>], iteration_bounds = array<i64: 2>, scalar_prefetch = 0 : i64, scratch_operands = 0 : i64, tpu.core_type = #tpu.core_type<tc>, window_params = [{transform_indices = @transform_0, window_bounds = array<i64: 1, 8, 128>}, {transform_indices = @transform_1, window_bounds = array<i64: 1, 8, 8>}, {pipeline_mode = #tpu.pipeline_mode<synchronous>, transform_indices = @transform_2, window_bounds = array<i64: 1, 128>}, {pipeline_mode = #tpu.pipeline_mode<synchronous>, transform_indices = @transform_3, window_bounds = array<i64: 1, 128>}, {pipeline_mode = #tpu.pipeline_mode<synchronous>, transform_indices = @transform_4, window_bounds = array<i64: 128, 128>}, {pipeline_mode = #tpu.pipeline_mode<synchronous>, transform_indices = @transform_5, window_bounds = array<i64: 1, 128>}, {pipeline_mode = #tpu.pipeline_mode<synchronous>, transform_indices = @transform_6, window_bounds = array<i64: 128, 128>}, {pipeline_mode = #tpu.pipeline_mode<synchronous>, transform_indices = @transform_7, window_bounds = array<i64: 1, 128>}, {pipeline_mode = #tpu.pipeline_mode<synchronous>, transform_indices = @transform_8, window_bounds = array<i64: 128, 128>}, {pipeline_mode = #tpu.pipeline_mode<synchronous>, transform_indices = @transform_9, window_bounds = array<i64: 1, 128>}, {pipeline_mode = #tpu.pipeline_mode<synchronous>, transform_indices = @transform_10, window_bounds = array<i64: 128, 128>}, {pipeline_mode = #tpu.pipeline_mode<synchronous>, transform_indices = @transform_11, window_bounds = array<i64: 1, 128>}, {pipeline_mode = #tpu.pipeline_mode<synchronous>, transform_indices = @transform_12, window_bounds = array<i64: 1, 128>}, {pipeline_mode = #tpu.pipeline_mode<synchronous>, transform_indices = @transform_13, window_bounds = array<i64: 1, 128>}, {pipeline_mode = #tpu.pipeline_mode<synchronous>, transform_indices = @transform_14, window_bounds = array<i64: 128, 512>}, {pipeline_mode = #tpu.pipeline_mode<synchronous>, transform_indices = @transform_15, window_bounds = array<i64: 1, 512>}, {pipeline_mode = #tpu.pipeline_mode<synchronous>, transform_indices = @transform_16, window_bounds = array<i64: 512, 128>}, {pipeline_mode = #tpu.pipeline_mode<synchronous>, transform_indices = @transform_17, window_bounds = array<i64: 1, 128>}, {pipeline_mode = #tpu.pipeline_mode<synchronous>, transform_indices = @transform_18, window_bounds = array<i64: 1, 128>}, {pipeline_mode = #tpu.pipeline_mode<synchronous>, transform_indices = @transform_19, window_bounds = array<i64: 1, 128>}, {pipeline_mode = #tpu.pipeline_mode<synchronous>, transform_indices = @transform_20, window_bounds = array<i64: 128, 128>}, {pipeline_mode = #tpu.pipeline_mode<synchronous>, transform_indices = @transform_21, window_bounds = array<i64: 1, 128>}, {transform_indices = @transform_22, window_bounds = array<i64: 1, 1, 128>}]} {
    %c0 = arith.constant 0 : index
    %c0_0 = arith.constant 0 : index
    %c0_1 = arith.constant 0 : index
    %0 = vector.load %arg1[%c0, %c0_0, %c0_1] : memref<1x8x128xf32, #tpu.memory_space<vmem>>, vector<1x8x128xf32>
    %1 = vector.shape_cast %0 : vector<1x8x128xf32> to vector<8x128xf32>
    %c0_2 = arith.constant 0 : index
    %c0_3 = arith.constant 0 : index
    %2 = vector.load %arg3[%c0_2, %c0_3] : memref<1x128xf32, #tpu.memory_space<vmem>>, vector<1x128xf32>
    %c0_4 = arith.constant 0 : index
    %c0_5 = arith.constant 0 : index
    %3 = vector.load %arg4[%c0_4, %c0_5] : memref<1x128xf32, #tpu.memory_space<vmem>>, vector<1x128xf32>
    %cst = arith.constant dense<0.000000e+00> : vector<8xf32>
    %4 = vector.multi_reduction <add>, %1, %cst [1] : vector<8x128xf32> to vector<8xf32>
    %5 = vector.shape_cast %4 : vector<8xf32> to vector<8x1xf32>
    %cst_6 = arith.constant 1.280000e+02 : f32
    %6 = vector.broadcast %cst_6 : f32 to vector<8x1xf32>
    %7 = arith.divf %5, %6 : vector<8x1xf32>
    %8 = vector.broadcast %7 : vector<8x1xf32> to vector<8x128xf32>
    %9 = arith.subf %1, %8 : vector<8x128xf32>
    %10 = arith.mulf %9, %9 : vector<8x128xf32>
    %cst_7 = arith.constant dense<0.000000e+00> : vector<8xf32>
    %11 = vector.multi_reduction <add>, %10, %cst_7 [1] : vector<8x128xf32> to vector<8xf32>
    %12 = vector.shape_cast %11 : vector<8xf32> to vector<8x1xf32>
    %cst_8 = arith.constant 1.280000e+02 : f32
    %13 = vector.broadcast %cst_8 : f32 to vector<8x1xf32>
    %14 = arith.divf %12, %13 : vector<8x1xf32>
    %15 = vector.broadcast %7 : vector<8x1xf32> to vector<8x128xf32>
    %16 = arith.subf %1, %15 : vector<8x128xf32>
    %cst_9 = arith.constant 9.99999996E-13 : f32
    %17 = vector.broadcast %cst_9 : f32 to vector<8x1xf32>
    %18 = arith.addf %14, %17 : vector<8x1xf32>
    %19 = math.rsqrt %18 : vector<8x1xf32>
    %20 = vector.broadcast %19 : vector<8x1xf32> to vector<8x128xf32>
    %21 = arith.mulf %16, %20 : vector<8x128xf32>
    %22 = vector.broadcast %2 : vector<1x128xf32> to vector<8x128xf32>
    %23 = arith.mulf %21, %22 : vector<8x128xf32>
    %24 = vector.broadcast %3 : vector<1x128xf32> to vector<8x128xf32>
    %25 = arith.addf %23, %24 : vector<8x128xf32>
    %c0_10 = arith.constant 0 : index
    %c0_11 = arith.constant 0 : index
    %c0_12 = arith.constant 0 : index
    %26 = vector.load %arg2[%c0_10, %c0_11, %c0_12] : memref<1x8x8xf32, #tpu.memory_space<vmem>>, vector<1x8x8xf32>
    %27 = vector.shape_cast %26 : vector<1x8x8xf32> to vector<8x8xf32>
    %c0_13 = arith.constant 0 : index
    %c0_14 = arith.constant 0 : index
    %28 = vector.load %arg5[%c0_13, %c0_14] : memref<128x128xf32, #tpu.memory_space<vmem>>, vector<128x128xf32>
    %c0_15 = arith.constant 0 : index
    %c0_16 = arith.constant 0 : index
    %29 = vector.load %arg6[%c0_15, %c0_16] : memref<1x128xf32, #tpu.memory_space<vmem>>, vector<1x128xf32>
    %c0_17 = arith.constant 0 : index
    %c0_18 = arith.constant 0 : index
    %30 = vector.load %arg7[%c0_17, %c0_18] : memref<128x128xf32, #tpu.memory_space<vmem>>, vector<128x128xf32>
    %c0_19 = arith.constant 0 : index
    %c0_20 = arith.constant 0 : index
    %31 = vector.load %arg8[%c0_19, %c0_20] : memref<1x128xf32, #tpu.memory_space<vmem>>, vector<1x128xf32>
    %c0_21 = arith.constant 0 : index
    %c0_22 = arith.constant 0 : index
    %32 = vector.load %arg9[%c0_21, %c0_22] : memref<128x128xf32, #tpu.memory_space<vmem>>, vector<128x128xf32>
    %c0_23 = arith.constant 0 : index
    %c0_24 = arith.constant 0 : index
    %33 = vector.load %arg10[%c0_23, %c0_24] : memref<1x128xf32, #tpu.memory_space<vmem>>, vector<1x128xf32>
    %c0_25 = arith.constant 0 : index
    %c0_26 = arith.constant 0 : index
    %34 = vector.load %arg11[%c0_25, %c0_26] : memref<128x128xf32, #tpu.memory_space<vmem>>, vector<128x128xf32>
    %c0_27 = arith.constant 0 : index
    %c0_28 = arith.constant 0 : index
    %35 = vector.load %arg12[%c0_27, %c0_28] : memref<1x128xf32, #tpu.memory_space<vmem>>, vector<1x128xf32>
    %c0_29 = arith.constant 0 : index
    %c0_30 = arith.constant 0 : index
    %36 = vector.load %arg13[%c0_29, %c0_30] : memref<1x128xf32, #tpu.memory_space<vmem>>, vector<1x128xf32>
    %c0_31 = arith.constant 0 : index
    %c0_32 = arith.constant 0 : index
    %37 = vector.load %arg14[%c0_31, %c0_32] : memref<1x128xf32, #tpu.memory_space<vmem>>, vector<1x128xf32>
    %c0_33 = arith.constant 0 : index
    %c0_34 = arith.constant 0 : index
    %38 = vector.load %arg15[%c0_33, %c0_34] : memref<128x512xf32, #tpu.memory_space<vmem>>, vector<128x512xf32>
    %c0_35 = arith.constant 0 : index
    %c0_36 = arith.constant 0 : index
    %39 = vector.load %arg16[%c0_35, %c0_36] : memref<1x512xf32, #tpu.memory_space<vmem>>, vector<1x512xf32>
    %c0_37 = arith.constant 0 : index
    %c0_38 = arith.constant 0 : index
    %40 = vector.load %arg17[%c0_37, %c0_38] : memref<512x128xf32, #tpu.memory_space<vmem>>, vector<512x128xf32>
    %c0_39 = arith.constant 0 : index
    %c0_40 = arith.constant 0 : index
    %41 = vector.load %arg18[%c0_39, %c0_40] : memref<1x128xf32, #tpu.memory_space<vmem>>, vector<1x128xf32>
    %c0_41 = arith.constant 0 : index
    %c0_42 = arith.constant 0 : index
    %42 = vector.load %arg19[%c0_41, %c0_42] : memref<1x128xf32, #tpu.memory_space<vmem>>, vector<1x128xf32>
    %c0_43 = arith.constant 0 : index
    %c0_44 = arith.constant 0 : index
    %43 = vector.load %arg20[%c0_43, %c0_44] : memref<1x128xf32, #tpu.memory_space<vmem>>, vector<1x128xf32>
    %cst_45 = arith.constant dense<0.000000e+00> : vector<8x128xf32>
    %44 = tpu.matmul %25, %28, %cst_45 {dimension_numbers = #tpu.dot_dimension_numbers<[1], [0], [0], [1], [0, 0, 1, 1], [], []>} : vector<8x128xf32>, vector<128x128xf32>, vector<8x128xf32> -> vector<8x128xf32>
    %45 = vector.broadcast %29 : vector<1x128xf32> to vector<8x128xf32>
    %46 = arith.addf %44, %45 : vector<8x128xf32>
    %cst_46 = arith.constant dense<0.000000e+00> : vector<8x128xf32>
    %47 = tpu.matmul %25, %30, %cst_46 {dimension_numbers = #tpu.dot_dimension_numbers<[1], [0], [0], [1], [0, 0, 1, 1], [], []>} : vector<8x128xf32>, vector<128x128xf32>, vector<8x128xf32> -> vector<8x128xf32>
    %48 = vector.broadcast %31 : vector<1x128xf32> to vector<8x128xf32>
    %49 = arith.addf %47, %48 : vector<8x128xf32>
    %cst_47 = arith.constant dense<0.000000e+00> : vector<8x128xf32>
    %50 = tpu.matmul %25, %32, %cst_47 {dimension_numbers = #tpu.dot_dimension_numbers<[1], [0], [0], [1], [0, 0, 1, 1], [], []>} : vector<8x128xf32>, vector<128x128xf32>, vector<8x128xf32> -> vector<8x128xf32>
    %51 = vector.broadcast %33 : vector<1x128xf32> to vector<8x128xf32>
    %52 = arith.addf %50, %51 : vector<8x128xf32>
    %53 = vector.extract_strided_slice %46 {offsets = [0, 0], sizes = [8, 64], strides = [1, 1]} : vector<8x128xf32> to vector<8x64xf32>
    %54 = vector.extract_strided_slice %49 {offsets = [0, 0], sizes = [8, 64], strides = [1, 1]} : vector<8x128xf32> to vector<8x64xf32>
    %55 = vector.extract_strided_slice %52 {offsets = [0, 0], sizes = [8, 64], strides = [1, 1]} : vector<8x128xf32> to vector<8x64xf32>
    %cst_48 = arith.constant dense<0.000000e+00> : vector<8x8xf32>
    %56 = tpu.matmul %53, %54, %cst_48 {dimension_numbers = #tpu.dot_dimension_numbers<[1], [1], [0], [0], [0, 0, 1, 0], [], []>} : vector<8x64xf32>, vector<8x64xf32>, vector<8x8xf32> -> vector<8x8xf32>
    %cst_49 = arith.constant 1.250000e-01 : f32
    %57 = vector.broadcast %cst_49 : f32 to vector<8x8xf32>
    %58 = arith.mulf %56, %57 : vector<8x8xf32>
    %59 = arith.addf %58, %27 : vector<8x8xf32>
    %cst_50 = arith.constant dense<0xFF800000> : vector<8xf32>
    %60 = vector.multi_reduction <maximumf>, %59, %cst_50 [1] : vector<8x8xf32> to vector<8xf32>
    %61 = vector.shape_cast %60 : vector<8xf32> to vector<8x1xf32>
    %62 = vector.broadcast %61 : vector<8x1xf32> to vector<8x8xf32>
    %63 = arith.subf %59, %62 : vector<8x8xf32>
    %64 = math.exp %63 : vector<8x8xf32>
    %cst_51 = arith.constant dense<0.000000e+00> : vector<8xf32>
    %65 = vector.multi_reduction <add>, %64, %cst_51 [1] : vector<8x8xf32> to vector<8xf32>
    %66 = vector.shape_cast %65 : vector<8xf32> to vector<8x1xf32>
    %67 = vector.broadcast %66 : vector<8x1xf32> to vector<8x8xf32>
    %68 = arith.divf %64, %67 : vector<8x8xf32>
    %cst_52 = arith.constant dense<0.000000e+00> : vector<8x64xf32>
    %69 = tpu.matmul %68, %55, %cst_52 {dimension_numbers = #tpu.dot_dimension_numbers<[1], [0], [0], [1], [0, 0, 1, 1], [], []>} : vector<8x8xf32>, vector<8x64xf32>, vector<8x64xf32> -> vector<8x64xf32>
    %70 = vector.extract_strided_slice %46 {offsets = [0, 64], sizes = [8, 64], strides = [1, 1]} : vector<8x128xf32> to vector<8x64xf32>
    %71 = vector.extract_strided_slice %49 {offsets = [0, 64], sizes = [8, 64], strides = [1, 1]} : vector<8x128xf32> to vector<8x64xf32>
    %72 = vector.extract_strided_slice %52 {offsets = [0, 64], sizes = [8, 64], strides = [1, 1]} : vector<8x128xf32> to vector<8x64xf32>
    %cst_53 = arith.constant dense<0.000000e+00> : vector<8x8xf32>
    %73 = tpu.matmul %70, %71, %cst_53 {dimension_numbers = #tpu.dot_dimension_numbers<[1], [1], [0], [0], [0, 0, 1, 0], [], []>} : vector<8x64xf32>, vector<8x64xf32>, vector<8x8xf32> -> vector<8x8xf32>
    %cst_54 = arith.constant 1.250000e-01 : f32
    %74 = vector.broadcast %cst_54 : f32 to vector<8x8xf32>
    %75 = arith.mulf %73, %74 : vector<8x8xf32>
    %76 = arith.addf %75, %27 : vector<8x8xf32>
    %cst_55 = arith.constant dense<0xFF800000> : vector<8xf32>
    %77 = vector.multi_reduction <maximumf>, %76, %cst_55 [1] : vector<8x8xf32> to vector<8xf32>
    %78 = vector.shape_cast %77 : vector<8xf32> to vector<8x1xf32>
    %79 = vector.broadcast %78 : vector<8x1xf32> to vector<8x8xf32>
    %80 = arith.subf %76, %79 : vector<8x8xf32>
    %81 = math.exp %80 : vector<8x8xf32>
    %cst_56 = arith.constant dense<0.000000e+00> : vector<8xf32>
    %82 = vector.multi_reduction <add>, %81, %cst_56 [1] : vector<8x8xf32> to vector<8xf32>
    %83 = vector.shape_cast %82 : vector<8xf32> to vector<8x1xf32>
    %84 = vector.broadcast %83 : vector<8x1xf32> to vector<8x8xf32>
    %85 = arith.divf %81, %84 : vector<8x8xf32>
    %cst_57 = arith.constant dense<0.000000e+00> : vector<8x64xf32>
    %86 = tpu.matmul %85, %72, %cst_57 {dimension_numbers = #tpu.dot_dimension_numbers<[1], [0], [0], [1], [0, 0, 1, 1], [], []>} : vector<8x8xf32>, vector<8x64xf32>, vector<8x64xf32> -> vector<8x64xf32>
    %87 = tpu.concatenate %69, %86 in 1 : vector<8x64xf32>, vector<8x64xf32> -> vector<8x128xf32>
    %cst_58 = arith.constant dense<0.000000e+00> : vector<8x128xf32>
    %88 = tpu.matmul %87, %34, %cst_58 {dimension_numbers = #tpu.dot_dimension_numbers<[1], [0], [0], [1], [0, 0, 1, 1], [], []>} : vector<8x128xf32>, vector<128x128xf32>, vector<8x128xf32> -> vector<8x128xf32>
    %89 = vector.broadcast %35 : vector<1x128xf32> to vector<8x128xf32>
    %90 = arith.addf %88, %89 : vector<8x128xf32>
    %91 = arith.addf %90, %25 : vector<8x128xf32>
    %cst_59 = arith.constant dense<0.000000e+00> : vector<8xf32>
    %92 = vector.multi_reduction <add>, %91, %cst_59 [1] : vector<8x128xf32> to vector<8xf32>
    %93 = vector.shape_cast %92 : vector<8xf32> to vector<8x1xf32>
    %cst_60 = arith.constant 1.280000e+02 : f32
    %94 = vector.broadcast %cst_60 : f32 to vector<8x1xf32>
    %95 = arith.divf %93, %94 : vector<8x1xf32>
    %96 = vector.broadcast %95 : vector<8x1xf32> to vector<8x128xf32>
    %97 = arith.subf %91, %96 : vector<8x128xf32>
    %98 = arith.mulf %97, %97 : vector<8x128xf32>
    %cst_61 = arith.constant dense<0.000000e+00> : vector<8xf32>
    %99 = vector.multi_reduction <add>, %98, %cst_61 [1] : vector<8x128xf32> to vector<8xf32>
    %100 = vector.shape_cast %99 : vector<8xf32> to vector<8x1xf32>
    %cst_62 = arith.constant 1.280000e+02 : f32
    %101 = vector.broadcast %cst_62 : f32 to vector<8x1xf32>
    %102 = arith.divf %100, %101 : vector<8x1xf32>
    %103 = vector.broadcast %95 : vector<8x1xf32> to vector<8x128xf32>
    %104 = arith.subf %91, %103 : vector<8x128xf32>
    %cst_63 = arith.constant 9.99999996E-13 : f32
    %105 = vector.broadcast %cst_63 : f32 to vector<8x1xf32>
    %106 = arith.addf %102, %105 : vector<8x1xf32>
    %107 = math.rsqrt %106 : vector<8x1xf32>
    %108 = vector.broadcast %107 : vector<8x1xf32> to vector<8x128xf32>
    %109 = arith.mulf %104, %108 : vector<8x128xf32>
    %110 = vector.broadcast %36 : vector<1x128xf32> to vector<8x128xf32>
    %111 = arith.mulf %109, %110 : vector<8x128xf32>
    %112 = vector.broadcast %37 : vector<1x128xf32> to vector<8x128xf32>
    %113 = arith.addf %111, %112 : vector<8x128xf32>
    %cst_64 = arith.constant dense<0.000000e+00> : vector<8x512xf32>
    %114 = tpu.matmul %113, %38, %cst_64 {dimension_numbers = #tpu.dot_dimension_numbers<[1], [0], [0], [1], [0, 0, 1, 1], [], []>} : vector<8x128xf32>, vector<128x512xf32>, vector<8x512xf32> -> vector<8x512xf32>
    %115 = vector.broadcast %39 : vector<1x512xf32> to vector<8x512xf32>
    %116 = arith.addf %114, %115 : vector<8x512xf32>
    %cst_65 = arith.constant 5.000000e-01 : f32
    %117 = vector.broadcast %cst_65 : f32 to vector<8x512xf32>
    %118 = arith.mulf %117, %116 : vector<8x512xf32>
    %cst_66 = arith.constant 4.471500e-02 : f32
    %119 = vector.broadcast %cst_66 : f32 to vector<8x512xf32>
    %120 = arith.mulf %119, %116 : vector<8x512xf32>
    %121 = arith.mulf %120, %116 : vector<8x512xf32>
    %122 = arith.mulf %121, %116 : vector<8x512xf32>
    %123 = arith.addf %116, %122 : vector<8x512xf32>
    %cst_67 = arith.constant 0.797884583 : f32
    %124 = vector.broadcast %cst_67 : f32 to vector<8x512xf32>
    %125 = arith.mulf %124, %123 : vector<8x512xf32>
    %126 = math.tanh %125 : vector<8x512xf32>
    %cst_68 = arith.constant 1.000000e+00 : f32
    %127 = vector.broadcast %cst_68 : f32 to vector<8x512xf32>
    %128 = arith.addf %127, %126 : vector<8x512xf32>
    %129 = arith.mulf %118, %128 : vector<8x512xf32>
    %cst_69 = arith.constant dense<0.000000e+00> : vector<8x128xf32>
    %130 = tpu.matmul %129, %40, %cst_69 {dimension_numbers = #tpu.dot_dimension_numbers<[1], [0], [0], [1], [0, 0, 1, 1], [], []>} : vector<8x512xf32>, vector<512x128xf32>, vector<8x128xf32> -> vector<8x128xf32>
    %131 = vector.broadcast %41 : vector<1x128xf32> to vector<8x128xf32>
    %132 = arith.addf %130, %131 : vector<8x128xf32>
    %133 = arith.addf %132, %113 : vector<8x128xf32>
    %cst_70 = arith.constant dense<0.000000e+00> : vector<8xf32>
    %134 = vector.multi_reduction <add>, %133, %cst_70 [1] : vector<8x128xf32> to vector<8xf32>
    %135 = vector.shape_cast %134 : vector<8xf32> to vector<8x1xf32>
    %cst_71 = arith.constant 1.280000e+02 : f32
    %136 = vector.broadcast %cst_71 : f32 to vector<8x1xf32>
    %137 = arith.divf %135, %136 : vector<8x1xf32>
    %138 = vector.broadcast %137 : vector<8x1xf32> to vector<8x128xf32>
    %139 = arith.subf %133, %138 : vector<8x128xf32>
    %140 = arith.mulf %139, %139 : vector<8x128xf32>
    %cst_72 = arith.constant dense<0.000000e+00> : vector<8xf32>
    %141 = vector.multi_reduction <add>, %140, %cst_72 [1] : vector<8x128xf32> to vector<8xf32>
    %142 = vector.shape_cast %141 : vector<8xf32> to vector<8x1xf32>
    %cst_73 = arith.constant 1.280000e+02 : f32
    %143 = vector.broadcast %cst_73 : f32 to vector<8x1xf32>
    %144 = arith.divf %142, %143 : vector<8x1xf32>
    %145 = vector.broadcast %137 : vector<8x1xf32> to vector<8x128xf32>
    %146 = arith.subf %133, %145 : vector<8x128xf32>
    %cst_74 = arith.constant 9.99999996E-13 : f32
    %147 = vector.broadcast %cst_74 : f32 to vector<8x1xf32>
    %148 = arith.addf %144, %147 : vector<8x1xf32>
    %149 = math.rsqrt %148 : vector<8x1xf32>
    %150 = vector.broadcast %149 : vector<8x1xf32> to vector<8x128xf32>
    %151 = arith.mulf %146, %150 : vector<8x128xf32>
    %152 = vector.broadcast %42 : vector<1x128xf32> to vector<8x128xf32>
    %153 = arith.mulf %151, %152 : vector<8x128xf32>
    %154 = vector.broadcast %43 : vector<1x128xf32> to vector<8x128xf32>
    %155 = arith.addf %153, %154 : vector<8x128xf32>
    %156 = vector.extract_strided_slice %155 {offsets = [0, 0], sizes = [1, 128], strides = [1, 1]} : vector<8x128xf32> to vector<1x128xf32>
    %c0_75 = arith.constant 0 : index
    %c0_76 = arith.constant 0 : index
    %157 = vector.load %arg21[%c0_75, %c0_76] : memref<128x128xf32, #tpu.memory_space<vmem>>, vector<128x128xf32>
    %cst_77 = arith.constant dense<0.000000e+00> : vector<1x128xf32>
    %158 = tpu.matmul %156, %157, %cst_77 {dimension_numbers = #tpu.dot_dimension_numbers<[1], [0], [0], [1], [0, 0, 1, 1], [], []>} : vector<1x128xf32>, vector<128x128xf32>, vector<1x128xf32> -> vector<1x128xf32>
    %c0_78 = arith.constant 0 : index
    %c0_79 = arith.constant 0 : index
    %159 = vector.load %arg22[%c0_78, %c0_79] : memref<1x128xf32, #tpu.memory_space<vmem>>, vector<1x128xf32>
    %160 = arith.addf %158, %159 : vector<1x128xf32>
    %161 = math.tanh %160 : vector<1x128xf32>
    %c0_80 = arith.constant 0 : index
    %c0_81 = arith.constant 0 : index
    %c0_82 = arith.constant 0 : index
    %162 = vector.load %arg23[%c0_80, %c0_81, %c0_82] : memref<1x1x128xf32, #tpu.memory_space<vmem>>, vector<1x1x128xf32>
    %163 = vector.shape_cast %162 : vector<1x1x128xf32> to vector<1x128xf32>
    %164 = vector.shape_cast %161 : vector<1x128xf32> to vector<1x1x128xf32>
    tpu.vector_store %arg23[%c0_80, %c0_81, %c0_82], %164 {strides = array<i32>} : memref<1x1x128xf32, #tpu.memory_space<vmem>>, vector<1x1x128xf32>,
    return
  }
  func.func @transform_0(%arg0: i32) -> (i32, i32, i32) {
    %c0_i32 = arith.constant 0 : i32
    %c0_i32_0 = arith.constant 0 : i32
    %c0_i32_1 = arith.constant 0 : i32
    return %arg0, %c0_i32, %c0_i32_0 : i32, i32, i32
  }
  func.func @transform_1(%arg0: i32) -> (i32, i32, i32) {
    %c0_i32 = arith.constant 0 : i32
    %c0_i32_0 = arith.constant 0 : i32
    %c0_i32_1 = arith.constant 0 : i32
    return %arg0, %c0_i32, %c0_i32_0 : i32, i32, i32
  }
  func.func @transform_2(%arg0: i32) -> (i32, i32) {
    %c0_i32 = arith.constant 0 : i32
    %c0_i32_0 = arith.constant 0 : i32
    %c0_i32_1 = arith.constant 0 : i32
    return %c0_i32, %c0_i32_0 : i32, i32
  }
  func.func @transform_3(%arg0: i32) -> (i32, i32) {
    %c0_i32 = arith.constant 0 : i32
    %c0_i32_0 = arith.constant 0 : i32
    %c0_i32_1 = arith.constant 0 : i32
    return %c0_i32, %c0_i32_0 : i32, i32
  }
  func.func @transform_4(%arg0: i32) -> (i32, i32) {
    %c0_i32 = arith.constant 0 : i32
    %c0_i32_0 = arith.constant 0 : i32
    %c0_i32_1 = arith.constant 0 : i32
    return %c0_i32, %c0_i32_0 : i32, i32
  }
  func.func @transform_5(%arg0: i32) -> (i32, i32) {
    %c0_i32 = arith.constant 0 : i32
    %c0_i32_0 = arith.constant 0 : i32
    %c0_i32_1 = arith.constant 0 : i32
    return %c0_i32, %c0_i32_0 : i32, i32
  }
  func.func @transform_6(%arg0: i32) -> (i32, i32) {
    %c0_i32 = arith.constant 0 : i32
    %c0_i32_0 = arith.constant 0 : i32
    %c0_i32_1 = arith.constant 0 : i32
    return %c0_i32, %c0_i32_0 : i32, i32
  }
  func.func @transform_7(%arg0: i32) -> (i32, i32) {
    %c0_i32 = arith.constant 0 : i32
    %c0_i32_0 = arith.constant 0 : i32
    %c0_i32_1 = arith.constant 0 : i32
    return %c0_i32, %c0_i32_0 : i32, i32
  }
  func.func @transform_8(%arg0: i32) -> (i32, i32) {
    %c0_i32 = arith.constant 0 : i32
    %c0_i32_0 = arith.constant 0 : i32
    %c0_i32_1 = arith.constant 0 : i32
    return %c0_i32, %c0_i32_0 : i32, i32
  }
  func.func @transform_9(%arg0: i32) -> (i32, i32) {
    %c0_i32 = arith.constant 0 : i32
    %c0_i32_0 = arith.constant 0 : i32
    %c0_i32_1 = arith.constant 0 : i32
    return %c0_i32, %c0_i32_0 : i32, i32
  }
  func.func @transform_10(%arg0: i32) -> (i32, i32) {
    %c0_i32 = arith.constant 0 : i32
    %c0_i32_0 = arith.constant 0 : i32
    %c0_i32_1 = arith.constant 0 : i32
    return %c0_i32, %c0_i32_0 : i32, i32
  }
  func.func @transform_11(%arg0: i32) -> (i32, i32) {
    %c0_i32 = arith.constant 0 : i32
    %c0_i32_0 = arith.constant 0 : i32
    %c0_i32_1 = arith.constant 0 : i32
    return %c0_i32, %c0_i32_0 : i32, i32
  }
  func.func @transform_12(%arg0: i32) -> (i32, i32) {
    %c0_i32 = arith.constant 0 : i32
    %c0_i32_0 = arith.constant 0 : i32
    %c0_i32_1 = arith.constant 0 : i32
    return %c0_i32, %c0_i32_0 : i32, i32
  }
  func.func @transform_13(%arg0: i32) -> (i32, i32) {
    %c0_i32 = arith.constant 0 : i32
    %c0_i32_0 = arith.constant 0 : i32
    %c0_i32_1 = arith.constant 0 : i32
    return %c0_i32, %c0_i32_0 : i32, i32
  }
  func.func @transform_14(%arg0: i32) -> (i32, i32) {
    %c0_i32 = arith.constant 0 : i32
    %c0_i32_0 = arith.constant 0 : i32
    %c0_i32_1 = arith.constant 0 : i32
    return %c0_i32, %c0_i32_0 : i32, i32
  }
  func.func @transform_15(%arg0: i32) -> (i32, i32) {
    %c0_i32 = arith.constant 0 : i32
    %c0_i32_0 = arith.constant 0 : i32
    %c0_i32_1 = arith.constant 0 : i32
    return %c0_i32, %c0_i32_0 : i32, i32
  }
  func.func @transform_16(%arg0: i32) -> (i32, i32) {
    %c0_i32 = arith.constant 0 : i32
    %c0_i32_0 = arith.constant 0 : i32
    %c0_i32_1 = arith.constant 0 : i32
    return %c0_i32, %c0_i32_0 : i32, i32
  }
  func.func @transform_17(%arg0: i32) -> (i32, i32) {
    %c0_i32 = arith.constant 0 : i32
    %c0_i32_0 = arith.constant 0 : i32
    %c0_i32_1 = arith.constant 0 : i32
    return %c0_i32, %c0_i32_0 : i32, i32
  }
  func.func @transform_18(%arg0: i32) -> (i32, i32) {
    %c0_i32 = arith.constant 0 : i32
    %c0_i32_0 = arith.constant 0 : i32
    %c0_i32_1 = arith.constant 0 : i32
    return %c0_i32, %c0_i32_0 : i32, i32
  }
  func.func @transform_19(%arg0: i32) -> (i32, i32) {
    %c0_i32 = arith.constant 0 : i32
    %c0_i32_0 = arith.constant 0 : i32
    %c0_i32_1 = arith.constant 0 : i32
    return %c0_i32, %c0_i32_0 : i32, i32
  }
  func.func @transform_20(%arg0: i32) -> (i32, i32) {
    %c0_i32 = arith.constant 0 : i32
    %c0_i32_0 = arith.constant 0 : i32
    %c0_i32_1 = arith.constant 0 : i32
    return %c0_i32, %c0_i32_0 : i32, i32
  }
  func.func @transform_21(%arg0: i32) -> (i32, i32) {
    %c0_i32 = arith.constant 0 : i32
    %c0_i32_0 = arith.constant 0 : i32
    %c0_i32_1 = arith.constant 0 : i32
    return %c0_i32, %c0_i32_0 : i32, i32
  }
  func.func @transform_22(%arg0: i32) -> (i32, i32, i32) {
    %c0_i32 = arith.constant 0 : i32
    %c0_i32_0 = arith.constant 0 : i32
    %c0_i32_1 = arith.constant 0 : i32
    return %arg0, %c0_i32, %c0_i32_0 : i32, i32, i32
  }
}

module attributes {stable_mosaic.version = 11 : i64} {
  func.func @combine_fc_kernel(%arg0: i32, %arg1: memref<1x4x128xf32, #tpu.memory_space<vmem>>, %arg2: memref<4x128xf32, #tpu.memory_space<vmem>>, %arg3: memref<1x128xf32, #tpu.memory_space<vmem>>, %arg4: memref<1x128xf32, #tpu.memory_space<vmem>>, %arg5: memref<128x128xf32, #tpu.memory_space<vmem>>, %arg6: memref<1x128xf32, #tpu.memory_space<vmem>>, %arg7: memref<128x128xf32, #tpu.memory_space<vmem>>, %arg8: memref<1x128xf32, #tpu.memory_space<vmem>>, %arg9: memref<128x128xf32, #tpu.memory_space<vmem>>, %arg10: memref<1x128xf32, #tpu.memory_space<vmem>>, %arg11: memref<128x128xf32, #tpu.memory_space<vmem>>, %arg12: memref<1x128xf32, #tpu.memory_space<vmem>>, %arg13: memref<1x128xf32, #tpu.memory_space<vmem>>, %arg14: memref<1x128xf32, #tpu.memory_space<vmem>>, %arg15: memref<128x512xf32, #tpu.memory_space<vmem>>, %arg16: memref<1x512xf32, #tpu.memory_space<vmem>>, %arg17: memref<512x128xf32, #tpu.memory_space<vmem>>, %arg18: memref<1x128xf32, #tpu.memory_space<vmem>>, %arg19: memref<1x128xf32, #tpu.memory_space<vmem>>, %arg20: memref<1x128xf32, #tpu.memory_space<vmem>>, %arg21: memref<128x256xf32, #tpu.memory_space<vmem>>, %arg22: memref<1x256xf32, #tpu.memory_space<vmem>>, %arg23: memref<256x128xf32, #tpu.memory_space<vmem>>, %arg24: memref<1x128xf32, #tpu.memory_space<vmem>>, %arg25: memref<1x1x128xf32, #tpu.memory_space<vmem>>, %arg26: memref<1x1x256xf32, #tpu.memory_space<vmem>>) attributes {dimension_semantics = [#tpu.dimension_semantics<parallel>], iteration_bounds = array<i64: 2>, scalar_prefetch = 0 : i64, scratch_operands = 0 : i64, tpu.core_type = #tpu.core_type<tc>, window_params = [{transform_indices = @transform_0, window_bounds = array<i64: 1, 4, 128>}, {pipeline_mode = #tpu.pipeline_mode<synchronous>, transform_indices = @transform_1, window_bounds = array<i64: 4, 128>}, {pipeline_mode = #tpu.pipeline_mode<synchronous>, transform_indices = @transform_2, window_bounds = array<i64: 1, 128>}, {pipeline_mode = #tpu.pipeline_mode<synchronous>, transform_indices = @transform_3, window_bounds = array<i64: 1, 128>}, {pipeline_mode = #tpu.pipeline_mode<synchronous>, transform_indices = @transform_4, window_bounds = array<i64: 128, 128>}, {pipeline_mode = #tpu.pipeline_mode<synchronous>, transform_indices = @transform_5, window_bounds = array<i64: 1, 128>}, {pipeline_mode = #tpu.pipeline_mode<synchronous>, transform_indices = @transform_6, window_bounds = array<i64: 128, 128>}, {pipeline_mode = #tpu.pipeline_mode<synchronous>, transform_indices = @transform_7, window_bounds = array<i64: 1, 128>}, {pipeline_mode = #tpu.pipeline_mode<synchronous>, transform_indices = @transform_8, window_bounds = array<i64: 128, 128>}, {pipeline_mode = #tpu.pipeline_mode<synchronous>, transform_indices = @transform_9, window_bounds = array<i64: 1, 128>}, {pipeline_mode = #tpu.pipeline_mode<synchronous>, transform_indices = @transform_10, window_bounds = array<i64: 128, 128>}, {pipeline_mode = #tpu.pipeline_mode<synchronous>, transform_indices = @transform_11, window_bounds = array<i64: 1, 128>}, {pipeline_mode = #tpu.pipeline_mode<synchronous>, transform_indices = @transform_12, window_bounds = array<i64: 1, 128>}, {pipeline_mode = #tpu.pipeline_mode<synchronous>, transform_indices = @transform_13, window_bounds = array<i64: 1, 128>}, {pipeline_mode = #tpu.pipeline_mode<synchronous>, transform_indices = @transform_14, window_bounds = array<i64: 128, 512>}, {pipeline_mode = #tpu.pipeline_mode<synchronous>, transform_indices = @transform_15, window_bounds = array<i64: 1, 512>}, {pipeline_mode = #tpu.pipeline_mode<synchronous>, transform_indices = @transform_16, window_bounds = array<i64: 512, 128>}, {pipeline_mode = #tpu.pipeline_mode<synchronous>, transform_indices = @transform_17, window_bounds = array<i64: 1, 128>}, {pipeline_mode = #tpu.pipeline_mode<synchronous>, transform_indices = @transform_18, window_bounds = array<i64: 1, 128>}, {pipeline_mode = #tpu.pipeline_mode<synchronous>, transform_indices = @transform_19, window_bounds = array<i64: 1, 128>}, {pipeline_mode = #tpu.pipeline_mode<synchronous>, transform_indices = @transform_20, window_bounds = array<i64: 128, 256>}, {pipeline_mode = #tpu.pipeline_mode<synchronous>, transform_indices = @transform_21, window_bounds = array<i64: 1, 256>}, {pipeline_mode = #tpu.pipeline_mode<synchronous>, transform_indices = @transform_22, window_bounds = array<i64: 256, 128>}, {pipeline_mode = #tpu.pipeline_mode<synchronous>, transform_indices = @transform_23, window_bounds = array<i64: 1, 128>}, {transform_indices = @transform_24, window_bounds = array<i64: 1, 1, 128>}, {transform_indices = @transform_25, window_bounds = array<i64: 1, 1, 256>}]} {
    %c0 = arith.constant 0 : index
    %c0_0 = arith.constant 0 : index
    %c0_1 = arith.constant 0 : index
    %0 = vector.load %arg1[%c0, %c0_0, %c0_1] : memref<1x4x128xf32, #tpu.memory_space<vmem>>, vector<1x4x128xf32>
    %1 = vector.shape_cast %0 : vector<1x4x128xf32> to vector<4x128xf32>
    %c0_2 = arith.constant 0 : index
    %c0_3 = arith.constant 0 : index
    %2 = vector.load %arg2[%c0_2, %c0_3] : memref<4x128xf32, #tpu.memory_space<vmem>>, vector<4x128xf32>
    %3 = arith.addf %1, %2 : vector<4x128xf32>
    %c0_4 = arith.constant 0 : index
    %c0_5 = arith.constant 0 : index
    %4 = vector.load %arg3[%c0_4, %c0_5] : memref<1x128xf32, #tpu.memory_space<vmem>>, vector<1x128xf32>
    %c0_6 = arith.constant 0 : index
    %c0_7 = arith.constant 0 : index
    %5 = vector.load %arg4[%c0_6, %c0_7] : memref<1x128xf32, #tpu.memory_space<vmem>>, vector<1x128xf32>
    %cst = arith.constant dense<0.000000e+00> : vector<4xf32>
    %6 = vector.multi_reduction <add>, %3, %cst [1] : vector<4x128xf32> to vector<4xf32>
    %7 = vector.shape_cast %6 : vector<4xf32> to vector<4x1xf32>
    %cst_8 = arith.constant 1.280000e+02 : f32
    %8 = vector.broadcast %cst_8 : f32 to vector<4x1xf32>
    %9 = arith.divf %7, %8 : vector<4x1xf32>
    %10 = vector.broadcast %9 : vector<4x1xf32> to vector<4x128xf32>
    %11 = arith.subf %3, %10 : vector<4x128xf32>
    %12 = arith.mulf %11, %11 : vector<4x128xf32>
    %cst_9 = arith.constant dense<0.000000e+00> : vector<4xf32>
    %13 = vector.multi_reduction <add>, %12, %cst_9 [1] : vector<4x128xf32> to vector<4xf32>
    %14 = vector.shape_cast %13 : vector<4xf32> to vector<4x1xf32>
    %cst_10 = arith.constant 1.280000e+02 : f32
    %15 = vector.broadcast %cst_10 : f32 to vector<4x1xf32>
    %16 = arith.divf %14, %15 : vector<4x1xf32>
    %17 = vector.broadcast %9 : vector<4x1xf32> to vector<4x128xf32>
    %18 = arith.subf %3, %17 : vector<4x128xf32>
    %cst_11 = arith.constant 9.99999996E-13 : f32
    %19 = vector.broadcast %cst_11 : f32 to vector<4x1xf32>
    %20 = arith.addf %16, %19 : vector<4x1xf32>
    %21 = math.rsqrt %20 : vector<4x1xf32>
    %22 = vector.broadcast %21 : vector<4x1xf32> to vector<4x128xf32>
    %23 = arith.mulf %18, %22 : vector<4x128xf32>
    %24 = vector.broadcast %4 : vector<1x128xf32> to vector<4x128xf32>
    %25 = arith.mulf %23, %24 : vector<4x128xf32>
    %26 = vector.broadcast %5 : vector<1x128xf32> to vector<4x128xf32>
    %27 = arith.addf %25, %26 : vector<4x128xf32>
    %c0_12 = arith.constant 0 : index
    %c0_13 = arith.constant 0 : index
    %28 = vector.load %arg5[%c0_12, %c0_13] : memref<128x128xf32, #tpu.memory_space<vmem>>, vector<128x128xf32>
    %c0_14 = arith.constant 0 : index
    %c0_15 = arith.constant 0 : index
    %29 = vector.load %arg6[%c0_14, %c0_15] : memref<1x128xf32, #tpu.memory_space<vmem>>, vector<1x128xf32>
    %c0_16 = arith.constant 0 : index
    %c0_17 = arith.constant 0 : index
    %30 = vector.load %arg7[%c0_16, %c0_17] : memref<128x128xf32, #tpu.memory_space<vmem>>, vector<128x128xf32>
    %c0_18 = arith.constant 0 : index
    %c0_19 = arith.constant 0 : index
    %31 = vector.load %arg8[%c0_18, %c0_19] : memref<1x128xf32, #tpu.memory_space<vmem>>, vector<1x128xf32>
    %c0_20 = arith.constant 0 : index
    %c0_21 = arith.constant 0 : index
    %32 = vector.load %arg9[%c0_20, %c0_21] : memref<128x128xf32, #tpu.memory_space<vmem>>, vector<128x128xf32>
    %c0_22 = arith.constant 0 : index
    %c0_23 = arith.constant 0 : index
    %33 = vector.load %arg10[%c0_22, %c0_23] : memref<1x128xf32, #tpu.memory_space<vmem>>, vector<1x128xf32>
    %c0_24 = arith.constant 0 : index
    %c0_25 = arith.constant 0 : index
    %34 = vector.load %arg11[%c0_24, %c0_25] : memref<128x128xf32, #tpu.memory_space<vmem>>, vector<128x128xf32>
    %c0_26 = arith.constant 0 : index
    %c0_27 = arith.constant 0 : index
    %35 = vector.load %arg12[%c0_26, %c0_27] : memref<1x128xf32, #tpu.memory_space<vmem>>, vector<1x128xf32>
    %c0_28 = arith.constant 0 : index
    %c0_29 = arith.constant 0 : index
    %36 = vector.load %arg13[%c0_28, %c0_29] : memref<1x128xf32, #tpu.memory_space<vmem>>, vector<1x128xf32>
    %c0_30 = arith.constant 0 : index
    %c0_31 = arith.constant 0 : index
    %37 = vector.load %arg14[%c0_30, %c0_31] : memref<1x128xf32, #tpu.memory_space<vmem>>, vector<1x128xf32>
    %c0_32 = arith.constant 0 : index
    %c0_33 = arith.constant 0 : index
    %38 = vector.load %arg15[%c0_32, %c0_33] : memref<128x512xf32, #tpu.memory_space<vmem>>, vector<128x512xf32>
    %c0_34 = arith.constant 0 : index
    %c0_35 = arith.constant 0 : index
    %39 = vector.load %arg16[%c0_34, %c0_35] : memref<1x512xf32, #tpu.memory_space<vmem>>, vector<1x512xf32>
    %c0_36 = arith.constant 0 : index
    %c0_37 = arith.constant 0 : index
    %40 = vector.load %arg17[%c0_36, %c0_37] : memref<512x128xf32, #tpu.memory_space<vmem>>, vector<512x128xf32>
    %c0_38 = arith.constant 0 : index
    %c0_39 = arith.constant 0 : index
    %41 = vector.load %arg18[%c0_38, %c0_39] : memref<1x128xf32, #tpu.memory_space<vmem>>, vector<1x128xf32>
    %c0_40 = arith.constant 0 : index
    %c0_41 = arith.constant 0 : index
    %42 = vector.load %arg19[%c0_40, %c0_41] : memref<1x128xf32, #tpu.memory_space<vmem>>, vector<1x128xf32>
    %c0_42 = arith.constant 0 : index
    %c0_43 = arith.constant 0 : index
    %43 = vector.load %arg20[%c0_42, %c0_43] : memref<1x128xf32, #tpu.memory_space<vmem>>, vector<1x128xf32>
    %cst_44 = arith.constant dense<0.000000e+00> : vector<4x128xf32>
    %44 = tpu.matmul %27, %28, %cst_44 {dimension_numbers = #tpu.dot_dimension_numbers<[1], [0], [0], [1], [0, 0, 1, 1], [], []>} : vector<4x128xf32>, vector<128x128xf32>, vector<4x128xf32> -> vector<4x128xf32>
    %45 = vector.broadcast %29 : vector<1x128xf32> to vector<4x128xf32>
    %46 = arith.addf %44, %45 : vector<4x128xf32>
    %cst_45 = arith.constant dense<0.000000e+00> : vector<4x128xf32>
    %47 = tpu.matmul %27, %30, %cst_45 {dimension_numbers = #tpu.dot_dimension_numbers<[1], [0], [0], [1], [0, 0, 1, 1], [], []>} : vector<4x128xf32>, vector<128x128xf32>, vector<4x128xf32> -> vector<4x128xf32>
    %48 = vector.broadcast %31 : vector<1x128xf32> to vector<4x128xf32>
    %49 = arith.addf %47, %48 : vector<4x128xf32>
    %cst_46 = arith.constant dense<0.000000e+00> : vector<4x128xf32>
    %50 = tpu.matmul %27, %32, %cst_46 {dimension_numbers = #tpu.dot_dimension_numbers<[1], [0], [0], [1], [0, 0, 1, 1], [], []>} : vector<4x128xf32>, vector<128x128xf32>, vector<4x128xf32> -> vector<4x128xf32>
    %51 = vector.broadcast %33 : vector<1x128xf32> to vector<4x128xf32>
    %52 = arith.addf %50, %51 : vector<4x128xf32>
    %53 = vector.extract_strided_slice %46 {offsets = [0, 0], sizes = [4, 64], strides = [1, 1]} : vector<4x128xf32> to vector<4x64xf32>
    %54 = vector.extract_strided_slice %49 {offsets = [0, 0], sizes = [4, 64], strides = [1, 1]} : vector<4x128xf32> to vector<4x64xf32>
    %55 = vector.extract_strided_slice %52 {offsets = [0, 0], sizes = [4, 64], strides = [1, 1]} : vector<4x128xf32> to vector<4x64xf32>
    %cst_47 = arith.constant dense<0.000000e+00> : vector<4x4xf32>
    %56 = tpu.matmul %53, %54, %cst_47 {dimension_numbers = #tpu.dot_dimension_numbers<[1], [1], [0], [0], [0, 0, 1, 0], [], []>} : vector<4x64xf32>, vector<4x64xf32>, vector<4x4xf32> -> vector<4x4xf32>
    %cst_48 = arith.constant 1.250000e-01 : f32
    %57 = vector.broadcast %cst_48 : f32 to vector<4x4xf32>
    %58 = arith.mulf %56, %57 : vector<4x4xf32>
    %cst_49 = arith.constant 0.000000e+00 : f32
    %59 = vector.broadcast %cst_49 : f32 to vector<4x4xf32>
    %60 = arith.addf %58, %59 : vector<4x4xf32>
    %cst_50 = arith.constant dense<0xFF800000> : vector<4xf32>
    %61 = vector.multi_reduction <maximumf>, %60, %cst_50 [1] : vector<4x4xf32> to vector<4xf32>
    %62 = vector.shape_cast %61 : vector<4xf32> to vector<4x1xf32>
    %63 = vector.broadcast %62 : vector<4x1xf32> to vector<4x4xf32>
    %64 = arith.subf %60, %63 : vector<4x4xf32>
    %65 = math.exp %64 : vector<4x4xf32>
    %cst_51 = arith.constant dense<0.000000e+00> : vector<4xf32>
    %66 = vector.multi_reduction <add>, %65, %cst_51 [1] : vector<4x4xf32> to vector<4xf32>
    %67 = vector.shape_cast %66 : vector<4xf32> to vector<4x1xf32>
    %68 = vector.broadcast %67 : vector<4x1xf32> to vector<4x4xf32>
    %69 = arith.divf %65, %68 : vector<4x4xf32>
    %cst_52 = arith.constant dense<0.000000e+00> : vector<4x64xf32>
    %70 = tpu.matmul %69, %55, %cst_52 {dimension_numbers = #tpu.dot_dimension_numbers<[1], [0], [0], [1], [0, 0, 1, 1], [], []>} : vector<4x4xf32>, vector<4x64xf32>, vector<4x64xf32> -> vector<4x64xf32>
    %71 = vector.extract_strided_slice %46 {offsets = [0, 64], sizes = [4, 64], strides = [1, 1]} : vector<4x128xf32> to vector<4x64xf32>
    %72 = vector.extract_strided_slice %49 {offsets = [0, 64], sizes = [4, 64], strides = [1, 1]} : vector<4x128xf32> to vector<4x64xf32>
    %73 = vector.extract_strided_slice %52 {offsets = [0, 64], sizes = [4, 64], strides = [1, 1]} : vector<4x128xf32> to vector<4x64xf32>
    %cst_53 = arith.constant dense<0.000000e+00> : vector<4x4xf32>
    %74 = tpu.matmul %71, %72, %cst_53 {dimension_numbers = #tpu.dot_dimension_numbers<[1], [1], [0], [0], [0, 0, 1, 0], [], []>} : vector<4x64xf32>, vector<4x64xf32>, vector<4x4xf32> -> vector<4x4xf32>
    %cst_54 = arith.constant 1.250000e-01 : f32
    %75 = vector.broadcast %cst_54 : f32 to vector<4x4xf32>
    %76 = arith.mulf %74, %75 : vector<4x4xf32>
    %cst_55 = arith.constant 0.000000e+00 : f32
    %77 = vector.broadcast %cst_55 : f32 to vector<4x4xf32>
    %78 = arith.addf %76, %77 : vector<4x4xf32>
    %cst_56 = arith.constant dense<0xFF800000> : vector<4xf32>
    %79 = vector.multi_reduction <maximumf>, %78, %cst_56 [1] : vector<4x4xf32> to vector<4xf32>
    %80 = vector.shape_cast %79 : vector<4xf32> to vector<4x1xf32>
    %81 = vector.broadcast %80 : vector<4x1xf32> to vector<4x4xf32>
    %82 = arith.subf %78, %81 : vector<4x4xf32>
    %83 = math.exp %82 : vector<4x4xf32>
    %cst_57 = arith.constant dense<0.000000e+00> : vector<4xf32>
    %84 = vector.multi_reduction <add>, %83, %cst_57 [1] : vector<4x4xf32> to vector<4xf32>
    %85 = vector.shape_cast %84 : vector<4xf32> to vector<4x1xf32>
    %86 = vector.broadcast %85 : vector<4x1xf32> to vector<4x4xf32>
    %87 = arith.divf %83, %86 : vector<4x4xf32>
    %cst_58 = arith.constant dense<0.000000e+00> : vector<4x64xf32>
    %88 = tpu.matmul %87, %73, %cst_58 {dimension_numbers = #tpu.dot_dimension_numbers<[1], [0], [0], [1], [0, 0, 1, 1], [], []>} : vector<4x4xf32>, vector<4x64xf32>, vector<4x64xf32> -> vector<4x64xf32>
    %89 = tpu.concatenate %70, %88 in 1 : vector<4x64xf32>, vector<4x64xf32> -> vector<4x128xf32>
    %cst_59 = arith.constant dense<0.000000e+00> : vector<4x128xf32>
    %90 = tpu.matmul %89, %34, %cst_59 {dimension_numbers = #tpu.dot_dimension_numbers<[1], [0], [0], [1], [0, 0, 1, 1], [], []>} : vector<4x128xf32>, vector<128x128xf32>, vector<4x128xf32> -> vector<4x128xf32>
    %91 = vector.broadcast %35 : vector<1x128xf32> to vector<4x128xf32>
    %92 = arith.addf %90, %91 : vector<4x128xf32>
    %93 = arith.addf %92, %27 : vector<4x128xf32>
    %cst_60 = arith.constant dense<0.000000e+00> : vector<4xf32>
    %94 = vector.multi_reduction <add>, %93, %cst_60 [1] : vector<4x128xf32> to vector<4xf32>
    %95 = vector.shape_cast %94 : vector<4xf32> to vector<4x1xf32>
    %cst_61 = arith.constant 1.280000e+02 : f32
    %96 = vector.broadcast %cst_61 : f32 to vector<4x1xf32>
    %97 = arith.divf %95, %96 : vector<4x1xf32>
    %98 = vector.broadcast %97 : vector<4x1xf32> to vector<4x128xf32>
    %99 = arith.subf %93, %98 : vector<4x128xf32>
    %100 = arith.mulf %99, %99 : vector<4x128xf32>
    %cst_62 = arith.constant dense<0.000000e+00> : vector<4xf32>
    %101 = vector.multi_reduction <add>, %100, %cst_62 [1] : vector<4x128xf32> to vector<4xf32>
    %102 = vector.shape_cast %101 : vector<4xf32> to vector<4x1xf32>
    %cst_63 = arith.constant 1.280000e+02 : f32
    %103 = vector.broadcast %cst_63 : f32 to vector<4x1xf32>
    %104 = arith.divf %102, %103 : vector<4x1xf32>
    %105 = vector.broadcast %97 : vector<4x1xf32> to vector<4x128xf32>
    %106 = arith.subf %93, %105 : vector<4x128xf32>
    %cst_64 = arith.constant 9.99999996E-13 : f32
    %107 = vector.broadcast %cst_64 : f32 to vector<4x1xf32>
    %108 = arith.addf %104, %107 : vector<4x1xf32>
    %109 = math.rsqrt %108 : vector<4x1xf32>
    %110 = vector.broadcast %109 : vector<4x1xf32> to vector<4x128xf32>
    %111 = arith.mulf %106, %110 : vector<4x128xf32>
    %112 = vector.broadcast %36 : vector<1x128xf32> to vector<4x128xf32>
    %113 = arith.mulf %111, %112 : vector<4x128xf32>
    %114 = vector.broadcast %37 : vector<1x128xf32> to vector<4x128xf32>
    %115 = arith.addf %113, %114 : vector<4x128xf32>
    %cst_65 = arith.constant dense<0.000000e+00> : vector<4x512xf32>
    %116 = tpu.matmul %115, %38, %cst_65 {dimension_numbers = #tpu.dot_dimension_numbers<[1], [0], [0], [1], [0, 0, 1, 1], [], []>} : vector<4x128xf32>, vector<128x512xf32>, vector<4x512xf32> -> vector<4x512xf32>
    %117 = vector.broadcast %39 : vector<1x512xf32> to vector<4x512xf32>
    %118 = arith.addf %116, %117 : vector<4x512xf32>
    %cst_66 = arith.constant 5.000000e-01 : f32
    %119 = vector.broadcast %cst_66 : f32 to vector<4x512xf32>
    %120 = arith.mulf %119, %118 : vector<4x512xf32>
    %cst_67 = arith.constant 4.471500e-02 : f32
    %121 = vector.broadcast %cst_67 : f32 to vector<4x512xf32>
    %122 = arith.mulf %121, %118 : vector<4x512xf32>
    %123 = arith.mulf %122, %118 : vector<4x512xf32>
    %124 = arith.mulf %123, %118 : vector<4x512xf32>
    %125 = arith.addf %118, %124 : vector<4x512xf32>
    %cst_68 = arith.constant 0.797884583 : f32
    %126 = vector.broadcast %cst_68 : f32 to vector<4x512xf32>
    %127 = arith.mulf %126, %125 : vector<4x512xf32>
    %128 = math.tanh %127 : vector<4x512xf32>
    %cst_69 = arith.constant 1.000000e+00 : f32
    %129 = vector.broadcast %cst_69 : f32 to vector<4x512xf32>
    %130 = arith.addf %129, %128 : vector<4x512xf32>
    %131 = arith.mulf %120, %130 : vector<4x512xf32>
    %cst_70 = arith.constant dense<0.000000e+00> : vector<4x128xf32>
    %132 = tpu.matmul %131, %40, %cst_70 {dimension_numbers = #tpu.dot_dimension_numbers<[1], [0], [0], [1], [0, 0, 1, 1], [], []>} : vector<4x512xf32>, vector<512x128xf32>, vector<4x128xf32> -> vector<4x128xf32>
    %133 = vector.broadcast %41 : vector<1x128xf32> to vector<4x128xf32>
    %134 = arith.addf %132, %133 : vector<4x128xf32>
    %135 = arith.addf %134, %115 : vector<4x128xf32>
    %cst_71 = arith.constant dense<0.000000e+00> : vector<4xf32>
    %136 = vector.multi_reduction <add>, %135, %cst_71 [1] : vector<4x128xf32> to vector<4xf32>
    %137 = vector.shape_cast %136 : vector<4xf32> to vector<4x1xf32>
    %cst_72 = arith.constant 1.280000e+02 : f32
    %138 = vector.broadcast %cst_72 : f32 to vector<4x1xf32>
    %139 = arith.divf %137, %138 : vector<4x1xf32>
    %140 = vector.broadcast %139 : vector<4x1xf32> to vector<4x128xf32>
    %141 = arith.subf %135, %140 : vector<4x128xf32>
    %142 = arith.mulf %141, %141 : vector<4x128xf32>
    %cst_73 = arith.constant dense<0.000000e+00> : vector<4xf32>
    %143 = vector.multi_reduction <add>, %142, %cst_73 [1] : vector<4x128xf32> to vector<4xf32>
    %144 = vector.shape_cast %143 : vector<4xf32> to vector<4x1xf32>
    %cst_74 = arith.constant 1.280000e+02 : f32
    %145 = vector.broadcast %cst_74 : f32 to vector<4x1xf32>
    %146 = arith.divf %144, %145 : vector<4x1xf32>
    %147 = vector.broadcast %139 : vector<4x1xf32> to vector<4x128xf32>
    %148 = arith.subf %135, %147 : vector<4x128xf32>
    %cst_75 = arith.constant 9.99999996E-13 : f32
    %149 = vector.broadcast %cst_75 : f32 to vector<4x1xf32>
    %150 = arith.addf %146, %149 : vector<4x1xf32>
    %151 = math.rsqrt %150 : vector<4x1xf32>
    %152 = vector.broadcast %151 : vector<4x1xf32> to vector<4x128xf32>
    %153 = arith.mulf %148, %152 : vector<4x128xf32>
    %154 = vector.broadcast %42 : vector<1x128xf32> to vector<4x128xf32>
    %155 = arith.mulf %153, %154 : vector<4x128xf32>
    %156 = vector.broadcast %43 : vector<1x128xf32> to vector<4x128xf32>
    %157 = arith.addf %155, %156 : vector<4x128xf32>
    %cst_76 = arith.constant dense<0.000000e+00> : vector<128xf32>
    %158 = vector.multi_reduction <add>, %157, %cst_76 [0] : vector<4x128xf32> to vector<128xf32>
    %159 = vector.shape_cast %158 : vector<128xf32> to vector<1x128xf32>
    %cst_77 = arith.constant 4.000000e+00 : f32
    %160 = vector.broadcast %cst_77 : f32 to vector<1x128xf32>
    %161 = arith.divf %159, %160 : vector<1x128xf32>
    %c0_78 = arith.constant 0 : index
    %c0_79 = arith.constant 0 : index
    %162 = vector.load %arg21[%c0_78, %c0_79] : memref<128x256xf32, #tpu.memory_space<vmem>>, vector<128x256xf32>
    %cst_80 = arith.constant dense<0.000000e+00> : vector<1x256xf32>
    %163 = tpu.matmul %161, %162, %cst_80 {dimension_numbers = #tpu.dot_dimension_numbers<[1], [0], [0], [1], [0, 0, 1, 1], [], []>} : vector<1x128xf32>, vector<128x256xf32>, vector<1x256xf32> -> vector<1x256xf32>
    %c0_81 = arith.constant 0 : index
    %c0_82 = arith.constant 0 : index
    %164 = vector.load %arg22[%c0_81, %c0_82] : memref<1x256xf32, #tpu.memory_space<vmem>>, vector<1x256xf32>
    %165 = arith.addf %163, %164 : vector<1x256xf32>
    %c0_83 = arith.constant 0 : index
    %c0_84 = arith.constant 0 : index
    %c0_85 = arith.constant 0 : index
    %166 = vector.load %arg26[%c0_83, %c0_84, %c0_85] : memref<1x1x256xf32, #tpu.memory_space<vmem>>, vector<1x1x256xf32>
    %167 = vector.shape_cast %166 : vector<1x1x256xf32> to vector<1x256xf32>
    %168 = vector.shape_cast %165 : vector<1x256xf32> to vector<1x1x256xf32>
    tpu.vector_store %arg26[%c0_83, %c0_84, %c0_85], %168 {strides = array<i32>} : memref<1x1x256xf32, #tpu.memory_space<vmem>>, vector<1x1x256xf32>,
    %cst_86 = arith.constant 0.000000e+00 : f32
    %169 = vector.broadcast %cst_86 : f32 to vector<1x256xf32>
    %170 = arith.maximumf %165, %169 : vector<1x256xf32>
    %c0_87 = arith.constant 0 : index
    %c0_88 = arith.constant 0 : index
    %171 = vector.load %arg23[%c0_87, %c0_88] : memref<256x128xf32, #tpu.memory_space<vmem>>, vector<256x128xf32>
    %cst_89 = arith.constant dense<0.000000e+00> : vector<1x128xf32>
    %172 = tpu.matmul %170, %171, %cst_89 {dimension_numbers = #tpu.dot_dimension_numbers<[1], [0], [0], [1], [0, 0, 1, 1], [], []>} : vector<1x256xf32>, vector<256x128xf32>, vector<1x128xf32> -> vector<1x128xf32>
    %c0_90 = arith.constant 0 : index
    %c0_91 = arith.constant 0 : index
    %173 = vector.load %arg24[%c0_90, %c0_91] : memref<1x128xf32, #tpu.memory_space<vmem>>, vector<1x128xf32>
    %174 = arith.addf %172, %173 : vector<1x128xf32>
    %c0_92 = arith.constant 0 : index
    %c0_93 = arith.constant 0 : index
    %c0_94 = arith.constant 0 : index
    %175 = vector.load %arg25[%c0_92, %c0_93, %c0_94] : memref<1x1x128xf32, #tpu.memory_space<vmem>>, vector<1x1x128xf32>
    %176 = vector.shape_cast %175 : vector<1x1x128xf32> to vector<1x128xf32>
    %177 = vector.shape_cast %174 : vector<1x128xf32> to vector<1x1x128xf32>
    tpu.vector_store %arg25[%c0_92, %c0_93, %c0_94], %177 {strides = array<i32>} : memref<1x1x128xf32, #tpu.memory_space<vmem>>, vector<1x1x128xf32>,
    return
  }
  func.func @transform_0(%arg0: i32) -> (i32, i32, i32) {
    %c0_i32 = arith.constant 0 : i32
    %c0_i32_0 = arith.constant 0 : i32
    %c0_i32_1 = arith.constant 0 : i32
    return %arg0, %c0_i32, %c0_i32_0 : i32, i32, i32
  }
  func.func @transform_1(%arg0: i32) -> (i32, i32) {
    %c0_i32 = arith.constant 0 : i32
    %c0_i32_0 = arith.constant 0 : i32
    %c0_i32_1 = arith.constant 0 : i32
    return %c0_i32, %c0_i32_0 : i32, i32
  }
  func.func @transform_2(%arg0: i32) -> (i32, i32) {
    %c0_i32 = arith.constant 0 : i32
    %c0_i32_0 = arith.constant 0 : i32
    %c0_i32_1 = arith.constant 0 : i32
    return %c0_i32, %c0_i32_0 : i32, i32
  }
  func.func @transform_3(%arg0: i32) -> (i32, i32) {
    %c0_i32 = arith.constant 0 : i32
    %c0_i32_0 = arith.constant 0 : i32
    %c0_i32_1 = arith.constant 0 : i32
    return %c0_i32, %c0_i32_0 : i32, i32
  }
  func.func @transform_4(%arg0: i32) -> (i32, i32) {
    %c0_i32 = arith.constant 0 : i32
    %c0_i32_0 = arith.constant 0 : i32
    %c0_i32_1 = arith.constant 0 : i32
    return %c0_i32, %c0_i32_0 : i32, i32
  }
  func.func @transform_5(%arg0: i32) -> (i32, i32) {
    %c0_i32 = arith.constant 0 : i32
    %c0_i32_0 = arith.constant 0 : i32
    %c0_i32_1 = arith.constant 0 : i32
    return %c0_i32, %c0_i32_0 : i32, i32
  }
  func.func @transform_6(%arg0: i32) -> (i32, i32) {
    %c0_i32 = arith.constant 0 : i32
    %c0_i32_0 = arith.constant 0 : i32
    %c0_i32_1 = arith.constant 0 : i32
    return %c0_i32, %c0_i32_0 : i32, i32
  }
  func.func @transform_7(%arg0: i32) -> (i32, i32) {
    %c0_i32 = arith.constant 0 : i32
    %c0_i32_0 = arith.constant 0 : i32
    %c0_i32_1 = arith.constant 0 : i32
    return %c0_i32, %c0_i32_0 : i32, i32
  }
  func.func @transform_8(%arg0: i32) -> (i32, i32) {
    %c0_i32 = arith.constant 0 : i32
    %c0_i32_0 = arith.constant 0 : i32
    %c0_i32_1 = arith.constant 0 : i32
    return %c0_i32, %c0_i32_0 : i32, i32
  }
  func.func @transform_9(%arg0: i32) -> (i32, i32) {
    %c0_i32 = arith.constant 0 : i32
    %c0_i32_0 = arith.constant 0 : i32
    %c0_i32_1 = arith.constant 0 : i32
    return %c0_i32, %c0_i32_0 : i32, i32
  }
  func.func @transform_10(%arg0: i32) -> (i32, i32) {
    %c0_i32 = arith.constant 0 : i32
    %c0_i32_0 = arith.constant 0 : i32
    %c0_i32_1 = arith.constant 0 : i32
    return %c0_i32, %c0_i32_0 : i32, i32
  }
  func.func @transform_11(%arg0: i32) -> (i32, i32) {
    %c0_i32 = arith.constant 0 : i32
    %c0_i32_0 = arith.constant 0 : i32
    %c0_i32_1 = arith.constant 0 : i32
    return %c0_i32, %c0_i32_0 : i32, i32
  }
  func.func @transform_12(%arg0: i32) -> (i32, i32) {
    %c0_i32 = arith.constant 0 : i32
    %c0_i32_0 = arith.constant 0 : i32
    %c0_i32_1 = arith.constant 0 : i32
    return %c0_i32, %c0_i32_0 : i32, i32
  }
  func.func @transform_13(%arg0: i32) -> (i32, i32) {
    %c0_i32 = arith.constant 0 : i32
    %c0_i32_0 = arith.constant 0 : i32
    %c0_i32_1 = arith.constant 0 : i32
    return %c0_i32, %c0_i32_0 : i32, i32
  }
  func.func @transform_14(%arg0: i32) -> (i32, i32) {
    %c0_i32 = arith.constant 0 : i32
    %c0_i32_0 = arith.constant 0 : i32
    %c0_i32_1 = arith.constant 0 : i32
    return %c0_i32, %c0_i32_0 : i32, i32
  }
  func.func @transform_15(%arg0: i32) -> (i32, i32) {
    %c0_i32 = arith.constant 0 : i32
    %c0_i32_0 = arith.constant 0 : i32
    %c0_i32_1 = arith.constant 0 : i32
    return %c0_i32, %c0_i32_0 : i32, i32
  }
  func.func @transform_16(%arg0: i32) -> (i32, i32) {
    %c0_i32 = arith.constant 0 : i32
    %c0_i32_0 = arith.constant 0 : i32
    %c0_i32_1 = arith.constant 0 : i32
    return %c0_i32, %c0_i32_0 : i32, i32
  }
  func.func @transform_17(%arg0: i32) -> (i32, i32) {
    %c0_i32 = arith.constant 0 : i32
    %c0_i32_0 = arith.constant 0 : i32
    %c0_i32_1 = arith.constant 0 : i32
    return %c0_i32, %c0_i32_0 : i32, i32
  }
  func.func @transform_18(%arg0: i32) -> (i32, i32) {
    %c0_i32 = arith.constant 0 : i32
    %c0_i32_0 = arith.constant 0 : i32
    %c0_i32_1 = arith.constant 0 : i32
    return %c0_i32, %c0_i32_0 : i32, i32
  }
  func.func @transform_19(%arg0: i32) -> (i32, i32) {
    %c0_i32 = arith.constant 0 : i32
    %c0_i32_0 = arith.constant 0 : i32
    %c0_i32_1 = arith.constant 0 : i32
    return %c0_i32, %c0_i32_0 : i32, i32
  }
  func.func @transform_20(%arg0: i32) -> (i32, i32) {
    %c0_i32 = arith.constant 0 : i32
    %c0_i32_0 = arith.constant 0 : i32
    %c0_i32_1 = arith.constant 0 : i32
    return %c0_i32, %c0_i32_0 : i32, i32
  }
  func.func @transform_21(%arg0: i32) -> (i32, i32) {
    %c0_i32 = arith.constant 0 : i32
    %c0_i32_0 = arith.constant 0 : i32
    %c0_i32_1 = arith.constant 0 : i32
    return %c0_i32, %c0_i32_0 : i32, i32
  }
  func.func @transform_22(%arg0: i32) -> (i32, i32) {
    %c0_i32 = arith.constant 0 : i32
    %c0_i32_0 = arith.constant 0 : i32
    %c0_i32_1 = arith.constant 0 : i32
    return %c0_i32, %c0_i32_0 : i32, i32
  }
  func.func @transform_23(%arg0: i32) -> (i32, i32) {
    %c0_i32 = arith.constant 0 : i32
    %c0_i32_0 = arith.constant 0 : i32
    %c0_i32_1 = arith.constant 0 : i32
    return %c0_i32, %c0_i32_0 : i32, i32
  }
  func.func @transform_24(%arg0: i32) -> (i32, i32, i32) {
    %c0_i32 = arith.constant 0 : i32
    %c0_i32_0 = arith.constant 0 : i32
    %c0_i32_1 = arith.constant 0 : i32
    return %arg0, %c0_i32, %c0_i32_0 : i32, i32, i32
  }
  func.func @transform_25(%arg0: i32) -> (i32, i32, i32) {
    %c0_i32 = arith.constant 0 : i32
    %c0_i32_0 = arith.constant 0 : i32
    %c0_i32_1 = arith.constant 0 : i32
    return %arg0, %c0_i32, %c0_i32_0 : i32, i32, i32
  }
}

</mosaic_0001>

<bundles_post_ra>
// kernel: teacher_forward.3
= control target key start
LH: loop header
LB: loop body
LE: loop exit
PB: predicated region body
PF: predicated region fallthrough
CT: control target
= control target key end

     0   :  { %s3701_s0 = inlined_call_operand.vmem [shape: f32[2,8,128], index: 0, kind: input, shape index: {}]   ;;  %s3702_s1 = inlined_call_operand.vmem [shape: f32[2,8,8], index: 1, kind: input, shape index: {}]   ;;  %s3703_s2 = inlined_call_operand.vmem [shape: f32[1,128], index: 2, kind: input, shape index: {}]   ;;  %s3704_s3 = inlined_call_operand.vmem [shape: f32[1,128], index: 3, kind: input, shape index: {}]   ;;  %s3705_s4 = inlined_call_operand.vmem [shape: f32[128,128], index: 4, kind: input, shape index: {}]   ;;  %s3706_s5 = inlined_call_operand.vmem [shape: f32[1,128], index: 5, kind: input, shape index: {}]   ;;  %s3707_s6 = inlined_call_operand.vmem [shape: f32[128,128], index: 6, kind: input, shape index: {}]   ;;  %s3708_s7 = inlined_call_operand.vmem [shape: f32[1,128], index: 7, kind: input, shape index: {}]   ;;  %s3709_s8 = inlined_call_operand.vmem [shape: f32[128,128], index: 8, kind: input, shape index: {}]   ;;  %s3710_s9 = inlined_call_operand.vmem [shape: f32[1,128], index: 9, kind: input, shape index: {}]   ;;  %s3711_s10 = inlined_call_operand.vmem [shape: f32[128,128], index: 10, kind: input, shape index: {}]   ;;  %s3712_s11 = inlined_call_operand.vmem [shape: f32[1,128], index: 11, kind: input, shape index: {}]   ;;  %s3713_s12 = inlined_call_operand.vmem [shape: f32[1,128], index: 12, kind: input, shape index: {}]   ;;  %s3714_s13 = inlined_call_operand.vmem [shape: f32[1,128], index: 13, kind: input, shape index: {}]   ;;  %s3715_s14 = inlined_call_operand.vmem [shape: f32[128,512], index: 14, kind: input, shape index: {}]   ;;  %s3716_s15 = inlined_call_operand.vmem [shape: f32[1,512], index: 15, kind: input, shape index: {}]   ;;  %s3717_s16 = inlined_call_operand.vmem [shape: f32[512,128], index: 16, kind: input, shape index: {}]   ;;  %s3718_s17 = inlined_call_operand.vmem [shape: f32[1,128], index: 17, kind: input, shape index: {}]   ;;  %s3719_s18 = inlined_call_operand.vmem [shape: f32[1,128], index: 18, kind: input, shape index: {}]   ;;  %s3720_s19 = inlined_call_operand.vmem [shape: f32[1,128], index: 19, kind: input, shape index: {}]   ;;  %s3721_s20 = inlined_call_operand.vmem [shape: f32[128,128], index: 20, kind: input, shape index: {}]   ;;  %s3722_s21 = inlined_call_operand.vmem [shape: f32[1,128], index: 21, kind: input, shape index: {}]   ;;  %s3723_s22 = inlined_call_operand.vmem [shape: f32[2,1,128], index: 22, kind: output, shape index: {}]  }
   0x1   :  { %3727 = sst [smem:[#allocation2_spill]] %s3701_s0 }
   0x2   :  { %3728 = sst [smem:[#allocation3_spill]] %s3702_s1 }
   0x3   :  { %3729 = sst [smem:[#allocation4_spill]] %s3703_s2 }
   0x4   :  { %3730 = sst [smem:[#allocation5_spill]] %s3704_s3  ;;  %s2907_s3 = smov 0  }
   0x5   :  { %3731 = sst [smem:[#allocation6_spill]] %s3705_s4 }
   0x6   :  { %3732 = sst [smem:[#allocation7_spill]] %s3706_s5 }
   0x7   :  { %3733 = sst [smem:[#allocation8_spill]] %s3707_s6 }
   0x8   :  { %3734 = sst [smem:[#allocation9_spill]] %s3708_s7 }
   0x9 LB: > { %s2112_s28 = sadd.s32 4294967295, %s2786_s3   ;;  %p2116_p0 = scmp.ge.s32.totalorder %s2786_s3, 1  ;;  %s2786_s3 = sphi %s2907_s3, %s32_s3  }
   0xa   : > { %p620_p1 = scmp.lt.s32.totalorder %s2786_s3, 3 }
   0xc   : > { %p621_p2 = pnand %p2116_p0, %p620_p1 }
   0xd   : > { %p683_p3 = scmp.lt.s32.totalorder (!%p621_p2), %s2112_s28, 1  ;;  %s3735_s0 = sld [smem:[#allocation2_spill]] (!%p621_p2)  ;;  %v2788_v4 = vmov (!%p621_p2), 0.0|0.0   ;;  %vm2789_vm0 = vmmov (!%p621_p2), 0   ;;  %v2790_v41 = vmov (!%p621_p2), 0.0   ;;  %v758_v61 = vld [vmem:[%s3709_s8] sm:$0xff] (!%p621_p2) }
   0xe   : > { %624 = sbr.rel (%p621_p2) target bundleno = 3471 (0xd8f), region = 108  ;;  %s3736_s24 = sld [smem:[#allocation6_spill]] (!%p621_p2)  ;;  %2496 = vmatprep.subr.bf16.mxu0 (!%p621_p2), %v2788_v4  ;;  %2520 = vmatprep.subr.bf16.mxu1 (!%p621_p2), %v2788_v4  ;;  %v759_v62 = vld [vmem:[%s3709_s8 + $0x8] sm:$0xff] (!%p621_p2)  ;;  %vm1154_vm1 = vcmask (!%p621_p2), 523264   ;;  %vm1233_vm2 = vcmask (!%p621_p2), 64512  }
   0xf   : > { %s3737_s27 = sld [smem:[#allocation8_spill]] (!%p621_p2)  ;;  %2333 = vmatprep.mubr.msk.f32.mxu0 (!%p621_p2), %vm2789_vm0, %v2790_v41  ;;  %2368 = vmatprep.mubr.msk.f32.mxu1 (!%p621_p2), %vm2789_vm0, %v2790_v41  ;;  %s3738_s30 = sld [smem:[#allocation4_spill]] (!%p621_p2) }
  0x10   : > { %s3739_s25 = sld [smem:[#allocation5_spill]] (!%p621_p2)  ;;  %s3740_s7 = sld [smem:[#allocation9_spill]] (!%p621_p2) }
  0x11   : > { %s3741_s6 = sld [smem:[#allocation7_spill]] (!%p621_p2) }
  0x14   : > { %v724_v1 = vld [vmem:[%s3736_s24] sm:$0xff] (!%p621_p2)  ;;  %v725_v2 = vld [vmem:[%s3736_s24 + $0x8] sm:$0xff] (!%p621_p2)  ;;  %v726_v7 = vld [vmem:[%s3736_s24 + $0x10] sm:$0xff] (!%p621_p2) }
  0x15   : > { %s3745_s28 = smov (!%p683_p3, %s2112_s28), 1  ;;  %v741_v3 = vld [vmem:[%s3737_s27] sm:$0xff]  ;;  %v2497_v5 = vpack.c.bf16 %v725_v2, %v724_v1  ;;  %v742_v6 = vld [vmem:[%s3737_s27 + $0x8] sm:$0xff]  ;;  %v727_v8 = vld [vmem:[%s3736_s24 + $0x18] sm:$0xff]  ;;  %v2545_v1 = vpack.c.bf16 %v759_v62, %v758_v61 }
  0x16   : > { %s3726_s29 = sshll.u32 %s3745_s28, 3  ;;  %v2521_v9 = vpack.c.bf16 %v742_v6, %v741_v3  ;;  %v743_v10 = vld [vmem:[%s3737_s27 + $0x10] sm:$0xff]  ;;  %v744_v11 = vld [vmem:[%s3737_s27 + $0x18] sm:$0xff]  ;;  %v2500_v12 = vpack.c.bf16 %v727_v8, %v726_v7  ;;  %v728_v14 = vld [vmem:[%s3736_s24 + $0x20] sm:$0xff] }
  0x17   : > { %s686_s23 = scalar_lea.vmem %s3735_s0, %s3726_s29  ;;  %2498 = vmatpush3.bf16.msra.mxu0 %v2497_v5  ;;  %v2524_v13 = vpack.c.bf16 %v744_v11, %v743_v10  ;;  %v729_v15 = vld [vmem:[%s3736_s24 + $0x28] sm:$0xff]  ;;  %v745_v16 = vld [vmem:[%s3737_s27 + $0x20] sm:$0xff]  ;;  %v730_v24 = vld [vmem:[%s3736_s24 + $0x30] sm:$0xff] }
  0x18   : > { %v694_v0 = vld [vmem:[%s686_s23] sm:$0xff]  ;;  %2522 = vmatpush3.bf16.msra.mxu1 %v2521_v9  ;;  %2499 = vmatprep.subr.bf16.mxu0 %v2788_v4  ;;  %v746_v17 = vld [vmem:[%s3737_s27 + $0x28] sm:$0xff]  ;;  %v2503_v18 = vpack.c.bf16 %v729_v15, %v728_v14  ;;  %v731_v25 = vld [vmem:[%s3736_s24 + $0x38] sm:$0xff]  ;;  %s3743_s23 = sld [smem:[#allocation3_spill]] }
  0x19   : > { %697 = vadd.xlane.f32.xlu0 %v694_v0  ;;  %2523 = vmatprep.subr.bf16.mxu1 %v2788_v4  ;;  %v2527_v19 = vpack.c.bf16 %v746_v17, %v745_v16  ;;  %v2506_v26 = vpack.c.bf16 %v731_v25, %v730_v24  ;;  %v747_v27 = vld [vmem:[%s3737_s27 + $0x30] sm:$0xff]  ;;  %v748_v28 = vld [vmem:[%s3737_s27 + $0x38] sm:$0xff]  ;;  %v732_v30 = vld [vmem:[%s3736_s24 + $0x40] sm:$0xff] }
  0x1a   : > { %v2530_v29 = vpack.c.bf16 %v748_v28, %v747_v27  ;;  %v733_v31 = vld [vmem:[%s3736_s24 + $0x48] sm:$0xff]  ;;  %v749_v33 = vld [vmem:[%s3737_s27 + $0x40] sm:$0xff]  ;;  %v734_v36 = vld [vmem:[%s3736_s24 + $0x50] sm:$0xff] }
  0x1b   : > { %2501 = vmatpush3.bf16.msra.mxu0 %v2500_v12  ;;  %v2509_v32 = vpack.c.bf16 %v733_v31, %v732_v30  ;;  %v750_v34 = vld [vmem:[%s3737_s27 + $0x48] sm:$0xff]  ;;  %v735_v37 = vld [vmem:[%s3736_s24 + $0x58] sm:$0xff]  ;;  %v751_v38 = vld [vmem:[%s3737_s27 + $0x50] sm:$0xff] }
  0x1c   : > { %2525 = vmatpush3.bf16.msra.mxu1 %v2524_v13  ;;  %2502 = vmatprep.subr.bf16.mxu0 %v2788_v4  ;;  %v2533_v35 = vpack.c.bf16 %v750_v34, %v749_v33  ;;  %v2512_v39 = vpack.c.bf16 %v735_v37, %v734_v36  ;;  %v752_v40 = vld [vmem:[%s3737_s27 + $0x58] sm:$0xff]  ;;  %v736_v43 = vld [vmem:[%s3736_s24 + $0x60] sm:$0xff]  ;;  %v737_v44 = vld [vmem:[%s3736_s24 + $0x68] sm:$0xff] }
  0x1d   : > { %2526 = vmatprep.subr.bf16.mxu1 %v2788_v4  ;;  %v2536_v42 = vpack.c.bf16 %v752_v40, %v751_v38  ;;  %v753_v45 = vld [vmem:[%s3737_s27 + $0x60] sm:$0xff]  ;;  %v754_v46 = vld [vmem:[%s3737_s27 + $0x68] sm:$0xff]  ;;  %v2515_v47 = vpack.c.bf16 %v737_v44, %v736_v43  ;;  %v738_v49 = vld [vmem:[%s3736_s24 + $0x70] sm:$0xff] }
  0x1e   : > { %v2539_v48 = vpack.c.bf16 %v754_v46, %v753_v45  ;;  %v739_v50 = vld [vmem:[%s3736_s24 + $0x78] sm:$0xff]  ;;  %v755_v51 = vld [vmem:[%s3737_s27 + $0x70] sm:$0xff]  ;;  %v2119_v59 = vld [vmem:[%s3738_s30] ss:$0 sm:$0xff]  ;;  %s3742_s30 = sshll.u32 %s3745_s28, 3 }
  0x1f   : > { %2504 = vmatpush3.bf16.msra.mxu0 %v2503_v18  ;;  %v756_v52 = vld [vmem:[%s3737_s27 + $0x78] sm:$0xff]  ;;  %v2518_v53 = vpack.c.bf16 %v739_v50, %v738_v49  ;;  %v2120_v63 = vld [vmem:[%s3739_s25] ss:$0 sm:$0xff]  ;;  %v760_v3 = vld [vmem:[%s3709_s8 + $0x10] sm:$0xff]  ;;  %s2791_s25 = smov 64   ;;  %s690_s1 = scalar_lea.vmem %s3743_s23, %s3742_s30 }
  0x20   : > { %2528 = vmatpush3.bf16.msra.mxu1 %v2527_v19  ;;  %2505 = vmatprep.subr.bf16.mxu0 %v2788_v4  ;;  %v2542_v54 = vpack.c.bf16 %v756_v52, %v755_v51  ;;  %v761_v5 = vld [vmem:[%s3709_s8 + $0x18] sm:$0xff]  ;;  %v762_v7 = vld [vmem:[%s3709_s8 + $0x20] sm:$0xff]  ;;  %v763_v8 = vld [vmem:[%s3709_s8 + $0x28] sm:$0xff]  ;;  %s693_s30 = scalar_lea.vmem %s3723_s22, %s3745_s28 }
  0x21   : > { %2529 = vmatprep.subr.bf16.mxu1 %v2788_v4  ;;  %v2548_v6 = vpack.c.bf16 %v761_v5, %v760_v3  ;;  %v2551_v9 = vpack.c.bf16 %v763_v8, %v762_v7  ;;  %v764_v10 = vld [vmem:[%s3709_s8 + $0x30] sm:$0xff]  ;;  %v765_v11 = vld [vmem:[%s3709_s8 + $0x38] sm:$0xff]  ;;  %v766_v13 = vld [vmem:[%s3709_s8 + $0x40] sm:$0xff] }
  0x22   : > { %v2554_v12 = vpack.c.bf16 %v765_v11, %v764_v10  ;;  %v767_v14 = vld [vmem:[%s3709_s8 + $0x48] sm:$0xff]  ;;  %v768_v16 = vld [vmem:[%s3709_s8 + $0x50] sm:$0xff]  ;;  %v769_v17 = vld [vmem:[%s3709_s8 + $0x58] sm:$0xff] }
  0x23   : > { %2507 = vmatpush3.bf16.msra.mxu0 %v2506_v26  ;;  %v2557_v15 = vpack.c.bf16 %v767_v14, %v766_v13  ;;  %v2560_v18 = vpack.c.bf16 %v769_v17, %v768_v16  ;;  %v770_v19 = vld [vmem:[%s3709_s8 + $0x60] sm:$0xff]  ;;  %v777_v10 = vld [vmem:[%s3711_s10 + $0x10] sm:$0xff] }
  0x24   : > { %2531 = vmatpush3.bf16.msra.mxu1 %v2530_v29  ;;  %2508 = vmatprep.subr.bf16.mxu0 %v2788_v4  ;;  %v2122_v25 = vld [vmem:[%s3740_s7] ss:$0 sm:$0xff]  ;;  %v781_v17 = vld [vmem:[%s3711_s10 + $0x30] sm:$0xff] }
  0x25   : > { %2532 = vmatprep.subr.bf16.mxu1 %v2788_v4  ;;  %v2121_v28 = vld [vmem:[%s3741_s6] ss:$0 sm:$0xff] }
  0x26   : > { %v2123_v33 = vld [vmem:[%s3710_s9] ss:$0 sm:$0xff] }
  0x27   : > { %2510 = vmatpush3.bf16.msra.mxu0 %v2509_v32  ;;  %v723_v38 = vld [vmem:[%s690_s1] sm:$0xff] }
  0x28   : > { %2534 = vmatpush3.bf16.msra.mxu1 %v2533_v35  ;;  %2511 = vmatprep.subr.bf16.mxu0 %v2788_v4  ;;  %v775_v8 = vld [vmem:[%s3711_s10] sm:$0xff] }
  0x29   : > { %2535 = vmatprep.subr.bf16.mxu1 %v2788_v4  ;;  %v779_v14 = vld [vmem:[%s3711_s10 + $0x20] sm:$0xff] }
  0x2b   : > { %2513 = vmatpush3.bf16.msra.mxu0 %v2512_v39 }
  0x2c   : > { %2537 = vmatpush3.bf16.msra.mxu1 %v2536_v42  ;;  %2514 = vmatprep.subr.bf16.mxu0 %v2788_v4 }
  0x2d   : > { %2538 = vmatprep.subr.bf16.mxu1 %v2788_v4 }
  0x2f   : > { %2516 = vmatpush3.bf16.msra.mxu0 %v2515_v47 }
  0x30   : > { %2540 = vmatpush3.bf16.msra.mxu1 %v2539_v48  ;;  %2517 = vmatprep.subr.bf16.mxu0 %v2788_v4 }
  0x31   : > { %2541 = vmatprep.subr.bf16.mxu1 %v2788_v4 }
  0x33   : > { %2519 = vmatpush3.bf16.msra.mxu0 %v2518_v53 }
  0x34   : > { %2543 = vmatpush3.bf16.msra.mxu1 %v2542_v54  ;;  %2544 = vmatprep.subr.bf16.mxu0 %v2788_v4 }
  0x35   : > { %2406 = vmatprep.subr.mxu1 %v2790_v41 }
  0xa6   : > { %v698_v20 = vpop.xlane.xlu0 %697 }
  0xa7   : > { %v700_v21 = vmul.f32 0.0078125, %v698_v20  ;;  %v771_v20 = vld [vmem:[%s3709_s8 + $0x68] sm:$0xff] }
  0xa9   : > { %v2967_v22 = vsub.f32 %v694_v0, %v700_v21  ;;  %v2563_v21 = vpack.c.bf16 %v771_v20, %v770_v19  ;;  %v783_v20 = vld [vmem:[%s3711_s10 + $0x40] sm:$0xff] }
  0xab   : > { %v702_v23 = vmul.f32 %v2967_v22, %v2967_v22 }
  0xad   : > { %703 = vadd.xlane.f32.xlu0 %v702_v23  ;;  %v773_v23 = vld [vmem:[%s3709_s8 + $0x78] sm:$0xff] }
 0x13a   : > { %v704_v55 = vpop.xlane.xlu0 %703 }
 0x13b   : > { %v705_v56 = vmul.f32 0.0078125, %v704_v55 }
 0x13d   : > { %v706_v57 = vadd.f32 1e-12, %v705_v56 }
 0x13f   : > { %2756 = vrsqrt.f32 %v706_v57 }
 0x149   : > { %v2757_v58 = vpop.eup %2756 }
 0x14a   : > { %v708_v60 = vmul.f32 %v2757_v58, %v2967_v22  ;;  %v772_v22 = vld [vmem:[%s3709_s8 + $0x70] sm:$0xff] }
 0x14b   : > { %v2566_v24 = vpack.c.bf16 %v773_v23, %v772_v22  ;;  %v785_v23 = vld [vmem:[%s3711_s10 + $0x50] sm:$0xff] }
 0x14c   : > { %v715_v0 = vmul.f32 %v2119_v59, %v708_v60 }
 0x14e   : > { %v3058_v2 = vadd.f32 %v2120_v63, %v715_v0 }
 0x150   : > { %2334 = vmatmul.mubr.f32.vlgmr.msra.gmra.mrb[0].mxu0 %v3058_v2  ;;  %2369 = vmatmul.mubr.f32.vlgmr.msra.gmra.mrb[0].mxu1 %v3058_v2 }
 0x151   : > { %2546 = vmatpush3.bf16.msra.mxu0 %v2545_v1  ;;  %2403 = vmatprep.mubr.msk.f32.mxu0 %vm2789_vm0, %v2790_v41 }
 0x152   : > { %2547 = vmatprep.subr.bf16.mxu0 %v2788_v4  ;;  %2408 = vmatprep.mubr.msk.f32.mxu1 %vm2789_vm0, %v2790_v41 }
 0x155   : > { %2549 = vmatpush3.bf16.msra.mxu0 %v2548_v6 }
 0x156   : > { %2550 = vmatprep.subr.bf16.mxu0 %v2788_v4 }
 0x159   : > { %2552 = vmatpush3.bf16.msra.mxu0 %v2551_v9  ;;  %v776_v9 = vld [vmem:[%s3711_s10 + $0x8] sm:$0xff] }
 0x15a   : > { %2553 = vmatprep.subr.bf16.mxu0 %v2788_v4  ;;  %v2569_v11 = vpack.c.bf16 %v776_v9, %v775_v8  ;;  %v810_v8 = vld [vmem:[%s3715_s14 + $0x80] sm:$0xff] }
 0x15d   : > { %2555 = vmatpush3.bf16.msra.mxu0 %v2554_v12  ;;  %v778_v12 = vld [vmem:[%s3711_s10 + $0x18] sm:$0xff] }
 0x15e   : > { %2556 = vmatprep.subr.bf16.mxu0 %v2788_v4  ;;  %v2572_v13 = vpack.c.bf16 %v778_v12, %v777_v10  ;;  %v814_v10 = vld [vmem:[%s3715_s14 + $0xa0] sm:$0xff]  ;;  %v816_v12 = vld [vmem:[%s3715_s14 + $0xb0] sm:$0xff] }
 0x161   : > { %2558 = vmatpush3.bf16.msra.mxu0 %v2557_v15  ;;  %v780_v15 = vld [vmem:[%s3711_s10 + $0x28] sm:$0xff] }
 0x162   : > { %2559 = vmatprep.subr.bf16.mxu0 %v2788_v4  ;;  %v2575_v16 = vpack.c.bf16 %v780_v15, %v779_v14 }
 0x165   : > { %2561 = vmatpush3.bf16.msra.mxu0 %v2560_v18  ;;  %v782_v18 = vld [vmem:[%s3711_s10 + $0x38] sm:$0xff] }
 0x166   : > { %2562 = vmatprep.subr.bf16.mxu0 %v2788_v4  ;;  %v2578_v19 = vpack.c.bf16 %v782_v18, %v781_v17 }
 0x169   : > { %2564 = vmatpush3.bf16.msra.mxu0 %v2563_v21  ;;  %v784_v21 = vld [vmem:[%s3711_s10 + $0x48] sm:$0xff] }
 0x16a   : > { %2565 = vmatprep.subr.bf16.mxu0 %v2788_v4  ;;  %v2581_v22 = vpack.c.bf16 %v784_v21, %v783_v20  ;;  %v823_v20 = vld [vmem:[%s3715_s14 + $0xe8] sm:$0xff]  ;;  %v821_v21 = vld [vmem:[%s3715_s14 + $0xd8] sm:$0xff] }
 0x16d   : > { %2567 = vmatpush3.bf16.msra.mxu0 %v2566_v24  ;;  %v786_v24 = vld [vmem:[%s3711_s10 + $0x58] sm:$0xff] }
 0x170   : > { %2404 = vmatmul.mubr.f32.vlgmr.msra.gmra.mrb[2].mxu0 %v3058_v2 }
 0x171   : > { %1678 = vmatprep.mubr.f32.mxu0 %v2790_v41 }
 0x223   : > { %v998_v26 = vpop.f32.mrb[0].mxu0  ;;  %v1074_v27 = vpop.f32.mrb[0].mxu1 }
 0x224   : > { %v1075_v29 = vadd.f32 %v2122_v25, %v1074_v27  ;;  %v2335_v30 = vpop.f32.mrb[1].mxu0  ;;  %v2370_v31 = vpop.f32.mrb[1].mxu1  ;;  %v999_v32 = vadd.f32 %v2121_v28, %v998_v26  ;;  %v2584_v25 = vpack.c.bf16 %v786_v24, %v785_v23  ;;  %v787_v26 = vld [vmem:[%s3711_s10 + $0x60] sm:$0xff]  ;;  %v788_v27 = vld [vmem:[%s3711_s10 + $0x68] sm:$0xff]  ;;  %v825_v23 = vld [vmem:[%s3715_s14 + $0xf8] sm:$0xff] }
 0x225   : > { %v2587_v28 = vpack.c.bf16 %v788_v27, %v787_v26  ;;  %v790_v30 = vld [vmem:[%s3711_s10 + $0x78] sm:$0xff]  ;;  %v818_v24 = vld [vmem:[%s3715_s14 + $0xc0] sm:$0xff]  ;;  %v2636_v26 = vpack.c.bf16 %v825_v23, %v821_v21 }
 0x226   : > { %1320 = vrot.lane.b32.xlu0 %v1075_v29, %s2791_s25  ;;  %2407 = vmatpush3.xpose.msk.msra.mxu1 %vm1154_vm1, %v1075_v29  ;;  %v789_v29 = vld [vmem:[%s3711_s10 + $0x70] sm:$0xff] }
 0x227   : > { %2411 = vmatprep.subr.mxu1 %v2790_v41  ;;  %v2590_v31 = vpack.c.bf16 %v790_v30, %v789_v29  ;;  %v824_v29 = vld [vmem:[%s3715_s14 + $0xf0] sm:$0xff] }
 0x229   : > { %2409 = vmatmul.mubr.msk.f32.vlgmr.msra.gmra.mrb[2].mxu1 %vm1154_vm1, %v999_v32 }
 0x22a   : > { %2413 = vmatprep.mubr.msk.f32.mxu1 %vm2789_vm0, %v2790_v41 }
 0x243   : > { %v1150_v34 = vpop.f32.mrb[2].mxu0 }
 0x244   : > { %v1151_v35 = vadd.f32 %v2123_v33, %v1150_v34  ;;  %v2405_v36 = vpop.f32.mrb[3].mxu0 }
 0x245   : > { %v2130_v36 = vld [vmem:[%s3712_s11] ss:$0 sm:$0xff] }
 0x246   : > { %2412 = vmatpush3.msra.mxu1 %v1151_v35 }
 0x247   : > { %2416 = vmatprep.subr.mxu1 %v2790_v41 }
 0x298   : > { %v1321_v52 = vpop.permute.xlu0 %1320 }
 0x2fc   : > { %v1227_v37 = vpop.f32.mrb[2].mxu1 }
 0x2fd   : > { %v1231_v39 = vmul.f32 0.125, %v1227_v37  ;;  %v2410_v40 = vpop.f32.mrb[3].mxu1 }
 0x2ff   : > { %v1232_v42 = vadd.f32 %v1231_v39, %v723_v38 }
 0x301   : > { %v1234_v43 = vsel %vm1233_vm2, %v1232_v42, -inf }
 0x302   : > { %1235 = vmax.xlane.f32.xlu1 %v1234_v43  ;;  %v799_v43 = vld [vmem:[%s3715_s14 + $0x28] sm:$0xff] }
 0x38f   : > { %v1236_v44 = vpop.xlane.xlu1 %1235 }
 0x390   : > { %v1237_v45 = vsub.f32 %v1232_v42, %v1236_v44  ;;  %v795_v42 = vld [vmem:[%s3715_s14 + $0x8] sm:$0xff]  ;;  %v797_v44 = vld [vmem:[%s3715_s14 + $0x18] sm:$0xff] }
 0x392   : > { %v1238_v46 = vmul.f32 1.442695, %v1237_v45  ;;  %v2592_v45 = vpack.c.bf16 %v799_v43, %v795_v42  ;;  %v832_v42 = vld [vmem:[%s3715_s14 + $0x130] sm:$0xff]  ;;  %v835_v43 = vld [vmem:[%s3715_s14 + $0x148] sm:$0xff] }
 0x394   : > { %2758 = vpow2.f32 %v1238_v46  ;;  %v801_v46 = vld [vmem:[%s3715_s14 + $0x38] sm:$0xff]  ;;  %2593 = vmatprep.subr.bf16.mxu0 %v2592_v45  ;;  %v839_v45 = vld [vmem:[%s3715_s14 + $0x168] sm:$0xff] }
 0x39e   : > { %v2759_v47 = vpop.eup %2758 }
 0x39f   : > { %v1240_v48 = vsel %vm1233_vm2, %v2759_v47, 0.0 }
 0x3a0   : > { %1241 = vadd.xlane.f32.xlu1 %v1240_v48  ;;  %v2624_v48 = vpack.c.bf16 %v801_v46, %v797_v44  ;;  %v837_v46 = vld [vmem:[%s3715_s14 + $0x158] sm:$0xff] }
 0x3b1   : > { %1318 = vrot.lane.b32.xlu1 %v999_v32, %s2791_s25 }
 0x42d   : > { %v1242_v49 = vpop.xlane.xlu1 %1241 }
 0x42e   : > { %2760 = vrcp.f32 %v1242_v49 }
 0x431   : > { %v1319_v53 = vpop.permute.xlu1 %1318 }
 0x438   : > { %v2761_v50 = vpop.eup %2760 }
 0x439   : > { %v1244_v51 = vmul.f32 %v2761_v50, %v2759_v47  ;;  %v798_v47 = vld [vmem:[%s3715_s14 + $0x20] sm:$0xff]  ;;  %v796_v50 = vld [vmem:[%s3715_s14 + $0x10] sm:$0xff] }
 0x43b   : > { %2414 = vmatmul.mubr.msk.f32.vlgmr.msra.gmra.mrb[4].mxu1 %vm1233_vm2, %v1244_v51  ;;  %v800_v51 = vld [vmem:[%s3715_s14 + $0x30] sm:$0xff] }
 0x43c   : > { %2417 = vmatpush3.xpose.msk.msra.mxu1 %vm1154_vm1, %v1321_v52  ;;  %2418 = vmatprep.mubr.msk.f32.mxu1 %vm2789_vm0, %v2790_v41  ;;  %v803_v52 = vld [vmem:[%s3715_s14 + $0x48] sm:$0xff] }
 0x43d   : > { %2421 = vmatprep.subr.mxu1 %v2790_v41 }
 0x43f   : > { %2419 = vmatmul.mubr.msk.f32.vlgmr.msra.gmra.mrb[6].mxu1 %vm1154_vm1, %v1319_v53  ;;  %v2626_v53 = vpack.c.bf16 %v800_v51, %v796_v50  ;;  %v838_v50 = vld [vmem:[%s3715_s14 + $0x160] sm:$0xff]  ;;  %v836_v51 = vld [vmem:[%s3715_s14 + $0x150] sm:$0xff] }
 0x440   : > { %2423 = vmatprep.mubr.msk.f32.mxu1 %vm2789_vm0, %v2790_v41 }
 0x50e   : > { %v3149_v54 = vpop.f32.mrb[4].mxu1 }
 0x50f   : > { %v2415_v55 = vpop.f32.mrb[5].mxu1 }
 0x510   : > { %v805_v55 = vld [vmem:[%s3715_s14 + $0x58] sm:$0xff] }
 0x512   : > { %v1392_v56 = vpop.f32.mrb[6].mxu1 }
 0x513   : > { %v1396_v57 = vmul.f32 0.125, %v1392_v56  ;;  %v2420_v58 = vpop.f32.mrb[7].mxu1  ;;  %v809_v56 = vld [vmem:[%s3715_s14 + $0x78] sm:$0xff] }
 0x514   : > { %v2628_v58 = vpack.c.bf16 %v809_v56, %v805_v55  ;;  %v847_v55 = vld [vmem:[%s3715_s14 + $0x1a8] sm:$0xff] }
 0x515   : > { %v1397_v59 = vadd.f32 %v1396_v57, %v723_v38 }
 0x517   : > { %v1398_v60 = vsel %vm1233_vm2, %v1397_v59, -inf }
 0x518   : > { %1399 = vmax.xlane.f32.xlu1 %v1398_v60  ;;  %v806_v60 = vld [vmem:[%s3715_s14 + $0x60] sm:$0xff] }
 0x5a5   : > { %v1400_v61 = vpop.xlane.xlu1 %1399 }
 0x5a6   : > { %v1401_v62 = vsub.f32 %v1397_v59, %v1400_v61  ;;  %v802_v59 = vld [vmem:[%s3715_s14 + $0x40] sm:$0xff]  ;;  %v804_v61 = vld [vmem:[%s3715_s14 + $0x50] sm:$0xff] }
 0x5a8   : > { %v1402_v63 = vmul.f32 1.442695, %v1401_v62  ;;  %v2598_v62 = vpack.c.bf16 %v806_v60, %v802_v59  ;;  %v849_v59 = vld [vmem:[%s3715_s14 + $0x1b8] sm:$0xff]  ;;  %v842_v60 = vld [vmem:[%s3715_s14 + $0x180] sm:$0xff] }
 0x5aa   : > { %2762 = vpow2.f32 %v1402_v63  ;;  %v808_v63 = vld [vmem:[%s3715_s14 + $0x70] sm:$0xff] }
 0x5b4   : > { %v2763_v0 = vpop.eup %2762 }
 0x5b5   : > { %v1404_v1 = vsel %vm1233_vm2, %v2763_v0, 0.0 }
 0x5b6   : > { %1405 = vadd.xlane.f32.xlu0 %v1404_v1  ;;  %v815_v1 = vld [vmem:[%s3715_s14 + $0xa8] sm:$0xff] }
 0x5cc   : > { %1410 = vrot.lane.b32.xlu0 %v1151_v35, %s2791_s25 }
 0x643   : > { %v1406_v3 = vpop.xlane.xlu0 %1405 }
 0x644   : > { %2764 = vrcp.f32 %v1406_v3  ;;  %v2630_v3 = vpack.c.bf16 %v808_v63, %v804_v61  ;;  %v844_v63 = vld [vmem:[%s3715_s14 + $0x190] sm:$0xff] }
 0x647   : > { %v1411_v5 = vpop.permute.xlu0 %1410 }
 0x648   : > { %2422 = vmatpush3.msra.mxu1 %v1411_v5 }
 0x649   : > { %2568 = vmatprep.subr.bf16.mxu1 %v2788_v4 }
 0x64e   : > { %v2765_v6 = vpop.eup %2764 }
 0x64f   : > { %v1408_v7 = vmul.f32 %v2765_v6, %v2763_v0  ;;  %v811_v0 = vld [vmem:[%s3715_s14 + $0x88] sm:$0xff]  ;;  %v813_v6 = vld [vmem:[%s3715_s14 + $0x98] sm:$0xff] }
 0x650   : > { %v2600_v5 = vpack.c.bf16 %v815_v1, %v811_v0  ;;  %v848_v0 = vld [vmem:[%s3715_s14 + $0x1b0] sm:$0xff] }
 0x651   : > { %2424 = vmatmul.mubr.msk.f32.vlgmr.msra.gmra.mrb[8].mxu1 %vm1233_vm2, %v1408_v7  ;;  %v817_v7 = vld [vmem:[%s3715_s14 + $0xb8] sm:$0xff] }
 0x652   : > { %2458 = vmatprep.mubr.msk.f32.mxu1 %vm2789_vm0, %v2790_v41  ;;  %2570 = vmatpush3.bf16.msra.mxu1 %v2569_v11  ;;  %v2632_v9 = vpack.c.bf16 %v817_v7, %v813_v6  ;;  %v812_v11 = vld [vmem:[%s3715_s14 + $0x90] sm:$0xff]  ;;  %v853_v6 = vld [vmem:[%s3715_s14 + $0x1d8] sm:$0xff]  ;;  %v2650_v7 = vpack.c.bf16 %v848_v0, %v844_v63 }
 0x653   : > { %2571 = vmatprep.subr.bf16.mxu1 %v2788_v4  ;;  %v2634_v14 = vpack.c.bf16 %v816_v12, %v812_v11  ;;  %v854_v11 = vld [vmem:[%s3715_s14 + $0x1e0] sm:$0xff]  ;;  %v882_v63 = vld [vmem:[%s3717_s16 + $0xb8] sm:$0xff]  ;;  %v913_v0 = vld [vmem:[%s3717_s16 + $0x1b0] sm:$0xff] }
 0x656   : > { %2573 = vmatpush3.bf16.msra.mxu1 %v2572_v13  ;;  %v2602_v13 = vpack.c.bf16 %v814_v10, %v810_v8  ;;  %v850_v10 = vld [vmem:[%s3715_s14 + $0x1c0] sm:$0xff] }
 0x657   : > { %2574 = vmatprep.subr.bf16.mxu1 %v2788_v4 }
 0x65a   : > { %2576 = vmatpush3.bf16.msra.mxu1 %v2575_v16 }
 0x65b   : > { %2577 = vmatprep.subr.bf16.mxu1 %v2788_v4 }
 0x65e   : > { %2579 = vmatpush3.bf16.msra.mxu1 %v2578_v19  ;;  %v819_v19 = vld [vmem:[%s3715_s14 + $0xc8] sm:$0xff] }
 0x65f   : > { %2580 = vmatprep.subr.bf16.mxu1 %v2788_v4 }
 0x662   : > { %2582 = vmatpush3.bf16.msra.mxu1 %v2581_v22  ;;  %v2604_v22 = vpack.c.bf16 %v823_v20, %v819_v19  ;;  %v876_v19 = vld [vmem:[%s3717_s16 + $0x88] sm:$0xff]  ;;  %v907_v20 = vld [vmem:[%s3717_s16 + $0x180] sm:$0xff] }
 0x663   : > { %2583 = vmatprep.subr.bf16.mxu1 %v2788_v4 }
 0x666   : > { %2585 = vmatpush3.bf16.msra.mxu1 %v2584_v25  ;;  %v822_v25 = vld [vmem:[%s3715_s14 + $0xe0] sm:$0xff] }
 0x667   : > { %2586 = vmatprep.subr.bf16.mxu1 %v2788_v4  ;;  %v2606_v27 = vpack.c.bf16 %v822_v25, %v818_v24 }
 0x66a   : > { %2588 = vmatpush3.bf16.msra.mxu1 %v2587_v28  ;;  %v820_v28 = vld [vmem:[%s3715_s14 + $0xd0] sm:$0xff] }
 0x66b   : > { %2589 = vmatprep.subr.bf16.mxu1 %v2788_v4  ;;  %v2638_v30 = vpack.c.bf16 %v824_v29, %v820_v28  ;;  %v2131_v28 = vld [vmem:[%s3713_s12] ss:$0 sm:$0xff] }
 0x66c   : > { %v859_v29 = vld [vmem:[%s3717_s16] sm:$0xff] }
 0x66e   : > { %2591 = vmatpush3.bf16.msra.mxu1 %v2590_v31  ;;  %v827_v31 = vld [vmem:[%s3715_s14 + $0x108] sm:$0xff] }
 0x66f   : > { %2625 = vmatprep.subr.bf16.mxu1 %v2624_v48 }
 0x724   : > { %v1482_v32 = vpop.f32.mrb[8].mxu1 }
 0x725   : > { %1487 = vrot.lane.b32.xlu1 %v1482_v32, %s2791_s25  ;;  %v2425_v33 = vpop.f32.mrb[9].mxu1  ;;  %v831_v32 = vld [vmem:[%s3715_s14 + $0x128] sm:$0xff] }
 0x726   : > { %v829_v33 = vld [vmem:[%s3715_s14 + $0x118] sm:$0xff] }
 0x797   : > { %v1488_v34 = vpop.permute.xlu1 %1487 }
 0x798   : > { %v1490_v35 = vsel %vm1154_vm1, %v3149_v54, %v1488_v34  ;;  %v807_v54 = vld [vmem:[%s3715_s14 + $0x68] sm:$0xff]  ;;  %v2608_v34 = vpack.c.bf16 %v831_v32, %v827_v31  ;;  %v891_v32 = vld [vmem:[%s3717_s16 + $0x100] sm:$0xff] }
 0x799   : > { %2459 = vmatmul.mubr.f32.vlgmr.msra.gmra.mrb[10].mxu1 %v1490_v35  ;;  %v2596_v57 = vpack.c.bf16 %v807_v54, %v803_v52  ;;  %v833_v35 = vld [vmem:[%s3715_s14 + $0x138] sm:$0xff]  ;;  %v843_v54 = vld [vmem:[%s3715_s14 + $0x188] sm:$0xff] }
 0x79a   : > { %1749 = vmatprep.mubr.f32.mxu1 %v2790_v41  ;;  %2627 = vmatpush1.bf16.msra.mxu1 %v2626_v53  ;;  %v840_v53 = vld [vmem:[%s3715_s14 + $0x170] sm:$0xff]  ;;  %v860_v31 = vld [vmem:[%s3717_s16 + $0x8] sm:$0xff] }
 0x79b   : > { %2629 = vmatprep.subr.bf16.mxu1 %v2628_v58  ;;  %v2646_v56 = vpack.c.bf16 %v840_v53, %v836_v51  ;;  %v845_v58 = vld [vmem:[%s3715_s14 + $0x198] sm:$0xff]  ;;  %v880_v51 = vld [vmem:[%s3717_s16 + $0xa8] sm:$0xff] }
 0x79c   : > { %v2648_v61 = vpack.c.bf16 %v849_v59, %v845_v58  ;;  %v895_v59 = vld [vmem:[%s3717_s16 + $0x120] sm:$0xff] }
 0x79e   : > { %2631 = vmatpush1.bf16.msra.mxu1 %v2630_v3  ;;  %v851_v3 = vld [vmem:[%s3715_s14 + $0x1c8] sm:$0xff] }
 0x79f   : > { %2633 = vmatprep.subr.bf16.mxu1 %v2632_v9  ;;  %v857_v9 = vld [vmem:[%s3715_s14 + $0x1f8] sm:$0xff] }
 0x7a0   : > { %v2652_v12 = vpack.c.bf16 %v857_v9, %v853_v6  ;;  %v866_v6 = vld [vmem:[%s3717_s16 + $0x38] sm:$0xff]  ;;  %v897_v9 = vld [vmem:[%s3717_s16 + $0x130] sm:$0xff] }
 0x7a2   : > { %2635 = vmatpush1.bf16.msra.mxu1 %v2634_v14  ;;  %v856_v14 = vld [vmem:[%s3715_s14 + $0x1f0] sm:$0xff] }
 0x7a3   : > { %2637 = vmatprep.subr.bf16.mxu1 %v2636_v26 }
 0x7a6   : > { %2639 = vmatpush1.bf16.msra.mxu1 %v2638_v30 }
 0x86c   : > { %v1563_v37 = vpop.f32.mrb[10].mxu1 }
 0x86d   : > { %v1564_v38 = vadd.f32 %v2130_v36, %v1563_v37  ;;  %v2460_v39 = vpop.f32.mrb[11].mxu1  ;;  %v826_v36 = vld [vmem:[%s3715_s14 + $0x100] sm:$0xff] }
 0x86e   : > { %v830_v37 = vld [vmem:[%s3715_s14 + $0x120] sm:$0xff] }
 0x86f   : > { %v1567_v40 = vadd.f32 %v1564_v38, %v3058_v2  ;;  %v794_v2 = vld [vmem:[%s3715_s14] sm:$0xff]  ;;  %v2640_v38 = vpack.c.bf16 %v833_v35, %v829_v33  ;;  %v2610_v39 = vpack.c.bf16 %v830_v37, %v826_v36  ;;  %v892_v33 = vld [vmem:[%s3717_s16 + $0x108] sm:$0xff]  ;;  %v2658_v36 = vpack.c.bf16 %v860_v31, %v859_v29  ;;  %v918_v29 = vld [vmem:[%s3717_s16 + $0x1d8] sm:$0xff] }
 0x870   : > { %v2594_v49 = vpack.c.bf16 %v798_v47, %v794_v2  ;;  %v841_v2 = vld [vmem:[%s3715_s14 + $0x178] sm:$0xff]  ;;  %v2612_v47 = vpack.c.bf16 %v839_v45, %v835_v43  ;;  %v2690_v37 = vpack.c.bf16 %v892_v33, %v891_v32  ;;  %v901_v33 = vld [vmem:[%s3717_s16 + $0x150] sm:$0xff] }
 0x871   : > { %1568 = vadd.xlane.f32.xlu1 %v1567_v40  ;;  %2641 = vmatprep.subr.bf16.mxu1 %v2640_v38  ;;  %v2644_v48 = vpack.c.bf16 %v841_v2, %v837_v46  ;;  %v877_v38 = vld [vmem:[%s3717_s16 + $0x90] sm:$0xff]  ;;  %v910_v43 = vld [vmem:[%s3717_s16 + $0x198] sm:$0xff] }
 0x872   : > { %2595 = vmatpush1.bf16.msra.mxu0 %v2594_v49  ;;  %v834_v49 = vld [vmem:[%s3715_s14 + $0x140] sm:$0xff]  ;;  %v862_v45 = vld [vmem:[%s3717_s16 + $0x18] sm:$0xff] }
 0x873   : > { %2597 = vmatprep.subr.bf16.mxu0 %v2596_v57  ;;  %v2614_v52 = vpack.c.bf16 %v838_v50, %v834_v49  ;;  %v2616_v57 = vpack.c.bf16 %v847_v55, %v843_v54  ;;  %v879_v50 = vld [vmem:[%s3717_s16 + $0xa0] sm:$0xff]  ;;  %v912_v54 = vld [vmem:[%s3717_s16 + $0x1a8] sm:$0xff]  ;;  %v870_v32 = vld [vmem:[%s3717_s16 + $0x58] sm:$0xff] }
 0x874   : > { %v2664_v53 = vpack.c.bf16 %v880_v51, %v879_v50  ;;  %v863_v55 = vld [vmem:[%s3717_s16 + $0x20] sm:$0xff]  ;;  %v922_v50 = vld [vmem:[%s3717_s16 + $0x1f8] sm:$0xff] }
 0x876   : > { %2599 = vmatpush1.bf16.msra.mxu0 %v2598_v62  ;;  %v846_v62 = vld [vmem:[%s3715_s14 + $0x1a0] sm:$0xff] }
 0x877   : > { %2601 = vmatprep.subr.bf16.mxu0 %v2600_v5  ;;  %v2618_v1 = vpack.c.bf16 %v846_v62, %v842_v60  ;;  %v855_v5 = vld [vmem:[%s3715_s14 + $0x1e8] sm:$0xff]  ;;  %v881_v62 = vld [vmem:[%s3717_s16 + $0xb0] sm:$0xff] }
 0x878   : > { %v2620_v8 = vpack.c.bf16 %v855_v5, %v851_v3  ;;  %v896_v60 = vld [vmem:[%s3717_s16 + $0x128] sm:$0xff]  ;;  %v914_v3 = vld [vmem:[%s3717_s16 + $0x1b8] sm:$0xff]  ;;  %v865_v5 = vld [vmem:[%s3717_s16 + $0x30] sm:$0xff] }
 0x87a   : > { %2603 = vmatpush1.bf16.msra.mxu0 %v2602_v13  ;;  %v852_v13 = vld [vmem:[%s3715_s14 + $0x1d0] sm:$0xff] }
 0x87b   : > { %2605 = vmatprep.subr.bf16.mxu0 %v2604_v22  ;;  %v908_v22 = vld [vmem:[%s3717_s16 + $0x188] sm:$0xff] }
 0x87c   : > { %v2688_v23 = vpack.c.bf16 %v908_v22, %v907_v20  ;;  %v868_v20 = vld [vmem:[%s3717_s16 + $0x48] sm:$0xff] }
 0x87e   : > { %2607 = vmatpush1.bf16.msra.mxu0 %v2606_v27 }
 0x87f   : > { %2609 = vmatprep.subr.bf16.mxu0 %v2608_v34  ;;  %v2132_v34 = vld [vmem:[%s3714_s13] ss:$0 sm:$0xff] }
 0x882   : > { %2611 = vmatpush1.bf16.msra.mxu0 %v2610_v39  ;;  %v878_v39 = vld [vmem:[%s3717_s16 + $0x98] sm:$0xff] }
 0x883   : > { %2613 = vmatprep.subr.bf16.mxu0 %v2612_v47  ;;  %v893_v47 = vld [vmem:[%s3717_s16 + $0x110] sm:$0xff] }
 0x886   : > { %2615 = vmatpush1.bf16.msra.mxu0 %v2614_v52  ;;  %v911_v52 = vld [vmem:[%s3717_s16 + $0x1a0] sm:$0xff] }
 0x887   : > { %2617 = vmatprep.subr.bf16.mxu0 %v2616_v57  ;;  %v2696_v57 = vpack.c.bf16 %v912_v54, %v911_v52  ;;  %v873_v54 = vld [vmem:[%s3717_s16 + $0x70] sm:$0xff] }
 0x88a   : > { %2619 = vmatpush1.bf16.msra.mxu0 %v2618_v1  ;;  %v2668_v1 = vpack.c.bf16 %v882_v63, %v881_v62 }
 0x88b   : > { %2621 = vmatprep.subr.bf16.mxu0 %v2620_v8  ;;  %v2670_v8 = vpack.c.bf16 %v866_v6, %v865_v5 }
 0x8fe   : > { %v1569_v15 = vpop.xlane.xlu1 %1568 }
 0x8ff   : > { %v1570_v16 = vmul.f32 0.0078125, %v1569_v15  ;;  %v2622_v15 = vpack.c.bf16 %v854_v11, %v850_v10  ;;  %v898_v10 = vld [vmem:[%s3717_s16 + $0x138] sm:$0xff]  ;;  %v883_v11 = vld [vmem:[%s3717_s16 + $0xc0] sm:$0xff] }
 0x901   : > { %v3293_v17 = vsub.f32 %v1567_v40, %v1570_v16  ;;  %v828_v40 = vld [vmem:[%s3715_s14 + $0x110] sm:$0xff]  ;;  %v2654_v16 = vpack.c.bf16 %v856_v14, %v852_v13  ;;  %2623 = vmatpush1.bf16.msra.mxu0 %v2622_v15  ;;  %v884_v13 = vld [vmem:[%s3717_s16 + $0xc8] sm:$0xff]  ;;  %v915_v14 = vld [vmem:[%s3717_s16 + $0x1c0] sm:$0xff] }
 0x902   : > { %v2642_v44 = vpack.c.bf16 %v832_v42, %v828_v40  ;;  %v909_v40 = vld [vmem:[%s3717_s16 + $0x190] sm:$0xff]  ;;  %v2660_v42 = vpack.c.bf16 %v878_v39, %v877_v38  ;;  %v916_v15 = vld [vmem:[%s3717_s16 + $0x1c8] sm:$0xff]  ;;  %v919_v38 = vld [vmem:[%s3717_s16 + $0x1e0] sm:$0xff] }
 0x903   : > { %v1572_v18 = vmul.f32 %v3293_v17, %v3293_v17  ;;  %v2692_v46 = vpack.c.bf16 %v910_v43, %v909_v40  ;;  %v871_v43 = vld [vmem:[%s3717_s16 + $0x60] sm:$0xff] }
 0x904   : > { %2643 = vmatpush1.bf16.msra.mxu1 %v2642_v44  ;;  %v861_v44 = vld [vmem:[%s3717_s16 + $0x10] sm:$0xff] }
 0x905   : > { %1573 = vadd.xlane.f32.xlu0 %v1572_v18  ;;  %2645 = vmatprep.subr.bf16.mxu1 %v2644_v48  ;;  %v875_v18 = vld [vmem:[%s3717_s16 + $0x80] sm:$0xff]  ;;  %v2662_v2 = vpack.c.bf16 %v862_v45, %v861_v44  ;;  %v894_v48 = vld [vmem:[%s3717_s16 + $0x118] sm:$0xff]  ;;  %v872_v44 = vld [vmem:[%s3717_s16 + $0x68] sm:$0xff] }
 0x906   : > { %v2656_v21 = vpack.c.bf16 %v876_v19, %v875_v18  ;;  %v2694_v49 = vpack.c.bf16 %v894_v48, %v893_v47  ;;  %v2704_v18 = vpack.c.bf16 %v916_v15, %v915_v14  ;;  %v867_v19 = vld [vmem:[%s3717_s16 + $0x40] sm:$0xff]  ;;  %v889_v47 = vld [vmem:[%s3717_s16 + $0xf0] sm:$0xff]  ;;  %v890_v48 = vld [vmem:[%s3717_s16 + $0xf8] sm:$0xff]  ;;  %v2682_v51 = vpack.c.bf16 %v872_v44, %v871_v43 }
 0x907   : > { %v2674_v22 = vpack.c.bf16 %v868_v20, %v867_v19 }
 0x908   : > { %2647 = vmatpush1.bf16.msra.mxu1 %v2646_v56  ;;  %2657 = vmatprep.subr.bf16.mxu0 %v2656_v21  ;;  %v864_v56 = vld [vmem:[%s3717_s16 + $0x28] sm:$0xff]  ;;  %v899_v21 = vld [vmem:[%s3717_s16 + $0x140] sm:$0xff] }
 0x909   : > { %2649 = vmatprep.subr.bf16.mxu1 %v2648_v61  ;;  %v2666_v58 = vpack.c.bf16 %v864_v56, %v863_v55  ;;  %v2698_v61 = vpack.c.bf16 %v896_v60, %v895_v59  ;;  %v874_v55 = vld [vmem:[%s3717_s16 + $0x78] sm:$0xff] }
 0x90a   : > { %v2686_v59 = vpack.c.bf16 %v874_v55, %v873_v54 }
 0x90c   : > { %2651 = vmatpush1.bf16.msra.mxu1 %v2650_v7  ;;  %v2700_v7 = vpack.c.bf16 %v914_v3, %v913_v0 }
 0x90d   : > { %2653 = vmatprep.subr.bf16.mxu1 %v2652_v12  ;;  %v2702_v12 = vpack.c.bf16 %v898_v10, %v897_v9 }
 0x910   : > { %2655 = vmatpush1.bf16.msra.mxu1 %v2654_v16  ;;  %v2672_v16 = vpack.c.bf16 %v884_v13, %v883_v11 }
 0x911   : > { %2689 = vmatprep.subr.bf16.mxu1 %v2688_v23  ;;  %v900_v23 = vld [vmem:[%s3717_s16 + $0x148] sm:$0xff] }
 0x992   : > { %v1574_v24 = vpop.xlane.xlu0 %1573 }
 0x993   : > { %v1575_v25 = vmul.f32 0.0078125, %v1574_v24  ;;  %v885_v24 = vld [vmem:[%s3717_s16 + $0xd0] sm:$0xff] }
 0x995   : > { %v1576_v26 = vadd.f32 1e-12, %v1575_v25  ;;  %v886_v25 = vld [vmem:[%s3717_s16 + $0xd8] sm:$0xff] }
 0x997   : > { %2766 = vrsqrt.f32 %v1576_v26  ;;  %v2706_v26 = vpack.c.bf16 %v900_v23, %v899_v21 }
 0x9a1   : > { %v2767_v27 = vpop.eup %2766 }
 0x9a2   : > { %v1578_v30 = vmul.f32 %v2767_v27, %v3293_v17  ;;  %v2676_v27 = vpack.c.bf16 %v886_v25, %v885_v24 }
 0x9a4   : > { %v1585_v35 = vmul.f32 %v2131_v28, %v1578_v30  ;;  %v917_v28 = vld [vmem:[%s3717_s16 + $0x1d0] sm:$0xff] }
 0x9a5   : > { %v869_v30 = vld [vmem:[%s3717_s16 + $0x50] sm:$0xff]  ;;  %v2708_v31 = vpack.c.bf16 %v918_v29, %v917_v28 }
 0x9a6   : > { %v3448_v17 = vadd.f32 %v2132_v34, %v1585_v35  ;;  %v902_v34 = vld [vmem:[%s3717_s16 + $0x158] sm:$0xff]  ;;  %v2678_v35 = vpack.c.bf16 %v870_v32, %v869_v30 }
 0x9a7   : > { %v2710_v39 = vpack.c.bf16 %v902_v34, %v901_v33 }
 0x9a8   : > { %1679 = vmatmul.mubr.f32.vlgmr.msra.gmra.mrb[4].mxu0 %v3448_v17  ;;  %1750 = vmatmul.mubr.f32.vlgmr.msra.gmra.mrb[12].mxu1 %v3448_v17 }
 0x9a9   : > { %2659 = vmatpush3.bf16.msra.mxu0 %v2658_v36  ;;  %2691 = vmatpush3.bf16.msra.mxu1 %v2690_v37  ;;  %v887_v36 = vld [vmem:[%s3717_s16 + $0xe0] sm:$0xff]  ;;  %v888_v37 = vld [vmem:[%s3717_s16 + $0xe8] sm:$0xff] }
 0x9aa   : > { %2661 = vmatprep.subr.bf16.mxu0 %v2660_v42  ;;  %2693 = vmatprep.subr.bf16.mxu1 %v2692_v46  ;;  %v2680_v40 = vpack.c.bf16 %v888_v37, %v887_v36  ;;  %v920_v42 = vld [vmem:[%s3717_s16 + $0x1e8] sm:$0xff]  ;;  %v903_v46 = vld [vmem:[%s3717_s16 + $0x160] sm:$0xff] }
 0x9ab   : > { %v2712_v45 = vpack.c.bf16 %v920_v42, %v919_v38 }
 0x9ad   : > { %2663 = vmatpush3.bf16.msra.mxu0 %v2662_v2  ;;  %2695 = vmatpush3.bf16.msra.mxu1 %v2694_v49  ;;  %v904_v2 = vld [vmem:[%s3717_s16 + $0x168] sm:$0xff]  ;;  %v921_v49 = vld [vmem:[%s3717_s16 + $0x1f0] sm:$0xff] }
 0x9ae   : > { %2665 = vmatprep.subr.bf16.mxu0 %v2664_v53  ;;  %2697 = vmatprep.subr.bf16.mxu1 %v2696_v57  ;;  %v2714_v52 = vpack.c.bf16 %v904_v2, %v903_v46  ;;  %v2684_v53 = vpack.c.bf16 %v890_v48, %v889_v47  ;;  %v2716_v56 = vpack.c.bf16 %v922_v50, %v921_v49  ;;  %v905_v57 = vld [vmem:[%s3717_s16 + $0x170] sm:$0xff] }
 0x9b1   : > { %2667 = vmatpush3.bf16.msra.mxu0 %v2666_v58  ;;  %2699 = vmatpush3.bf16.msra.mxu1 %v2698_v61  ;;  %v906_v58 = vld [vmem:[%s3717_s16 + $0x178] sm:$0xff]  ;;  %v1594_v61 = vlaneseq }
 0x9b2   : > { %2669 = vmatprep.subr.bf16.mxu0 %v2668_v1  ;;  %2701 = vmatprep.subr.bf16.mxu1 %v2700_v7  ;;  %v2718_v60 = vpack.c.bf16 %v906_v58, %v905_v57  ;;  %v858_v1 = vld [vmem:[%s3716_s15] sm:$0xf] }
 0x9b3   : > { %v1595_v62 = vshrl.u32 %v1594_v61, 7  ;;  %v2133_v57 = vld [vmem:[%s3718_s17] ss:$0 sm:$0xff] }
 0x9b5   : > { %2671 = vmatpush3.bf16.msra.mxu0 %v2670_v8  ;;  %2703 = vmatpush3.bf16.msra.mxu1 %v2702_v12  ;;  %v1596_v63 = vsub.s32 0, %v1595_v62  ;;  %v1604_v0 = vsub.s32 2, %v1595_v62  ;;  %v1600_v3 = vsub.s32 1, %v1595_v62  ;;  %v1608_v5 = vsub.s32 3, %v1595_v62 }
 0x9b6   : > { %2673 = vmatprep.subr.bf16.mxu0 %v2672_v16  ;;  %2705 = vmatprep.subr.bf16.mxu1 %v2704_v18 }
 0x9b7   : > { %v1597_v6 = vrot.slane %v858_v1, %v1596_v63  ;;  %v1605_v7 = vrot.slane %v858_v1, %v1604_v0  ;;  %v1601_v8 = vrot.slane %v858_v1, %v1600_v3  ;;  %v1609_v9 = vrot.slane %v858_v1, %v1608_v5  ;;  %v1964_v1 = vld [vmem:[%s3721_s20] sm:$0xff]  ;;  %v1966_v3 = vld [vmem:[%s3721_s20 + $0x10] sm:$0xff] }
 0x9b9   : > { %2675 = vmatpush3.bf16.msra.mxu0 %v2674_v22  ;;  %2707 = vmatpush3.bf16.msra.mxu1 %v2706_v26 }
 0x9ba   : > { %2677 = vmatprep.subr.bf16.mxu0 %v2676_v27  ;;  %2709 = vmatprep.subr.bf16.mxu1 %v2708_v31 }
 0x9bd   : > { %2679 = vmatpush3.bf16.msra.mxu0 %v2678_v35  ;;  %2711 = vmatpush3.bf16.msra.mxu1 %v2710_v39 }
 0x9be   : > { %2681 = vmatprep.subr.bf16.mxu0 %v2680_v40  ;;  %2713 = vmatprep.subr.bf16.mxu1 %v2712_v45 }
 0x9c1   : > { %2683 = vmatpush3.bf16.msra.mxu0 %v2682_v51  ;;  %2715 = vmatpush3.bf16.msra.mxu1 %v2714_v52 }
 0x9c2   : > { %2685 = vmatprep.subr.bf16.mxu0 %v2684_v53  ;;  %2717 = vmatprep.subr.bf16.mxu1 %v2716_v56 }
 0x9c5   : > { %2687 = vmatpush3.bf16.msra.mxu0 %v2686_v59  ;;  %2719 = vmatpush3.bf16.msra.mxu1 %v2718_v60 }
 0x9c6   : > { %2720 = vmatprep.subr.bf16.mxu0 %v2788_v4 }
 0xa7b   : > { %v1680_v10 = vpop.f32.mrb[4].mxu0  ;;  %v1751_v11 = vpop.f32.mrb[12].mxu1 }
 0xa7c   : > { %v1681_v12 = vadd.f32 %v1680_v10, %v1597_v6  ;;  %v1752_v13 = vadd.f32 %v1751_v11, %v1605_v7  ;;  %v1682_v14 = vpop.f32.mrb[5].mxu0  ;;  %v1753_v15 = vpop.f32.mrb[13].mxu1  ;;  %v1967_v6 = vld [vmem:[%s3721_s20 + $0x18] sm:$0xff]  ;;  %v1968_v7 = vld [vmem:[%s3721_s20 + $0x20] sm:$0xff] }
 0xa7d   : > { %v1683_v16 = vadd.f32 %v1682_v14, %v1601_v8  ;;  %v1754_v18 = vadd.f32 %v1753_v15, %v1609_v9  ;;  %v1969_v8 = vld [vmem:[%s3721_s20 + $0x28] sm:$0xff]  ;;  %v1970_v14 = vld [vmem:[%s3721_s20 + $0x30] sm:$0xff]  ;;  %v1971_v15 = vld [vmem:[%s3721_s20 + $0x38] sm:$0xff] }
 0xa7e   : > { %v1760_v19 = vmul.f32 0.044715, %v1681_v12  ;;  %v1762_v20 = vmul.f32 0.044715, %v1752_v13  ;;  %v1756_v48 = vmul.f32 0.5, %v1681_v12  ;;  %v1758_v50 = vmul.f32 0.5, %v1752_v13 }
 0xa7f   : > { %v1761_v21 = vmul.f32 0.044715, %v1683_v16  ;;  %v1763_v22 = vmul.f32 0.044715, %v1754_v18  ;;  %v1757_v44 = vmul.f32 0.5, %v1683_v16  ;;  %v1759_v2 = vmul.f32 0.5, %v1754_v18 }
 0xa80   : > { %v1764_v23 = vmul.f32 %v1760_v19, %v1681_v12  ;;  %v1766_v24 = vmul.f32 %v1762_v20, %v1752_v13  ;;  %v2727_v9 = vpack.c.bf16 %v1969_v8, %v1968_v7  ;;  %v1973_v19 = vld [vmem:[%s3721_s20 + $0x48] sm:$0xff] }
 0xa81   : > { %v1765_v25 = vmul.f32 %v1761_v21, %v1683_v16  ;;  %v1767_v26 = vmul.f32 %v1763_v22, %v1754_v18  ;;  %v1974_v21 = vld [vmem:[%s3721_s20 + $0x50] sm:$0xff]  ;;  %v1975_v22 = vld [vmem:[%s3721_s20 + $0x58] sm:$0xff] }
 0xa82   : > { %v1768_v27 = vmul.f32 %v1764_v23, %v1681_v12  ;;  %v1770_v28 = vmul.f32 %v1766_v24, %v1752_v13  ;;  %v2736_v23 = vpack.c.bf16 %v1975_v22, %v1974_v21  ;;  %v1976_v24 = vld [vmem:[%s3721_s20 + $0x60] sm:$0xff] }
 0xa83   : > { %v1769_v29 = vmul.f32 %v1765_v25, %v1683_v16  ;;  %v1771_v30 = vmul.f32 %v1767_v26, %v1754_v18  ;;  %v1977_v25 = vld [vmem:[%s3721_s20 + $0x68] sm:$0xff] }
 0xa84   : > { %v1772_v31 = vadd.f32 %v1768_v27, %v1681_v12  ;;  %v1774_v32 = vadd.f32 %v1770_v28, %v1752_v13  ;;  %v2739_v26 = vpack.c.bf16 %v1977_v25, %v1976_v24  ;;  %v1978_v27 = vld [vmem:[%s3721_s20 + $0x70] sm:$0xff]  ;;  %v1979_v28 = vld [vmem:[%s3721_s20 + $0x78] sm:$0xff] }
 0xa85   : > { %v1773_v33 = vadd.f32 %v1769_v29, %v1683_v16  ;;  %v1775_v34 = vadd.f32 %v1771_v30, %v1754_v18  ;;  %v2730_v16 = vpack.c.bf16 %v1971_v15, %v1970_v14  ;;  %v1972_v18 = vld [vmem:[%s3721_s20 + $0x40] sm:$0xff]  ;;  %v2742_v29 = vpack.c.bf16 %v1979_v28, %v1978_v27 }
 0xa86   : > { %v1776_v35 = vmul.f32 0.7978846, %v1772_v31  ;;  %v1778_v38 = vmul.f32 0.7978846, %v1774_v32  ;;  %v2733_v20 = vpack.c.bf16 %v1973_v19, %v1972_v18 }
 0xa87   : > { %v1777_v36 = vmul.f32 0.7978846, %v1773_v33  ;;  %v1779_v37 = vmul.f32 0.7978846, %v1775_v34  ;;  %v2134_v34 = vld [vmem:[%s3719_s18] ss:$0 sm:$0xff] }
 0xa88   : > { %2768 = vtanh.f32 %v1776_v35 }
 0xa89   : > { %2770 = vtanh.f32 %v1777_v36  ;;  %v2135_v36 = vld [vmem:[%s3720_s19] ss:$0 sm:$0xff] }
 0xa8a   : > { %2772 = vtanh.f32 %v1779_v37 }
 0xa8b   : > { %2774 = vtanh.f32 %v1778_v38 }
 0xa92   : > { %v2769_v39 = vpop.eup %2768 }
 0xa93   : > { %v2771_v40 = vpop.eup %2770  ;;  %v1784_v42 = vadd.f32 1.0, %v2769_v39 }
 0xa94   : > { %v2773_v43 = vpop.eup %2772  ;;  %v1785_v45 = vadd.f32 1.0, %v2771_v40 }
 0xa95   : > { %v2775_v46 = vpop.eup %2774  ;;  %v1787_v47 = vadd.f32 1.0, %v2773_v43  ;;  %v1788_v53 = vmul.f32 %v1784_v42, %v1756_v48 }
 0xa96   : > { %v1789_v49 = vmul.f32 %v1785_v45, %v1757_v44  ;;  %v1786_v51 = vadd.f32 1.0, %v2775_v46 }
 0xa97   : > { %v1791_v52 = vmul.f32 %v1787_v47, %v1759_v2 }
 0xa98   : > { %1862 = vmatprep.mubr.f32.mxu0 %v1789_v49  ;;  %v1790_v54 = vmul.f32 %v1786_v51, %v1758_v50 }
 0xa99   : > { %1932 = vmatprep.mubr.f32.mxu1 %v1791_v52  ;;  %1863 = vmatmul.mubr.f32.vlgmr.msra.gmra.mrb[6].mxu0 %v1788_v53 }
 0xa9a   : > { %1933 = vmatmul.mubr.f32.vlgmr.msra.gmra.mrb[14].mxu1 %v1790_v54  ;;  %2493 = vmatprep.mubr.msk.f32.mxu0 %vm2789_vm0, %v2790_v41  ;;  %v1965_v41 = vld [vmem:[%s3721_s20 + $0x8] sm:$0xff] }
 0xa9b   : > { %v2721_v5 = vpack.c.bf16 %v1965_v41, %v1964_v1 }
 0xa9d   : > { %2722 = vmatpush3.bf16.msra.mxu0 %v2721_v5 }
 0xa9e   : > { %2723 = vmatprep.subr.bf16.mxu0 %v2788_v4 }
 0xb6c   : > { %v2246_v55 = vpop.f32.mrb[6].mxu0 }
 0xb6d   : > { %v2281_v56 = vpop.f32.mrb[14].mxu1  ;;  %v2247_v58 = vpop.f32.mrb[7].mxu0 }
 0xb6e   : > { %v2248_v59 = vadd.f32 %v2247_v58, %v2246_v55  ;;  %v2282_v60 = vpop.f32.mrb[15].mxu1 }
 0xb6f   : > { %v2283_v61 = vadd.f32 %v2282_v60, %v2281_v56 }
 0xb70   : > { %v1865_v62 = vadd.f32 %v2248_v59, %v2133_v57 }
 0xb72   : > { %v1935_v63 = vadd.f32 %v2283_v61, %v1865_v62 }
 0xb74   : > { %v1938_v0 = vadd.f32 %v1935_v63, %v3448_v17  ;;  %v2724_v17 = vpack.c.bf16 %v1967_v6, %v1966_v3 }
 0xb76   : > { %1939 = vadd.xlane.f32.xlu0 %v1938_v0  ;;  %2725 = vmatpush3.bf16.msra.mxu0 %v2724_v17 }
 0xb77   : > { %2726 = vmatprep.subr.bf16.mxu0 %v2788_v4 }
 0xb7a   : > { %2728 = vmatpush3.bf16.msra.mxu0 %v2727_v9 }
 0xb7b   : > { %2729 = vmatprep.subr.bf16.mxu0 %v2788_v4 }
 0xb7e   : > { %2731 = vmatpush3.bf16.msra.mxu0 %v2730_v16 }
 0xb7f   : > { %2732 = vmatprep.subr.bf16.mxu0 %v2788_v4 }
 0xb82   : > { %2734 = vmatpush3.bf16.msra.mxu0 %v2733_v20 }
 0xb83   : > { %2735 = vmatprep.subr.bf16.mxu0 %v2788_v4 }
 0xb86   : > { %2737 = vmatpush3.bf16.msra.mxu0 %v2736_v23 }
 0xb87   : > { %2738 = vmatprep.subr.bf16.mxu0 %v2788_v4 }
 0xb8a   : > { %2740 = vmatpush3.bf16.msra.mxu0 %v2739_v26 }
 0xb8b   : > { %2741 = vmatprep.subr.bf16.mxu0 %v2788_v4  ;;  %v1980_v4 = vld [vmem:[%s3722_s21] sm:$0x1] }
 0xb8e   : > { %2743 = vmatpush3.bf16.msra.mxu0 %v2742_v29 }
 0xc03   : > { %v1940_v10 = vpop.xlane.xlu0 %1939 }
 0xc04   : > { %v1941_v11 = vmul.f32 0.0078125, %v1940_v10 }
 0xc06   : > { %v1942_v12 = vsub.f32 %v1938_v0, %v1941_v11 }
 0xc08   : > { %v1943_v13 = vmul.f32 %v1942_v12, %v1942_v12 }
 0xc0a   : > { %1944 = vadd.xlane.f32.xlu1 %v1943_v13 }
 0xc97   : > { %v1945_v30 = vpop.xlane.xlu1 %1944 }
 0xc98   : > { %v1946_v31 = vmul.f32 0.0078125, %v1945_v30 }
 0xc9a   : > { %v1947_v32 = vadd.f32 1e-12, %v1946_v31 }
 0xc9c   : > { %2776 = vrsqrt.f32 %v1947_v32 }
 0xca6   : > { %v2777_v33 = vpop.eup %2776 }
 0xca7   : > { %v1949_v35 = vmul.f32 %v2777_v33, %v1942_v12 }
 0xca9   : > { %v1956_v37 = vmul.f32 %v2134_v34, %v1949_v35 }
 0xcab   : > { %v1963_v38 = vadd.f32 %v2135_v36, %v1956_v37 }
 0xcad   : > { %2494 = vmatmul.mubr.f32.vlgmr.msra.gmra.mrb[8].mxu0 %v1963_v38 }
 0xd80   : > { %v2047_v39 = vpop.f32.mrb[8].mxu0 }
 0xd81   : > { %v2048_v40 = vadd.f32 %v2047_v39, %v1980_v4  ;;  %v2495_v42 = vpop.f32.mrb[9].mxu0 }
 0xd83   : > { %2778 = vtanh.f32 %v2048_v40 }
 0xd8d   : > { %v2779_v43 = vpop.eup %2778 }
 0xd8e   : > { %2052 = vst [vmem:[%s693_s30] sm:$0x1] %v2779_v43 }
 0xd8f PF: > { %s32_s3 = sadd.s32 1, %s2786_s3  }
 0xd90   : > { %p29_p4 = scmp.ge.s32.totalorder %s32_s3, 4  }
 0xd92   :  { %31 = sbr.rel (!%p29_p4) target bundleno = 9 (0x9), region = 141 }

// kernel: teacher_forward.4
= control target key start
LH: loop header
LB: loop body
LE: loop exit
PB: predicated region body
PF: predicated region fallthrough
CT: control target
= control target key end

     0   :  { %s4562_s0 = inlined_call_operand.vmem [shape: f32[2,24,128], index: 0, kind: input, shape index: {}]   ;;  %s4563_s1 = inlined_call_operand.vmem [shape: f32[2,24,24], index: 1, kind: input, shape index: {}]   ;;  %s4564_s2 = inlined_call_operand.vmem [shape: f32[1,128], index: 2, kind: input, shape index: {}]   ;;  %s4565_s3 = inlined_call_operand.vmem [shape: f32[1,128], index: 3, kind: input, shape index: {}]   ;;  %s4566_s4 = inlined_call_operand.vmem [shape: f32[128,128], index: 4, kind: input, shape index: {}]   ;;  %s4567_s5 = inlined_call_operand.vmem [shape: f32[1,128], index: 5, kind: input, shape index: {}]   ;;  %s4568_s6 = inlined_call_operand.vmem [shape: f32[128,128], index: 6, kind: input, shape index: {}]   ;;  %s4569_s7 = inlined_call_operand.vmem [shape: f32[1,128], index: 7, kind: input, shape index: {}]   ;;  %s4570_s8 = inlined_call_operand.vmem [shape: f32[128,128], index: 8, kind: input, shape index: {}]   ;;  %s4571_s9 = inlined_call_operand.vmem [shape: f32[1,128], index: 9, kind: input, shape index: {}]   ;;  %s4572_s10 = inlined_call_operand.vmem [shape: f32[128,128], index: 10, kind: input, shape index: {}]   ;;  %s4573_s11 = inlined_call_operand.vmem [shape: f32[1,128], index: 11, kind: input, shape index: {}]   ;;  %s4574_s12 = inlined_call_operand.vmem [shape: f32[1,128], index: 12, kind: input, shape index: {}]   ;;  %s4575_s13 = inlined_call_operand.vmem [shape: f32[1,128], index: 13, kind: input, shape index: {}]   ;;  %s4576_s14 = inlined_call_operand.vmem [shape: f32[128,512], index: 14, kind: input, shape index: {}]   ;;  %s4577_s15 = inlined_call_operand.vmem [shape: f32[1,512], index: 15, kind: input, shape index: {}]   ;;  %s4578_s16 = inlined_call_operand.vmem [shape: f32[512,128], index: 16, kind: input, shape index: {}]   ;;  %s4579_s17 = inlined_call_operand.vmem [shape: f32[1,128], index: 17, kind: input, shape index: {}]   ;;  %s4580_s18 = inlined_call_operand.vmem [shape: f32[1,128], index: 18, kind: input, shape index: {}]   ;;  %s4581_s19 = inlined_call_operand.vmem [shape: f32[1,128], index: 19, kind: input, shape index: {}]   ;;  %s4582_s20 = inlined_call_operand.vmem [shape: f32[128,128], index: 20, kind: input, shape index: {}]   ;;  %s4583_s21 = inlined_call_operand.vmem [shape: f32[1,128], index: 21, kind: input, shape index: {}]   ;;  %s4584_s22 = inlined_call_operand.vmem [shape: f32[2,3,128], index: 22, kind: output, shape index: {}]  }
   0x1   :  { %4587 = sst [smem:[#allocation2_spill]] %s4562_s0 }
   0x2   :  { %4588 = sst [smem:[#allocation3_spill]] %s4563_s1 }
   0x3   :  { %4589 = sst [smem:[#allocation4_spill]] %s4564_s2 }
   0x4   :  { %4590 = sst [smem:[#allocation5_spill]] %s4565_s3  ;;  %s3512_s3 = smov 0  }
   0x5   :  { %4591 = sst [smem:[#allocation6_spill]] %s4566_s4 }
   0x6   :  { %4592 = sst [smem:[#allocation7_spill]] %s4567_s5 }
   0x7   :  { %4593 = sst [smem:[#allocation8_spill]] %s4568_s6 }
   0x8 LB: > { %s2534_s28 = sadd.s32 4294967295, %s3391_s3   ;;  %p2538_p0 = scmp.ge.s32.totalorder %s3391_s3, 1  ;;  %s3391_s3 = sphi %s3512_s3, %s32_s3  }
   0x9   : > { %p622_p1 = scmp.lt.s32.totalorder %s3391_s3, 3 }
   0xb   : > { %p623_p2 = pnand %p2538_p0, %p622_p1 }
   0xc   : > { %p688_p3 = scmp.lt.s32.totalorder (!%p623_p2), %s2534_s28, 1  ;;  %s4594_s0 = sld [smem:[#allocation2_spill]] (!%p623_p2)  ;;  %v3393_v6 = vmov (!%p623_p2), 0.0|0.0   ;;  %vm3394_vm0 = vmmov (!%p623_p2), 0   ;;  %v3395_v57 = vmov (!%p623_p2), 0.0   ;;  %vm1222_vm1 = vcmask (!%p623_p2), 523264  }
   0xd   : > { %626 = sbr.rel (%p623_p2) target bundleno = 3562 (0xdea), region = 108  ;;  %s4595_s24 = sld [smem:[#allocation6_spill]] (!%p623_p2)  ;;  %3032 = vmatprep.subr.bf16.mxu0 (!%p623_p2), %v3393_v6  ;;  %3056 = vmatprep.subr.bf16.mxu1 (!%p623_p2), %v3393_v6  ;;  %vm3765_vm2 = vmpackc.low (!%p623_p2), %vm1222_vm1, %vm1222_vm1  ;;  %vm1327_vm3 = vcmask (!%p623_p2), 195584   ;;  %vm2370_vm4 = vcmask (!%p623_p2), 1040384   ;;  %vm2372_vm5 = vcmask (!%p623_p2), 1041408  }
   0xe   : > { %s4596_s27 = sld [smem:[#allocation8_spill]] (!%p623_p2)  ;;  %2805 = vmatprep.mubr.msk.f32.mxu0 (!%p623_p2), %vm3394_vm0, %v3395_v57  ;;  %2846 = vmatprep.mubr.msk.f32.mxu1 (!%p623_p2), %vm3394_vm0, %v3395_v57  ;;  %s4597_s30 = sld [smem:[#allocation4_spill]] (!%p623_p2) }
   0xf   : > { %s4598_s25 = sld [smem:[#allocation5_spill]] (!%p623_p2)  ;;  %s4602_s5 = sld [smem:[#allocation3_spill]] (!%p623_p2) }
  0x13   : > { %v762_v3 = vld [vmem:[%s4595_s24] sm:$0xff] (!%p623_p2)  ;;  %v763_v4 = vld [vmem:[%s4595_s24 + $0x8] sm:$0xff] (!%p623_p2)  ;;  %v764_v9 = vld [vmem:[%s4595_s24 + $0x10] sm:$0xff] (!%p623_p2) }
  0x14   : > { %s4604_s28 = smov (!%p688_p3, %s2534_s28), 1  ;;  %v779_v5 = vld [vmem:[%s4596_s27] sm:$0xff]  ;;  %v3033_v7 = vpack.c.bf16 %v763_v4, %v762_v3  ;;  %v780_v8 = vld [vmem:[%s4596_s27 + $0x8] sm:$0xff]  ;;  %v765_v10 = vld [vmem:[%s4595_s24 + $0x18] sm:$0xff] }
  0x15   : > { %s3294_s29 = smul.u32 24, %s4604_s28  ;;  %v3057_v11 = vpack.c.bf16 %v780_v8, %v779_v5  ;;  %v781_v12 = vld [vmem:[%s4596_s27 + $0x10] sm:$0xff]  ;;  %v782_v13 = vld [vmem:[%s4596_s27 + $0x18] sm:$0xff]  ;;  %v3036_v14 = vpack.c.bf16 %v765_v10, %v764_v9  ;;  %v766_v16 = vld [vmem:[%s4595_s24 + $0x20] sm:$0xff] }
  0x16   : > { %3034 = vmatpush3.bf16.msra.mxu0 %v3033_v7  ;;  %v3060_v15 = vpack.c.bf16 %v782_v13, %v781_v12  ;;  %v767_v17 = vld [vmem:[%s4595_s24 + $0x28] sm:$0xff]  ;;  %v783_v18 = vld [vmem:[%s4596_s27 + $0x20] sm:$0xff]  ;;  %v768_v34 = vld [vmem:[%s4595_s24 + $0x30] sm:$0xff] }
  0x17   : > { %s692_s23 = scalar_lea.vmem %s4594_s0, %s3294_s29  ;;  %3058 = vmatpush3.bf16.msra.mxu1 %v3057_v11  ;;  %3035 = vmatprep.subr.bf16.mxu0 %v3393_v6  ;;  %v784_v19 = vld [vmem:[%s4596_s27 + $0x28] sm:$0xff]  ;;  %v3039_v20 = vpack.c.bf16 %v767_v17, %v766_v16  ;;  %v769_v35 = vld [vmem:[%s4595_s24 + $0x38] sm:$0xff]  ;;  %v785_v37 = vld [vmem:[%s4596_s27 + $0x30] sm:$0xff]  ;;  %s697_s6 = scalar_lea.vmem %s4602_s5, %s3294_s29 }
  0x18   : > { %v702_v0 = vld [vmem:[%s692_s23] sm:$0xff]  ;;  %v704_v1 = vld [vmem:[%s692_s23 + $0x10] sm:$0xff]  ;;  %v703_v2 = vld [vmem:[%s692_s23 + $0x8] sm:$0xff]  ;;  %3059 = vmatprep.subr.bf16.mxu1 %v3393_v6  ;;  %v3063_v21 = vpack.c.bf16 %v784_v19, %v783_v18  ;;  %v3042_v36 = vpack.c.bf16 %v769_v35, %v768_v34  ;;  %s3396_s29 = smov 64   ;;  %s2541_s5 = sshll.u32 %s4604_s28, 2 }
  0x19   : > { %707 = vadd.xlane.f32.xlu0 %v702_v0  ;;  %711 = vadd.xlane.f32.xlu1 %v704_v1  ;;  %v786_v38 = vld [vmem:[%s4596_s27 + $0x38] sm:$0xff]  ;;  %v770_v40 = vld [vmem:[%s4595_s24 + $0x40] sm:$0xff]  ;;  %v771_v41 = vld [vmem:[%s4595_s24 + $0x48] sm:$0xff]  ;;  %s701_s26 = scalar_lea.vmem %s4584_s22, %s2541_s5 }
  0x1a   : > { %3037 = vmatpush3.bf16.msra.mxu0 %v3036_v14  ;;  %v3066_v39 = vpack.c.bf16 %v786_v38, %v785_v37  ;;  %v3045_v42 = vpack.c.bf16 %v771_v41, %v770_v40  ;;  %v787_v43 = vld [vmem:[%s4596_s27 + $0x40] sm:$0xff]  ;;  %v788_v44 = vld [vmem:[%s4596_s27 + $0x48] sm:$0xff]  ;;  %v772_v46 = vld [vmem:[%s4595_s24 + $0x50] sm:$0xff] }
  0x1b   : > { %3061 = vmatpush3.bf16.msra.mxu1 %v3060_v15  ;;  %3038 = vmatprep.subr.bf16.mxu0 %v3393_v6  ;;  %v3069_v45 = vpack.c.bf16 %v788_v44, %v787_v43  ;;  %v773_v47 = vld [vmem:[%s4595_s24 + $0x58] sm:$0xff]  ;;  %v789_v49 = vld [vmem:[%s4596_s27 + $0x50] sm:$0xff]  ;;  %v774_v52 = vld [vmem:[%s4595_s24 + $0x60] sm:$0xff] }
  0x1c   : > { %3062 = vmatprep.subr.bf16.mxu1 %v3393_v6  ;;  %v3048_v48 = vpack.c.bf16 %v773_v47, %v772_v46  ;;  %v790_v50 = vld [vmem:[%s4596_s27 + $0x58] sm:$0xff]  ;;  %v775_v53 = vld [vmem:[%s4595_s24 + $0x68] sm:$0xff]  ;;  %v791_v54 = vld [vmem:[%s4596_s27 + $0x60] sm:$0xff] }
  0x1d   : > { %709 = vadd.xlane.f32.xlu0 %v703_v2  ;;  %v3072_v51 = vpack.c.bf16 %v790_v50, %v789_v49  ;;  %v3051_v55 = vpack.c.bf16 %v775_v53, %v774_v52  ;;  %v792_v56 = vld [vmem:[%s4596_s27 + $0x68] sm:$0xff]  ;;  %v776_v59 = vld [vmem:[%s4595_s24 + $0x70] sm:$0xff]  ;;  %v777_v60 = vld [vmem:[%s4595_s24 + $0x78] sm:$0xff] }
  0x1e   : > { %3040 = vmatpush3.bf16.msra.mxu0 %v3039_v20  ;;  %v3075_v58 = vpack.c.bf16 %v792_v56, %v791_v54  ;;  %v793_v61 = vld [vmem:[%s4596_s27 + $0x70] sm:$0xff]  ;;  %v794_v62 = vld [vmem:[%s4596_s27 + $0x78] sm:$0xff]  ;;  %v3054_v63 = vpack.c.bf16 %v777_v60, %v776_v59  ;;  %v2542_v12 = vld [vmem:[%s4597_s30] ss:$0 sm:$0xff]  ;;  %s4601_s30 = sld [smem:[#allocation7_spill]] }
  0x1f   : > { %3064 = vmatpush3.bf16.msra.mxu1 %v3063_v21  ;;  %3041 = vmatprep.subr.bf16.mxu0 %v3393_v6  ;;  %v796_v14 = vld [vmem:[%s4570_s8] sm:$0xff]  ;;  %v797_v15 = vld [vmem:[%s4570_s8 + $0x8] sm:$0xff]  ;;  %v802_v34 = vld [vmem:[%s4570_s8 + $0x30] sm:$0xff] }
  0x20   : > { %3065 = vmatprep.subr.bf16.mxu1 %v3393_v6  ;;  %v2543_v16 = vld [vmem:[%s4598_s25] ss:$0 sm:$0xff]  ;;  %v3081_v19 = vpack.c.bf16 %v797_v15, %v796_v14  ;;  %v803_v35 = vld [vmem:[%s4570_s8 + $0x38] sm:$0xff]  ;;  %v805_v38 = vld [vmem:[%s4570_s8 + $0x48] sm:$0xff] }
  0x21   : > { %v804_v37 = vld [vmem:[%s4570_s8 + $0x40] sm:$0xff]  ;;  %v806_v40 = vld [vmem:[%s4570_s8 + $0x50] sm:$0xff]  ;;  %v807_v41 = vld [vmem:[%s4570_s8 + $0x58] sm:$0xff] }
  0x22   : > { %3043 = vmatpush3.bf16.msra.mxu0 %v3042_v36  ;;  %v3090_v36 = vpack.c.bf16 %v803_v35, %v802_v34  ;;  %v808_v43 = vld [vmem:[%s4570_s8 + $0x60] sm:$0xff]  ;;  %v809_v44 = vld [vmem:[%s4570_s8 + $0x68] sm:$0xff]  ;;  %v810_v46 = vld [vmem:[%s4570_s8 + $0x70] sm:$0xff] }
  0x23   : > { %3067 = vmatpush3.bf16.msra.mxu1 %v3066_v39  ;;  %3044 = vmatprep.subr.bf16.mxu0 %v3393_v6  ;;  %v3093_v39 = vpack.c.bf16 %v805_v38, %v804_v37  ;;  %v811_v47 = vld [vmem:[%s4570_s8 + $0x78] sm:$0xff]  ;;  %v2545_v53 = vld [vmem:[%s4569_s7] ss:$0 sm:$0xff]  ;;  %v3827_v37 = vld [vmem:[%s697_s6 + $0x10] sm:$0xff] }
  0x24   : > { %3068 = vmatprep.subr.bf16.mxu1 %v3393_v6 }
  0x26   : > { %3046 = vmatpush3.bf16.msra.mxu0 %v3045_v42  ;;  %v3096_v42 = vpack.c.bf16 %v807_v41, %v806_v40 }
  0x27   : > { %3070 = vmatpush3.bf16.msra.mxu1 %v3069_v45  ;;  %3047 = vmatprep.subr.bf16.mxu0 %v3393_v6  ;;  %v3099_v45 = vpack.c.bf16 %v809_v44, %v808_v43 }
  0x28   : > { %3071 = vmatprep.subr.bf16.mxu1 %v3393_v6 }
  0x2a   : > { %3049 = vmatpush3.bf16.msra.mxu0 %v3048_v48  ;;  %v3102_v48 = vpack.c.bf16 %v811_v47, %v810_v46 }
  0x2b   : > { %3073 = vmatpush3.bf16.msra.mxu1 %v3072_v51  ;;  %3050 = vmatprep.subr.bf16.mxu0 %v3393_v6 }
  0x2c   : > { %3074 = vmatprep.subr.bf16.mxu1 %v3393_v6 }
  0x2e   : > { %3052 = vmatpush3.bf16.msra.mxu0 %v3051_v55 }
  0x2f   : > { %3076 = vmatpush3.bf16.msra.mxu1 %v3075_v58  ;;  %3053 = vmatprep.subr.bf16.mxu0 %v3393_v6 }
  0x30   : > { %3077 = vmatprep.subr.bf16.mxu1 %v3393_v6 }
  0x32   : > { %3055 = vmatpush3.bf16.msra.mxu0 %v3054_v63 }
  0x33   : > { %3080 = vmatprep.subr.bf16.mxu0 %v3393_v6 }
  0xa6   : > { %v708_v22 = vpop.xlane.xlu0 %707  ;;  %v712_v23 = vpop.xlane.xlu1 %711 }
  0xa7   : > { %v714_v24 = vmul.f32 0.0078125, %v708_v22  ;;  %v716_v25 = vmul.f32 0.0078125, %v712_v23  ;;  %v798_v23 = vld [vmem:[%s4570_s8 + $0x10] sm:$0xff] }
  0xa9   : > { %v3572_v26 = vsub.f32 %v702_v0, %v714_v24  ;;  %v3574_v27 = vsub.f32 %v704_v1, %v716_v25  ;;  %v3078_v0 = vpack.c.bf16 %v794_v62, %v793_v61  ;;  %v799_v24 = vld [vmem:[%s4570_s8 + $0x18] sm:$0xff] }
  0xaa   : > { %v710_v28 = vpop.xlane.xlu0 %709 }
  0xab   : > { %v715_v29 = vmul.f32 0.0078125, %v710_v28  ;;  %v720_v30 = vmul.f32 %v3572_v26, %v3572_v26  ;;  %v722_v32 = vmul.f32 %v3574_v27, %v3574_v27  ;;  %3079 = vmatpush3.bf16.msra.mxu1 %v3078_v0  ;;  %v3084_v28 = vpack.c.bf16 %v799_v24, %v798_v23  ;;  %v3820_v24 = vld [vmem:[%s697_s6] sm:$0xff] }
  0xac   : > { %3104 = vmatprep.subr.bf16.mxu1 %v3393_v6 }
  0xad   : > { %v3578_v31 = vsub.f32 %v703_v2, %v715_v29  ;;  %723 = vadd.xlane.f32.xlu1 %v720_v30 }
  0xaf   : > { %v721_v33 = vmul.f32 %v3578_v31, %v3578_v31 }
  0xb1   : > { %727 = vadd.xlane.f32.xlu1 %v722_v32  ;;  %725 = vadd.xlane.f32.xlu0 %v721_v33 }
 0x13a   : > { %v724_v1 = vpop.xlane.xlu1 %723 }
 0x13b   : > { %v729_v2 = vmul.f32 0.0078125, %v724_v1 }
 0x13d   : > { %v732_v3 = vadd.f32 1e-12, %v729_v2 }
 0x13e   : > { %v728_v4 = vpop.xlane.xlu1 %727  ;;  %v726_v5 = vpop.xlane.xlu0 %725 }
 0x13f   : > { %3317 = vrsqrt.f32 %v732_v3  ;;  %v731_v7 = vmul.f32 0.0078125, %v728_v4  ;;  %v730_v8 = vmul.f32 0.0078125, %v726_v5  ;;  %v2544_v4 = vld [vmem:[%s4601_s30] ss:$0 sm:$0xff] }
 0x141   : > { %v734_v9 = vadd.f32 1e-12, %v731_v7  ;;  %v733_v10 = vadd.f32 1e-12, %v730_v8 }
 0x143   : > { %3319 = vrsqrt.f32 %v734_v9 }
 0x144   : > { %3321 = vrsqrt.f32 %v733_v10 }
 0x149   : > { %v3318_v11 = vpop.eup %3317 }
 0x14a   : > { %v738_v13 = vmul.f32 %v3318_v11, %v3572_v26 }
 0x14c   : > { %v747_v17 = vmul.f32 %v2542_v12, %v738_v13 }
 0x14d   : > { %v3320_v18 = vpop.eup %3319 }
 0x14e   : > { %v3322_v20 = vpop.eup %3321  ;;  %v3671_v21 = vadd.f32 %v2543_v16, %v747_v17  ;;  %v740_v25 = vmul.f32 %v3320_v18, %v3574_v27  ;;  %v800_v27 = vld [vmem:[%s4570_s8 + $0x20] sm:$0xff] }
 0x14f   : > { %v739_v22 = vmul.f32 %v3322_v20, %v3578_v31  ;;  %v801_v31 = vld [vmem:[%s4570_s8 + $0x28] sm:$0xff] }
 0x150   : > { %2806 = vmatmul.mubr.f32.vlgmr.msra.gmra.mrb[0].mxu0 %v3671_v21  ;;  %2847 = vmatmul.mubr.f32.vlgmr.msra.gmra.mrb[0].mxu1 %v3671_v21  ;;  %v749_v30 = vmul.f32 %v2542_v12, %v740_v25  ;;  %v3087_v32 = vpack.c.bf16 %v801_v31, %v800_v27  ;;  %v3823_v27 = vld [vmem:[%s697_s6 + $0x8] sm:$0xff] }
 0x151   : > { %3082 = vmatpush3.bf16.msra.mxu0 %v3081_v19  ;;  %2808 = vmatprep.mubr.msk.f32.mxu0 %vm3394_vm0, %v3395_v57  ;;  %v748_v26 = vmul.f32 %v2542_v12, %v739_v22  ;;  %v2546_v12 = vld [vmem:[%s4571_s9] ss:$0 sm:$0xff] }
 0x152   : > { %2849 = vmatprep.mubr.msk.f32.mxu1 %vm3394_vm0, %v3395_v57  ;;  %3083 = vmatprep.subr.bf16.mxu0 %v3393_v6  ;;  %v3703_v33 = vadd.f32 %v2543_v16, %v749_v30 }
 0x153   : > { %v3688_v29 = vadd.f32 %v2543_v16, %v748_v26 }
 0x155   : > { %2809 = vmatmul.mubr.f32.gmra.mrb[2].mxu0 %v3688_v29  ;;  %2850 = vmatmul.mubr.f32.gmra.mrb[2].mxu1 %v3688_v29 }
 0x156   : > { %3085 = vmatpush3.bf16.msra.mxu0 %v3084_v28  ;;  %2811 = vmatprep.mubr.msk.f32.mxu0 %vm3394_vm0, %v3395_v57 }
 0x157   : > { %2852 = vmatprep.mubr.msk.f32.mxu1 %vm3394_vm0, %v3395_v57  ;;  %3086 = vmatprep.subr.bf16.mxu0 %v3393_v6 }
 0x159   : > { %2812 = vmatmul.mubr.f32.gmra.mrb[4].mxu0 %v3703_v33  ;;  %2853 = vmatmul.mubr.f32.gmra.mrb[4].mxu1 %v3703_v33 }
 0x15a   : > { %3088 = vmatpush3.bf16.msra.mxu0 %v3087_v32  ;;  %2887 = vmatprep.mubr.msk.f32.mxu0 %vm3394_vm0, %v3395_v57 }
 0x15b   : > { %3089 = vmatprep.subr.bf16.mxu0 %v3393_v6  ;;  %2902 = vmatprep.mubr.msk.f32.mxu1 %vm3394_vm0, %v3395_v57 }
 0x15e   : > { %3091 = vmatpush3.bf16.msra.mxu0 %v3090_v36 }
 0x15f   : > { %3092 = vmatprep.subr.bf16.mxu0 %v3393_v6 }
 0x162   : > { %3094 = vmatpush3.bf16.msra.mxu0 %v3093_v39 }
 0x163   : > { %3095 = vmatprep.subr.bf16.mxu0 %v3393_v6 }
 0x166   : > { %3097 = vmatpush3.bf16.msra.mxu0 %v3096_v42 }
 0x167   : > { %3098 = vmatprep.subr.bf16.mxu0 %v3393_v6 }
 0x16a   : > { %3100 = vmatpush3.bf16.msra.mxu0 %v3099_v45 }
 0x16b   : > { %3101 = vmatprep.subr.bf16.mxu0 %v3393_v6 }
 0x16e   : > { %3103 = vmatpush3.bf16.msra.mxu0 %v3102_v48 }
 0x16f   : > { %3115 = vmatprep.subr.bf16.mxu0 %v3393_v6 }
 0x171   : > { %2888 = vmatmul.mubr.f32.vlgmr.msra.gmra.mrb[6].mxu0 %v3671_v21 }
 0x172   : > { %2890 = vmatprep.mubr.msk.f32.mxu0 %vm3394_vm0, %v3395_v57 }
 0x175   : > { %2891 = vmatmul.mubr.f32.gmra.mrb[8].mxu0 %v3688_v29 }
 0x176   : > { %2893 = vmatprep.mubr.msk.f32.mxu0 %vm3394_vm0, %v3395_v57 }
 0x179   : > { %2894 = vmatmul.mubr.f32.gmra.mrb[10].mxu0 %v3703_v33 }
 0x17a   : > { %2947 = vmatprep.mubr.msk.f32.mxu0 %vm3394_vm0, %v3395_v57 }
 0x223   : > { %v1036_v49 = vpop.f32.mrb[0].mxu0  ;;  %v1122_v50 = vpop.f32.mrb[0].mxu1 }
 0x224   : > { %v2807_v51 = vpop.f32.mrb[1].mxu0  ;;  %v2848_v52 = vpop.f32.mrb[1].mxu1  ;;  %v3759_v56 = vadd.f32 %v2545_v53, %v1122_v50  ;;  %v3783_v7 = vadd.f32 %v2544_v4, %v1036_v49 }
 0x228   : > { %v1041_v54 = vpop.f32.mrb[2].mxu0  ;;  %v1127_v55 = vpop.f32.mrb[2].mxu1 }
 0x229   : > { %v3761_v58 = vadd.f32 %v2545_v53, %v1127_v55  ;;  %v2810_v59 = vpop.f32.mrb[3].mxu0  ;;  %v2851_v60 = vpop.f32.mrb[3].mxu1  ;;  %v3790_v8 = vadd.f32 %v2544_v4, %v1041_v54 }
 0x22b   : > { %v3307_v62 = vpack.i.bf16 %v3761_v58, %v3759_v56  ;;  %v3105_v63 = vpack.c.bf16 %v3761_v58, %v3759_v56 }
 0x22c   : > { %v1046_v0 = vpop.f32.mrb[4].mxu0  ;;  %v1132_v1 = vpop.f32.mrb[4].mxu1 }
 0x22d   : > { %v2813_v2 = vpop.f32.mrb[5].mxu0  ;;  %v2854_v3 = vpop.f32.mrb[5].mxu1  ;;  %3107 = vmatpush3.bf16.xpose.msk.msra.mxu1 %vm3765_vm2, %v3105_v63  ;;  %v3779_v5 = vadd.f32 %v2545_v53, %v1132_v1  ;;  %v1047_v9 = vadd.f32 %v2544_v4, %v1046_v0 }
 0x22e   : > { %2900 = vmatprep.subr.mxu1 %v3395_v57 }
 0x235   : > { %2901 = vmatpush3.xpose.msk.msra.mxu1 %vm1222_vm1, %v3779_v5 }
 0x236   : > { %3108 = vmatprep.subr.bf16.mxu1 %v3393_v6 }
 0x238   : > { %2903 = vmatmul.mubr.msk.f32.vlgmr.msra.gmra.mrb[6].mxu1 %vm1222_vm1, %v3783_v7 }
 0x239   : > { %2905 = vmatprep.mubr.msk.f32.mxu1 %vm3394_vm0, %v3395_v57 }
 0x23c   : > { %2906 = vmatmul.mubr.msk.f32.gmra.mrb[8].mxu1 %vm1222_vm1, %v3790_v8 }
 0x23d   : > { %2908 = vmatprep.mubr.msk.f32.mxu1 %vm3394_vm0, %v3395_v57 }
 0x240   : > { %2909 = vmatmul.mubr.msk.f32.gmra.mrb[10].mxu1 %vm1222_vm1, %v1047_v9 }
 0x241   : > { %2917 = vmatprep.mubr.msk.f32.mxu1 %vm3394_vm0, %v3395_v57 }
 0x244   : > { %v1208_v10 = vpop.f32.mrb[6].mxu0 }
 0x245   : > { %v2889_v11 = vpop.f32.mrb[7].mxu0  ;;  %v3802_v14 = vadd.f32 %v2546_v12, %v1208_v10 }
 0x248   : > { %v1213_v13 = vpop.f32.mrb[8].mxu0 }
 0x249   : > { %v3804_v15 = vadd.f32 %v2546_v12, %v1213_v13  ;;  %v2892_v16 = vpop.f32.mrb[9].mxu0 }
 0x24b   : > { %v3312_v17 = vpack.i.bf16 %v3804_v15, %v3802_v14  ;;  %v3109_v18 = vpack.c.bf16 %v3804_v15, %v3802_v14 }
 0x24c   : > { %v1218_v19 = vpop.f32.mrb[10].mxu0 }
 0x24d   : > { %v2895_v20 = vpop.f32.mrb[11].mxu0  ;;  %3110 = vmatpush3.bf16.msra.mxu1 %v3109_v18  ;;  %v3811_v22 = vadd.f32 %v2546_v12, %v1218_v19 }
 0x24e   : > { %2915 = vmatprep.subr.mxu1 %v3395_v57 }
 0x251   : > { %2916 = vmatpush3.msra.mxu1 %v3811_v22 }
 0x252   : > { %3111 = vmatprep.subr.bf16.mxu1 %v3393_v6 }
 0x30b   : > { %v1307_v23 = vpop.f32.mrb[6].mxu1 }
 0x30c   : > { %v1321_v25 = vmul.f32 0.125, %v1307_v23  ;;  %v2904_v26 = vpop.f32.mrb[7].mxu1 }
 0x30e   : > { %v1324_v28 = vadd.f32 %v1321_v25, %v3820_v24 }
 0x30f   : > { %v1312_v30 = vpop.f32.mrb[8].mxu1 }
 0x310   : > { %v1322_v31 = vmul.f32 0.125, %v1312_v30  ;;  %v2907_v32 = vpop.f32.mrb[9].mxu1  ;;  %v1328_v34 = vsel %vm1327_vm3, %v1324_v28, -inf }
 0x311   : > { %1329 = vmax.xlane.f32.xlu0 %v1328_v34 }
 0x312   : > { %v1325_v35 = vadd.f32 %v1322_v31, %v3823_v27 }
 0x313   : > { %v1317_v36 = vpop.f32.mrb[10].mxu1 }
 0x314   : > { %v1323_v38 = vmul.f32 0.125, %v1317_v36  ;;  %v2910_v39 = vpop.f32.mrb[11].mxu1  ;;  %v1331_v40 = vsel %vm1327_vm3, %v1325_v35, -inf }
 0x315   : > { %1332 = vmax.xlane.f32.xlu1 %v1331_v40 }
 0x316   : > { %v1326_v41 = vadd.f32 %v1323_v38, %v3827_v37 }
 0x318   : > { %v1334_v42 = vsel %vm1327_vm3, %v1326_v41, -inf }
 0x319   : > { %1335 = vmax.xlane.f32.xlu0 %v1334_v42 }
 0x39e   : > { %v1330_v43 = vpop.xlane.xlu0 %1329 }
 0x39f   : > { %v1337_v44 = vsub.f32 %v1324_v28, %v1330_v43 }
 0x3a1   : > { %v1340_v45 = vmul.f32 1.442695, %v1337_v44 }
 0x3a2   : > { %v1333_v46 = vpop.xlane.xlu1 %1332 }
 0x3a3   : > { %3323 = vpow2.f32 %v1340_v45  ;;  %v1338_v47 = vsub.f32 %v1325_v35, %v1333_v46 }
 0x3a5   : > { %v1342_v48 = vmul.f32 1.442695, %v1338_v47 }
 0x3a6   : > { %v1336_v53 = vpop.xlane.xlu0 %1335 }
 0x3a7   : > { %3325 = vpow2.f32 %v1342_v48  ;;  %v1339_v54 = vsub.f32 %v1326_v41, %v1336_v53 }
 0x3a9   : > { %v1344_v55 = vmul.f32 1.442695, %v1339_v54 }
 0x3ab   : > { %3327 = vpow2.f32 %v1344_v55 }
 0x3ad   : > { %v3324_v49 = vpop.eup %3323 }
 0x3ae   : > { %v1346_v50 = vsel %vm1327_vm3, %v3324_v49, 0.0 }
 0x3af   : > { %1347 = vadd.xlane.f32.xlu1 %v1346_v50 }
 0x3b1   : > { %v3326_v51 = vpop.eup %3325 }
 0x3b2   : > { %v1349_v52 = vsel %vm1327_vm3, %v3326_v51, 0.0 }
 0x3b3   : > { %1350 = vadd.xlane.f32.xlu0 %v1349_v52 }
 0x3b5   : > { %v3328_v59 = vpop.eup %3327 }
 0x3b6   : > { %v1352_v60 = vsel %vm1327_vm3, %v3328_v59, 0.0 }
 0x3c0   : > { %1460 = vrot.lane.b32.xlu1 %v3779_v5, %s3396_s29 }
 0x3c4   : > { %1450 = vrot.lane.b32.xlu1 %v3783_v7, %s3396_s29 }
 0x3c9   : > { %3308 = vrot.lane.b32.xlu0 %v3307_v62, %s3396_s29 }
 0x3cd   : > { %1454 = vrot.lane.b32.xlu0 %v1047_v9, %s3396_s29 }
 0x3e8   : > { %1353 = vadd.xlane.f32.xlu1 %v1352_v60 }
 0x3f9   : > { %1452 = vrot.lane.b32.xlu1 %v3790_v8, %s3396_s29 }
 0x43c   : > { %v1348_v63 = vpop.xlane.xlu1 %1347 }
 0x43d   : > { %3329 = vrcp.f32 %v1348_v63 }
 0x440   : > { %v1351_v0 = vpop.xlane.xlu0 %1350  ;;  %v1461_v7 = vpop.permute.xlu1 %1460 }
 0x441   : > { %3331 = vrcp.f32 %v1351_v0 }
 0x444   : > { %v3309_v1 = vpop.permute.xlu0 %3308  ;;  %v1451_v8 = vpop.permute.xlu1 %1450 }
 0x445   : > { %v3311_v56 = vunpack.i.h.bf16 %v3309_v1  ;;  %v3310_v58 = vunpack.i.l.bf16 %v3309_v1 }
 0x447   : > { %v3330_v62 = vpop.eup %3329  ;;  %v3112_v2 = vpack.c.bf16 %v3311_v56, %v3310_v58 }
 0x448   : > { %v1356_v3 = vmul.f32 %v3330_v62, %v3324_v49  ;;  %v1455_v12 = vpop.permute.xlu0 %1454 }
 0x44a   : > { %2918 = vmatmul.mubr.msk.f32.vlgmr.msra.gmra.mrb[12].mxu1 %vm1327_vm3, %v1356_v3 }
 0x44b   : > { %v3332_v4 = vpop.eup %3331  ;;  %3114 = vmatpush3.bf16.xpose.msk.msra.mxu1 %vm3765_vm2, %v3112_v2  ;;  %2920 = vmatprep.mubr.msk.f32.mxu1 %vm3394_vm0, %v3395_v57 }
 0x44c   : > { %v1358_v5 = vmul.f32 %v3332_v4, %v3326_v51  ;;  %2930 = vmatprep.subr.mxu1 %v3395_v57  ;;  %v813_v4 = vld [vmem:[%s4572_s10] sm:$0xff] }
 0x44e   : > { %2921 = vmatmul.mubr.msk.f32.gmra.mrb[14].mxu1 %vm1327_vm3, %v1358_v5  ;;  %v814_v5 = vld [vmem:[%s4572_s10 + $0x8] sm:$0xff] }
 0x44f   : > { %2923 = vmatprep.mubr.msk.f32.mxu1 %vm3394_vm0, %v3395_v57 }
 0x453   : > { %2931 = vmatpush3.xpose.msk.msra.mxu1 %vm1222_vm1, %v1461_v7  ;;  %v815_v7 = vld [vmem:[%s4572_s10 + $0x10] sm:$0xff] }
 0x454   : > { %3118 = vmatprep.subr.bf16.mxu1 %v3393_v6 }
 0x475   : > { %v1354_v9 = vpop.xlane.xlu1 %1353 }
 0x476   : > { %3333 = vrcp.f32 %v1354_v9  ;;  %v816_v9 = vld [vmem:[%s4572_s10 + $0x18] sm:$0xff] }
 0x479   : > { %v1453_v11 = vpop.permute.xlu1 %1452 }
 0x480   : > { %v3334_v61 = vpop.eup %3333 }
 0x481   : > { %v1360_v10 = vmul.f32 %v3334_v61, %v3328_v59  ;;  %v3122_v61 = vpack.c.bf16 %v816_v9, %v815_v7  ;;  %v847_v7 = vld [vmem:[%s4576_s14 + $0x78] sm:$0xff] }
 0x483   : > { %2924 = vmatmul.mubr.msk.f32.gmra.mrb[16].mxu1 %vm1327_vm3, %v1360_v10  ;;  %v817_v10 = vld [vmem:[%s4572_s10 + $0x20] sm:$0xff] }
 0x484   : > { %2932 = vmatprep.mubr.msk.f32.mxu1 %vm3394_vm0, %v3395_v57 }
 0x487   : > { %2933 = vmatmul.mubr.msk.f32.vlgmr.msra.gmra.mrb[18].mxu1 %vm1222_vm1, %v1451_v8  ;;  %v3119_v8 = vpack.c.bf16 %v814_v5, %v813_v4  ;;  %v845_v4 = vld [vmem:[%s4576_s14 + $0x68] sm:$0xff]  ;;  %v843_v5 = vld [vmem:[%s4576_s14 + $0x58] sm:$0xff] }
 0x488   : > { %2935 = vmatprep.mubr.msk.f32.mxu1 %vm3394_vm0, %v3395_v57  ;;  %v3178_v9 = vpack.c.bf16 %v847_v7, %v843_v5  ;;  %v879_v5 = vld [vmem:[%s4576_s14 + $0x178] sm:$0xff]  ;;  %v872_v7 = vld [vmem:[%s4576_s14 + $0x140] sm:$0xff] }
 0x489   : > { %3120 = vmatpush3.bf16.msra.mxu1 %v3119_v8 }
 0x48a   : > { %3121 = vmatprep.subr.bf16.mxu1 %v3393_v6 }
 0x48b   : > { %2936 = vmatmul.mubr.msk.f32.gmra.mrb[20].mxu1 %vm1222_vm1, %v1453_v11  ;;  %v818_v11 = vld [vmem:[%s4572_s10 + $0x28] sm:$0xff] }
 0x48c   : > { %2938 = vmatprep.mubr.msk.f32.mxu1 %vm3394_vm0, %v3395_v57 }
 0x48d   : > { %3123 = vmatpush3.bf16.msra.mxu1 %v3122_v61  ;;  %v840_v61 = vld [vmem:[%s4576_s14 + $0x40] sm:$0xff] }
 0x48e   : > { %3124 = vmatprep.subr.bf16.mxu1 %v3393_v6 }
 0x48f   : > { %2939 = vmatmul.mubr.msk.f32.gmra.mrb[22].mxu1 %vm1222_vm1, %v1455_v12  ;;  %v3125_v12 = vpack.c.bf16 %v818_v11, %v817_v10  ;;  %v844_v10 = vld [vmem:[%s4576_s14 + $0x60] sm:$0xff]  ;;  %v842_v11 = vld [vmem:[%s4576_s14 + $0x50] sm:$0xff] }
 0x490   : > { %2988 = vmatprep.mubr.msk.f32.mxu1 %vm3394_vm0, %v3395_v57 }
 0x491   : > { %3126 = vmatpush3.bf16.msra.mxu1 %v3125_v12  ;;  %v3148_v12 = vpack.c.bf16 %v844_v10, %v840_v61  ;;  %v874_v10 = vld [vmem:[%s4576_s14 + $0x150] sm:$0xff] }
 0x492   : > { %3127 = vmatprep.subr.bf16.mxu1 %v3393_v6 }
 0x51d   : > { %v3869_v13 = vpop.f32.mrb[12].mxu1 }
 0x51e   : > { %v2919_v16 = vpop.f32.mrb[13].mxu1 }
 0x51f   : > { %v819_v16 = vld [vmem:[%s4572_s10 + $0x30] sm:$0xff] }
 0x521   : > { %v3871_v18 = vpop.f32.mrb[14].mxu1 }
 0x522   : > { %v2922_v19 = vpop.f32.mrb[15].mxu1 }
 0x523   : > { %v820_v19 = vld [vmem:[%s4572_s10 + $0x38] sm:$0xff] }
 0x556   : > { %v3873_v20 = vpop.f32.mrb[16].mxu1 }
 0x557   : > { %v2925_v23 = vpop.f32.mrb[17].mxu1 }
 0x558   : > { %v3128_v23 = vpack.c.bf16 %v820_v19, %v819_v16  ;;  %v846_v16 = vld [vmem:[%s4576_s14 + $0x70] sm:$0xff]  ;;  %v849_v19 = vld [vmem:[%s4576_s14 + $0x88] sm:$0xff] }
 0x55a   : > { %v1540_v25 = vpop.f32.mrb[18].mxu1  ;;  %3129 = vmatpush3.bf16.msra.mxu1 %v3128_v23  ;;  %v853_v23 = vld [vmem:[%s4576_s14 + $0xa8] sm:$0xff] }
 0x55b   : > { %v1554_v26 = vmul.f32 0.125, %v1540_v25  ;;  %v2934_v28 = vpop.f32.mrb[19].mxu1  ;;  %v821_v25 = vld [vmem:[%s4572_s10 + $0x40] sm:$0xff]  ;;  %3130 = vmatprep.subr.bf16.mxu1 %v3393_v6 }
 0x55d   : > { %v1557_v30 = vadd.f32 %v1554_v26, %v3820_v24  ;;  %v822_v26 = vld [vmem:[%s4572_s10 + $0x48] sm:$0xff] }
 0x55e   : > { %v1545_v31 = vpop.f32.mrb[20].mxu1  ;;  %v3131_v28 = vpack.c.bf16 %v822_v26, %v821_v25  ;;  %v3180_v25 = vpack.c.bf16 %v846_v16, %v842_v11  ;;  %v3150_v26 = vpack.c.bf16 %v853_v23, %v849_v19  ;;  %v878_v11 = vld [vmem:[%s4576_s14 + $0x170] sm:$0xff]  ;;  %v881_v16 = vld [vmem:[%s4576_s14 + $0x188] sm:$0xff]  ;;  %v883_v23 = vld [vmem:[%s4576_s14 + $0x198] sm:$0xff] }
 0x55f   : > { %v1555_v32 = vmul.f32 0.125, %v1545_v31  ;;  %v2937_v34 = vpop.f32.mrb[21].mxu1  ;;  %v1560_v35 = vsel %vm1327_vm3, %v1557_v30, -inf  ;;  %v824_v31 = vld [vmem:[%s4572_s10 + $0x58] sm:$0xff]  ;;  %v885_v19 = vld [vmem:[%s4576_s14 + $0x1a8] sm:$0xff] }
 0x560   : > { %1561 = vmax.xlane.f32.xlu1 %v1560_v35  ;;  %3132 = vmatpush3.bf16.msra.mxu1 %v3131_v28  ;;  %v825_v34 = vld [vmem:[%s4572_s10 + $0x60] sm:$0xff]  ;;  %v826_v35 = vld [vmem:[%s4572_s10 + $0x68] sm:$0xff]  ;;  %v851_v28 = vld [vmem:[%s4576_s14 + $0x98] sm:$0xff] }
 0x561   : > { %v1558_v36 = vadd.f32 %v1555_v32, %v3823_v27  ;;  %3133 = vmatprep.subr.bf16.mxu1 %v3393_v6 }
 0x562   : > { %v1550_v38 = vpop.f32.mrb[22].mxu1 }
 0x563   : > { %v1556_v39 = vmul.f32 0.125, %v1550_v38  ;;  %v2940_v40 = vpop.f32.mrb[23].mxu1  ;;  %v1563_v41 = vsel %vm1327_vm3, %v1558_v36, -inf  ;;  %v827_v38 = vld [vmem:[%s4572_s10 + $0x70] sm:$0xff] }
 0x564   : > { %1564 = vmax.xlane.f32.xlu0 %v1563_v41 }
 0x565   : > { %v1559_v42 = vadd.f32 %v1556_v39, %v3827_v37  ;;  %v828_v39 = vld [vmem:[%s4572_s10 + $0x78] sm:$0xff] }
 0x566   : > { %v3140_v40 = vpack.c.bf16 %v828_v39, %v827_v38 }
 0x567   : > { %v1566_v43 = vsel %vm1327_vm3, %v1559_v42, -inf }
 0x568   : > { %1567 = vmax.xlane.f32.xlu0 %v1566_v43 }
 0x5ed   : > { %v1562_v24 = vpop.xlane.xlu1 %1561 }
 0x5ee   : > { %v1569_v44 = vsub.f32 %v1557_v30, %v1562_v24  ;;  %v823_v30 = vld [vmem:[%s4572_s10 + $0x50] sm:$0xff] }
 0x5ef   : > { %v3134_v32 = vpack.c.bf16 %v824_v31, %v823_v30  ;;  %v855_v30 = vld [vmem:[%s4576_s14 + $0xb8] sm:$0xff]  ;;  %v848_v31 = vld [vmem:[%s4576_s14 + $0x80] sm:$0xff] }
 0x5f0   : > { %v1572_v45 = vmul.f32 1.442695, %v1569_v44 }
 0x5f1   : > { %v1565_v46 = vpop.xlane.xlu0 %1564  ;;  %3135 = vmatpush3.bf16.msra.mxu1 %v3134_v32  ;;  %v3182_v32 = vpack.c.bf16 %v855_v30, %v851_v28  ;;  %v880_v28 = vld [vmem:[%s4576_s14 + $0x180] sm:$0xff] }
 0x5f2   : > { %3335 = vpow2.f32 %v1572_v45  ;;  %v1570_v47 = vsub.f32 %v1558_v36, %v1565_v46  ;;  %v3137_v36 = vpack.c.bf16 %v826_v35, %v825_v34  ;;  %3136 = vmatprep.subr.bf16.mxu1 %v3393_v6  ;;  %v852_v34 = vld [vmem:[%s4576_s14 + $0xa0] sm:$0xff]  ;;  %v850_v35 = vld [vmem:[%s4576_s14 + $0x90] sm:$0xff] }
 0x5f3   : > { %v3152_v38 = vpack.c.bf16 %v852_v34, %v848_v31  ;;  %v884_v30 = vld [vmem:[%s4576_s14 + $0x1a0] sm:$0xff]  ;;  %v882_v34 = vld [vmem:[%s4576_s14 + $0x190] sm:$0xff] }
 0x5f4   : > { %v1574_v48 = vmul.f32 1.442695, %v1570_v47 }
 0x5f5   : > { %v1568_v49 = vpop.xlane.xlu0 %1567  ;;  %3138 = vmatpush3.bf16.msra.mxu1 %v3137_v36  ;;  %v854_v36 = vld [vmem:[%s4576_s14 + $0xb0] sm:$0xff] }
 0x5f6   : > { %3337 = vpow2.f32 %v1574_v48  ;;  %v1571_v27 = vsub.f32 %v1559_v42, %v1568_v49  ;;  %3139 = vmatprep.subr.bf16.mxu1 %v3393_v6  ;;  %v3184_v39 = vpack.c.bf16 %v854_v36, %v850_v35  ;;  %v886_v35 = vld [vmem:[%s4576_s14 + $0x1b0] sm:$0xff] }
 0x5f7   : > { %v3200_v36 = vpack.c.bf16 %v886_v35, %v882_v34  ;;  %v917_v34 = vld [vmem:[%s4578_s16 + $0xa0] sm:$0xff]  ;;  %v918_v35 = vld [vmem:[%s4578_s16 + $0xa8] sm:$0xff] }
 0x5f8   : > { %v1576_v50 = vmul.f32 1.442695, %v1571_v27 }
 0x5f9   : > { %3141 = vmatpush3.bf16.msra.mxu1 %v3140_v40 }
 0x5fa   : > { %3339 = vpow2.f32 %v1576_v50 }
 0x5fc   : > { %v3336_v51 = vpop.eup %3335 }
 0x5fd   : > { %v1578_v52 = vsel %vm1327_vm3, %v3336_v51, 0.0 }
 0x5fe   : > { %1579 = vadd.xlane.f32.xlu0 %v1578_v52 }
 0x600   : > { %v3338_v37 = vpop.eup %3337 }
 0x601   : > { %v1581_v53 = vsel %vm1327_vm3, %v3338_v37, 0.0 }
 0x602   : > { %1582 = vadd.xlane.f32.xlu1 %v1581_v53 }
 0x604   : > { %v3340_v54 = vpop.eup %3339 }
 0x605   : > { %v1584_v55 = vsel %vm1327_vm3, %v3340_v54, 0.0 }
 0x606   : > { %1585 = vadd.xlane.f32.xlu0 %v1584_v55 }
 0x613   : > { %3313 = vrot.lane.b32.xlu1 %v3312_v17, %s3396_s29 }
 0x61c   : > { %1600 = vrot.lane.b32.xlu0 %v3811_v22, %s3396_s29 }
 0x68b   : > { %v1580_v59 = vpop.xlane.xlu0 %1579 }
 0x68c   : > { %3341 = vrcp.f32 %v1580_v59 }
 0x68f   : > { %v1583_v60 = vpop.xlane.xlu1 %1582 }
 0x690   : > { %3343 = vrcp.f32 %v1583_v60 }
 0x693   : > { %v3314_v63 = vpop.permute.xlu1 %3313  ;;  %v1586_v0 = vpop.xlane.xlu0 %1585 }
 0x694   : > { %v3316_v1 = vunpack.i.h.bf16 %v3314_v63  ;;  %v3315_v56 = vunpack.i.l.bf16 %v3314_v63  ;;  %3345 = vrcp.f32 %v1586_v0 }
 0x696   : > { %v3116_v58 = vpack.c.bf16 %v3316_v1, %v3315_v56  ;;  %v3342_v62 = vpop.eup %3341  ;;  %v833_v1 = vld [vmem:[%s4576_s14 + $0x8] sm:$0xff]  ;;  %v835_v56 = vld [vmem:[%s4576_s14 + $0x18] sm:$0xff] }
 0x697   : > { %v1588_v2 = vmul.f32 %v3342_v62, %v3336_v51  ;;  %v1601_v14 = vpop.permute.xlu0 %1600  ;;  %v836_v62 = vld [vmem:[%s4576_s14 + $0x20] sm:$0xff] }
 0x698   : > { %3117 = vmatpush3.bf16.msra.mxu0 %v3116_v58  ;;  %v839_v58 = vld [vmem:[%s4576_s14 + $0x38] sm:$0xff] }
 0x699   : > { %2945 = vmatprep.subr.mxu0 %v3395_v57 }
 0x69a   : > { %v3344_v15 = vpop.eup %3343 }
 0x69b   : > { %v1590_v17 = vmul.f32 %v3344_v15, %v3338_v37  ;;  %v834_v15 = vld [vmem:[%s4576_s14 + $0x10] sm:$0xff] }
 0x69c   : > { %2946 = vmatpush3.msra.mxu0 %v1601_v14 }
 0x69d   : > { %2948 = vmatmul.mubr.msk.f32.vlgmr.msra.gmra.mrb[12].mxu0 %vm1327_vm3, %v1588_v2  ;;  %v3174_v2 = vpack.c.bf16 %v839_v58, %v835_v56  ;;  %v871_v56 = vld [vmem:[%s4576_s14 + $0x138] sm:$0xff]  ;;  %v868_v58 = vld [vmem:[%s4576_s14 + $0x120] sm:$0xff] }
 0x69e   : > { %2950 = vmatprep.mubr.msk.f32.mxu0 %vm3394_vm0, %v3395_v57  ;;  %v3346_v22 = vpop.eup %3345 }
 0x69f   : > { %v1592_v3 = vmul.f32 %v3346_v22, %v3340_v54  ;;  %v841_v22 = vld [vmem:[%s4576_s14 + $0x48] sm:$0xff]  ;;  %3175 = vmatprep.subr.bf16.mxu1 %v3174_v2  ;;  %v866_v2 = vld [vmem:[%s4576_s14 + $0x110] sm:$0xff] }
 0x6a0   : > { %v3146_v8 = vpack.c.bf16 %v845_v4, %v841_v22  ;;  %v877_v22 = vld [vmem:[%s4576_s14 + $0x168] sm:$0xff] }
 0x6a1   : > { %2951 = vmatmul.mubr.msk.f32.gmra.mrb[14].mxu0 %vm1327_vm3, %v1590_v17  ;;  %v838_v17 = vld [vmem:[%s4576_s14 + $0x30] sm:$0xff] }
 0x6a2   : > { %2953 = vmatprep.mubr.msk.f32.mxu0 %vm3394_vm0, %v3395_v57 }
 0x6a5   : > { %2954 = vmatmul.mubr.msk.f32.gmra.mrb[16].mxu0 %vm1327_vm3, %v1592_v3  ;;  %v3176_v3 = vpack.c.bf16 %v838_v17, %v834_v15  ;;  %v873_v17 = vld [vmem:[%s4576_s14 + $0x148] sm:$0xff] }
 0x6a6   : > { %1934 = vmatprep.mubr.f32.mxu0 %v3395_v57  ;;  %v3162_v4 = vpack.c.bf16 %v877_v22, %v873_v17 }
 0x770   : > { %v1680_v41 = vpop.f32.mrb[12].mxu0 }
 0x771   : > { %1697 = vrot.lane.b32.xlu1 %v1680_v41, %s3396_s29  ;;  %v2949_v42 = vpop.f32.mrb[13].mxu0 }
 0x774   : > { %v1685_v43 = vpop.f32.mrb[14].mxu0 }
 0x775   : > { %1699 = vrot.lane.b32.xlu1 %v1685_v43, %s3396_s29  ;;  %v2952_v24 = vpop.f32.mrb[15].mxu0 }
 0x778   : > { %v1690_v44 = vpop.f32.mrb[16].mxu0 }
 0x779   : > { %1701 = vrot.lane.b32.xlu1 %v1690_v44, %s3396_s29  ;;  %v2955_v45 = vpop.f32.mrb[17].mxu0 }
 0x7e3   : > { %v1698_v46 = vpop.permute.xlu1 %1697 }
 0x7e4   : > { %v1706_v47 = vsel %vm1222_vm1, %v3869_v13, %v1698_v46  ;;  %v2565_v13 = vld [vmem:[%s4573_s11] ss:$0 sm:$0xff] }
 0x7e5   : > { %2989 = vmatmul.mubr.f32.vlgmr.msra.gmra.mrb[24].mxu1 %v1706_v47 }
 0x7e6   : > { %2991 = vmatprep.mubr.msk.f32.mxu1 %vm3394_vm0, %v3395_v57  ;;  %3177 = vmatpush1.bf16.msra.mxu1 %v3176_v3  ;;  %v875_v3 = vld [vmem:[%s4576_s14 + $0x158] sm:$0xff] }
 0x7e7   : > { %v1700_v48 = vpop.permute.xlu1 %1699  ;;  %3179 = vmatprep.subr.bf16.mxu1 %v3178_v9  ;;  %v3194_v9 = vpack.c.bf16 %v879_v5, %v875_v3 }
 0x7e8   : > { %v1707_v49 = vsel %vm1222_vm1, %v3871_v18, %v1700_v48 }
 0x7e9   : > { %2992 = vmatmul.mubr.f32.gmra.mrb[26].mxu1 %v1707_v49 }
 0x7ea   : > { %2994 = vmatprep.mubr.msk.f32.mxu1 %vm3394_vm0, %v3395_v57  ;;  %3181 = vmatpush1.bf16.msra.mxu1 %v3180_v25  ;;  %v3166_v25 = vpack.c.bf16 %v885_v19, %v881_v16  ;;  %v948_v19 = vld [vmem:[%s4578_s16 + $0x198] sm:$0xff] }
 0x7eb   : > { %v1702_v27 = vpop.permute.xlu1 %1701  ;;  %3183 = vmatprep.subr.bf16.mxu1 %v3182_v32  ;;  %v3168_v32 = vpack.c.bf16 %v884_v30, %v880_v28  ;;  %v931_v30 = vld [vmem:[%s4578_s16 + $0x110] sm:$0xff] }
 0x7ec   : > { %v1708_v50 = vsel %vm1222_vm1, %v3873_v20, %v1702_v27 }
 0x7ed   : > { %2995 = vmatmul.mubr.f32.gmra.mrb[28].mxu1 %v1708_v50  ;;  %v857_v50 = vld [vmem:[%s4576_s14 + $0xc8] sm:$0xff] }
 0x7ee   : > { %2017 = vmatprep.mubr.f32.mxu1 %v3395_v57  ;;  %3185 = vmatpush1.bf16.msra.mxu1 %v3184_v39  ;;  %v893_v39 = vld [vmem:[%s4576_s14 + $0x1e8] sm:$0xff] }
 0x8b8   : > { %v1781_v51 = vpop.f32.mrb[24].mxu1 }
 0x8b9   : > { %v1782_v52 = vadd.f32 %v2565_v13, %v1781_v51  ;;  %v2990_v37 = vpop.f32.mrb[25].mxu1  ;;  %v859_v51 = vld [vmem:[%s4576_s14 + $0xd8] sm:$0xff] }
 0x8ba   : > { %v863_v37 = vld [vmem:[%s4576_s14 + $0xf8] sm:$0xff] }
 0x8bb   : > { %v1795_v18 = vadd.f32 %v1782_v52, %v3671_v21  ;;  %v837_v21 = vld [vmem:[%s4576_s14 + $0x28] sm:$0xff] }
 0x8bc   : > { %v1786_v53 = vpop.f32.mrb[26].mxu1 }
 0x8bd   : > { %v1787_v54 = vadd.f32 %v2565_v13, %v1786_v53  ;;  %1798 = vadd.xlane.f32.xlu0 %v1795_v18  ;;  %v2993_v55 = vpop.f32.mrb[27].mxu1  ;;  %v860_v53 = vld [vmem:[%s4576_s14 + $0xe0] sm:$0xff] }
 0x8bf   : > { %v1796_v59 = vadd.f32 %v1787_v54, %v3688_v29  ;;  %v3142_v29 = vpack.c.bf16 %v837_v21, %v833_v1  ;;  %v3186_v54 = vpack.c.bf16 %v863_v37, %v859_v51  ;;  %v867_v1 = vld [vmem:[%s4576_s14 + $0x118] sm:$0xff]  ;;  %v914_v51 = vld [vmem:[%s4578_s16 + $0x88] sm:$0xff] }
 0x8c0   : > { %v1791_v60 = vpop.f32.mrb[28].mxu1 }
 0x8c1   : > { %v1792_v20 = vadd.f32 %v2565_v13, %v1791_v60  ;;  %1800 = vadd.xlane.f32.xlu1 %v1796_v59  ;;  %v2996_v63 = vpop.f32.mrb[29].mxu1  ;;  %3143 = vmatprep.subr.bf16.mxu0 %v3142_v29  ;;  %v861_v13 = vld [vmem:[%s4576_s14 + $0xe8] sm:$0xff]  ;;  %v862_v60 = vld [vmem:[%s4576_s14 + $0xf0] sm:$0xff]  ;;  %v864_v29 = vld [vmem:[%s4576_s14 + $0x100] sm:$0xff] }
 0x8c2   : > { %v3154_v52 = vpack.c.bf16 %v861_v13, %v857_v50  ;;  %3187 = vmatprep.subr.bf16.mxu1 %v3186_v54  ;;  %v865_v63 = vld [vmem:[%s4576_s14 + $0x108] sm:$0xff]  ;;  %v913_v13 = vld [vmem:[%s4578_s16 + $0x80] sm:$0xff] }
 0x8c3   : > { %v1797_v0 = vadd.f32 %v1792_v20, %v3703_v33  ;;  %v832_v33 = vld [vmem:[%s4576_s14] sm:$0xff]  ;;  %v3206_v37 = vpack.c.bf16 %v914_v51, %v913_v13  ;;  %v952_v51 = vld [vmem:[%s4578_s16 + $0x1b8] sm:$0xff] }
 0x8c4   : > { %v3144_v14 = vpack.c.bf16 %v836_v62, %v832_v33  ;;  %v3190_v33 = vpack.c.bf16 %v871_v56, %v867_v1  ;;  %v3160_v62 = vpack.c.bf16 %v868_v58, %v864_v29  ;;  %v2566_v29 = vld [vmem:[%s4574_s12] ss:$0 sm:$0xff] }
 0x8c5   : > { %1802 = vadd.xlane.f32.xlu0 %v1797_v0 }
 0x8c6   : > { %3145 = vmatpush1.bf16.msra.mxu0 %v3144_v14  ;;  %v870_v14 = vld [vmem:[%s4576_s14 + $0x130] sm:$0xff] }
 0x8c7   : > { %3147 = vmatprep.subr.bf16.mxu0 %v3146_v8  ;;  %v3192_v15 = vpack.c.bf16 %v870_v14, %v866_v2  ;;  %v876_v8 = vld [vmem:[%s4576_s14 + $0x160] sm:$0xff]  ;;  %v898_v2 = vld [vmem:[%s4578_s16 + $0x8] sm:$0xff] }
 0x8c8   : > { %v3164_v61 = vpack.c.bf16 %v876_v8, %v872_v7  ;;  %v929_v14 = vld [vmem:[%s4578_s16 + $0x100] sm:$0xff] }
 0x8ca   : > { %3149 = vmatpush1.bf16.msra.mxu0 %v3148_v12  ;;  %v3196_v12 = vpack.c.bf16 %v878_v11, %v874_v10  ;;  %v916_v11 = vld [vmem:[%s4578_s16 + $0x98] sm:$0xff] }
 0x8cb   : > { %3151 = vmatprep.subr.bf16.mxu0 %v3150_v26  ;;  %v887_v26 = vld [vmem:[%s4576_s14 + $0x1b8] sm:$0xff] }
 0x8cc   : > { %v3198_v31 = vpack.c.bf16 %v887_v26, %v883_v23  ;;  %v899_v23 = vld [vmem:[%s4578_s16 + $0x10] sm:$0xff] }
 0x8ce   : > { %3153 = vmatpush1.bf16.msra.mxu0 %v3152_v38  ;;  %v889_v38 = vld [vmem:[%s4576_s14 + $0x1c8] sm:$0xff] }
 0x8cf   : > { %3155 = vmatprep.subr.bf16.mxu0 %v3154_v52  ;;  %v945_v52 = vld [vmem:[%s4578_s16 + $0x180] sm:$0xff] }
 0x94a   : > { %v1799_v40 = vpop.xlane.xlu0 %1798 }
 0x94b   : > { %v1804_v41 = vmul.f32 0.0078125, %v1799_v40  ;;  %v891_v40 = vld [vmem:[%s4576_s14 + $0x1d8] sm:$0xff] }
 0x94d   : > { %v4046_v42 = vsub.f32 %v1795_v18, %v1804_v41  ;;  %v856_v18 = vld [vmem:[%s4576_s14 + $0xc0] sm:$0xff]  ;;  %v3170_v41 = vpack.c.bf16 %v893_v39, %v889_v38  ;;  %v3214_v38 = vpack.c.bf16 %v918_v35, %v917_v34  ;;  %v950_v39 = vld [vmem:[%s4578_s16 + $0x1a8] sm:$0xff]  ;;  %v927_v34 = vld [vmem:[%s4578_s16 + $0xf0] sm:$0xff] }
 0x94e   : > { %v1801_v43 = vpop.xlane.xlu1 %1800  ;;  %v3156_v55 = vpack.c.bf16 %v860_v53, %v856_v18  ;;  %v946_v18 = vld [vmem:[%s4578_s16 + $0x188] sm:$0xff]  ;;  %v928_v35 = vld [vmem:[%s4578_s16 + $0xf8] sm:$0xff] }
 0x94f   : > { %v1805_v24 = vmul.f32 0.0078125, %v1801_v43  ;;  %v1810_v44 = vmul.f32 %v4046_v42, %v4046_v42  ;;  %v895_v43 = vld [vmem:[%s4576_s14 + $0x1f8] sm:$0xff]  ;;  %v3238_v53 = vpack.c.bf16 %v946_v18, %v945_v52  ;;  %v903_v52 = vld [vmem:[%s4578_s16 + $0x30] sm:$0xff] }
 0x950   : > { %3157 = vmatpush1.bf16.msra.mxu0 %v3156_v55 }
 0x951   : > { %v4050_v45 = vsub.f32 %v1796_v59, %v1805_v24  ;;  %1813 = vadd.xlane.f32.xlu0 %v1810_v44  ;;  %v858_v59 = vld [vmem:[%s4576_s14 + $0xd0] sm:$0xff]  ;;  %v888_v24 = vld [vmem:[%s4576_s14 + $0x1c0] sm:$0xff] }
 0x952   : > { %v1803_v46 = vpop.xlane.xlu0 %1802  ;;  %v3188_v20 = vpack.c.bf16 %v862_v60, %v858_v59  ;;  %v892_v44 = vld [vmem:[%s4576_s14 + $0x1e0] sm:$0xff] }
 0x953   : > { %v1806_v47 = vmul.f32 0.0078125, %v1803_v46  ;;  %v1811_v48 = vmul.f32 %v4050_v45, %v4050_v45  ;;  %v3202_v46 = vpack.c.bf16 %v895_v43, %v891_v40  ;;  %v901_v40 = vld [vmem:[%s4578_s16 + $0x20] sm:$0xff] }
 0x954   : > { %3189 = vmatpush1.bf16.msra.mxu1 %v3188_v20 }
 0x955   : > { %v4054_v49 = vsub.f32 %v1797_v0, %v1806_v47  ;;  %1815 = vadd.xlane.f32.xlu0 %v1811_v48  ;;  %v869_v0 = vld [vmem:[%s4576_s14 + $0x128] sm:$0xff]  ;;  %3191 = vmatprep.subr.bf16.mxu1 %v3190_v33  ;;  %v3172_v47 = vpack.c.bf16 %v892_v44, %v888_v24  ;;  %v890_v48 = vld [vmem:[%s4576_s14 + $0x1d0] sm:$0xff]  ;;  %v2567_v33 = vld [vmem:[%s4575_s13] ss:$0 sm:$0xff] }
 0x956   : > { %v3158_v21 = vpack.c.bf16 %v869_v0, %v865_v63  ;;  %v933_v44 = vld [vmem:[%s4578_s16 + $0x120] sm:$0xff] }
 0x957   : > { %v1812_v27 = vmul.f32 %v4054_v49, %v4054_v49 }
 0x958   : > { %3159 = vmatprep.subr.bf16.mxu0 %v3158_v21  ;;  %3193 = vmatpush1.bf16.msra.mxu1 %v3192_v15 }
 0x959   : > { %1817 = vadd.xlane.f32.xlu1 %v1812_v27  ;;  %3161 = vmatpush1.bf16.msra.mxu0 %v3160_v62  ;;  %v894_v27 = vld [vmem:[%s4576_s14 + $0x1f0] sm:$0xff]  ;;  %v897_v62 = vld [vmem:[%s4578_s16] sm:$0xff] }
 0x95a   : > { %3163 = vmatprep.subr.bf16.mxu0 %v3162_v4  ;;  %3195 = vmatprep.subr.bf16.mxu1 %v3194_v9  ;;  %v3204_v50 = vpack.c.bf16 %v894_v27, %v890_v48  ;;  %v3208_v4 = vpack.c.bf16 %v898_v2, %v897_v62  ;;  %v919_v48 = vld [vmem:[%s4578_s16 + $0xb0] sm:$0xff]  ;;  %v920_v27 = vld [vmem:[%s4578_s16 + $0xb8] sm:$0xff]  ;;  %v938_v62 = vld [vmem:[%s4578_s16 + $0x148] sm:$0xff] }
 0x95b   : > { %v3218_v13 = vpack.c.bf16 %v920_v27, %v919_v48  ;;  %v1850_v27 = vlaneseq }
 0x95c   : > { %3197 = vmatpush1.bf16.msra.mxu1 %v3196_v12  ;;  %v947_v12 = vld [vmem:[%s4578_s16 + $0x190] sm:$0xff] }
 0x95d   : > { %3165 = vmatpush1.bf16.msra.mxu0 %v3164_v61  ;;  %3199 = vmatprep.subr.bf16.mxu1 %v3198_v31  ;;  %v3242_v26 = vpack.c.bf16 %v948_v19, %v947_v12  ;;  %v932_v31 = vld [vmem:[%s4578_s16 + $0x118] sm:$0xff]  ;;  %v926_v12 = vld [vmem:[%s4578_s16 + $0xe8] sm:$0xff] }
 0x95e   : > { %3167 = vmatprep.subr.bf16.mxu0 %v3166_v25  ;;  %v900_v25 = vld [vmem:[%s4578_s16 + $0x18] sm:$0xff]  ;;  %v958_v19 = vld [vmem:[%s4578_s16 + $0x1e8] sm:$0xff] }
 0x95f   : > { %v3212_v28 = vpack.c.bf16 %v900_v25, %v899_v23 }
 0x960   : > { %3201 = vmatpush1.bf16.msra.mxu1 %v3200_v36  ;;  %v949_v36 = vld [vmem:[%s4578_s16 + $0x1a0] sm:$0xff] }
 0x961   : > { %3169 = vmatpush1.bf16.msra.mxu0 %v3168_v32  ;;  %3203 = vmatprep.subr.bf16.mxu1 %v3202_v46  ;;  %v3244_v32 = vpack.c.bf16 %v932_v31, %v931_v30  ;;  %v3246_v43 = vpack.c.bf16 %v950_v39, %v949_v36  ;;  %v934_v46 = vld [vmem:[%s4578_s16 + $0x128] sm:$0xff]  ;;  %v941_v30 = vld [vmem:[%s4578_s16 + $0x160] sm:$0xff]  ;;  %v959_v39 = vld [vmem:[%s4578_s16 + $0x1f0] sm:$0xff] }
 0x962   : > { %3171 = vmatprep.subr.bf16.mxu0 %v3170_v41  ;;  %v902_v41 = vld [vmem:[%s4578_s16 + $0x28] sm:$0xff] }
 0x963   : > { %v3216_v24 = vpack.c.bf16 %v902_v41, %v901_v40  ;;  %v960_v40 = vld [vmem:[%s4578_s16 + $0x1f8] sm:$0xff]  ;;  %v911_v41 = vld [vmem:[%s4578_s16 + $0x70] sm:$0xff] }
 0x964   : > { %3205 = vmatpush1.bf16.msra.mxu1 %v3204_v50  ;;  %v951_v50 = vld [vmem:[%s4578_s16 + $0x1b0] sm:$0xff] }
 0x965   : > { %3173 = vmatpush1.bf16.msra.mxu0 %v3172_v47  ;;  %3239 = vmatprep.subr.bf16.mxu1 %v3238_v53  ;;  %v3248_v47 = vpack.c.bf16 %v934_v46, %v933_v44  ;;  %v3250_v18 = vpack.c.bf16 %v952_v51, %v951_v50  ;;  %v943_v44 = vld [vmem:[%s4578_s16 + $0x170] sm:$0xff]  ;;  %v944_v46 = vld [vmem:[%s4578_s16 + $0x178] sm:$0xff]  ;;  %v1851_v50 = vshrl.u32 %v1850_v27, 7 }
 0x966   : > { %3207 = vmatprep.subr.bf16.mxu0 %v3206_v37  ;;  %v904_v37 = vld [vmem:[%s4578_s16 + $0x38] sm:$0xff]  ;;  %v3268_v48 = vpack.c.bf16 %v944_v46, %v943_v44 }
 0x967   : > { %v3220_v53 = vpack.c.bf16 %v904_v37, %v903_v52  ;;  %v1860_v51 = vsub.s32 2, %v1851_v50  ;;  %v896_v52 = vld [vmem:[%s4577_s15] sm:$0xf]  ;;  %v1856_v37 = vsub.s32 1, %v1851_v50 }
 0x9de   : > { %v1814_v54 = vpop.xlane.xlu0 %1813 }
 0x9df   : > { %v1819_v55 = vmul.f32 0.0078125, %v1814_v54  ;;  %v935_v54 = vld [vmem:[%s4578_s16 + $0x130] sm:$0xff] }
 0x9e1   : > { %v1822_v59 = vadd.f32 1e-12, %v1819_v55  ;;  %v936_v55 = vld [vmem:[%s4578_s16 + $0x138] sm:$0xff] }
 0x9e2   : > { %v1816_v60 = vpop.xlane.xlu0 %1815 }
 0x9e3   : > { %3347 = vrsqrt.f32 %v1822_v59  ;;  %v1820_v20 = vmul.f32 0.0078125, %v1816_v60  ;;  %v3252_v59 = vpack.c.bf16 %v936_v55, %v935_v54  ;;  %v921_v60 = vld [vmem:[%s4578_s16 + $0xc0] sm:$0xff]  ;;  %v1861_v54 = vrot.slane %v896_v52, %v1860_v51 }
 0x9e4   : > { %v1857_v55 = vrot.slane %v896_v52, %v1856_v37 }
 0x9e5   : > { %v1823_v63 = vadd.f32 1e-12, %v1820_v20  ;;  %v922_v20 = vld [vmem:[%s4578_s16 + $0xc8] sm:$0xff] }
 0x9e6   : > { %v1818_v0 = vpop.xlane.xlu1 %1817 }
 0x9e7   : > { %3349 = vrsqrt.f32 %v1823_v63  ;;  %v1821_v1 = vmul.f32 0.0078125, %v1818_v0  ;;  %v953_v63 = vld [vmem:[%s4578_s16 + $0x1c0] sm:$0xff]  ;;  %v3222_v0 = vpack.c.bf16 %v922_v20, %v921_v60 }
 0x9e9   : > { %v1824_v21 = vadd.f32 1e-12, %v1821_v1  ;;  %v954_v1 = vld [vmem:[%s4578_s16 + $0x1c8] sm:$0xff] }
 0x9eb   : > { %3351 = vrsqrt.f32 %v1824_v21  ;;  %v905_v21 = vld [vmem:[%s4578_s16 + $0x40] sm:$0xff] }
 0x9ed   : > { %v3348_v56 = vpop.eup %3347 }
 0x9ee   : > { %v1828_v58 = vmul.f32 %v3348_v56, %v4046_v42  ;;  %v930_v42 = vld [vmem:[%s4578_s16 + $0x108] sm:$0xff] }
 0x9ef   : > { %v3240_v5 = vpack.c.bf16 %v930_v42, %v929_v14  ;;  %v906_v56 = vld [vmem:[%s4578_s16 + $0x48] sm:$0xff]  ;;  %v923_v14 = vld [vmem:[%s4578_s16 + $0xd0] sm:$0xff]  ;;  %v924_v42 = vld [vmem:[%s4578_s16 + $0xd8] sm:$0xff] }
 0x9f0   : > { %v1837_v15 = vmul.f32 %v2566_v29, %v1828_v58  ;;  %v3224_v58 = vpack.c.bf16 %v906_v56, %v905_v21 }
 0x9f1   : > { %v3350_v17 = vpop.eup %3349 }
 0x9f2   : > { %v4209_v22 = vadd.f32 %v2567_v33, %v1837_v15  ;;  %v1829_v3 = vmul.f32 %v3350_v17, %v4050_v45  ;;  %v955_v15 = vld [vmem:[%s4578_s16 + $0x1d0] sm:$0xff]  ;;  %v3226_v17 = vpack.c.bf16 %v924_v42, %v923_v14 }
 0x9f4   : > { %1935 = vmatmul.mubr.f32.vlgmr.msra.gmra.mrb[18].mxu0 %v4209_v22  ;;  %2018 = vmatmul.mubr.f32.vlgmr.msra.gmra.mrb[30].mxu1 %v4209_v22  ;;  %v1838_v7 = vmul.f32 %v2566_v29, %v1829_v3  ;;  %v956_v3 = vld [vmem:[%s4578_s16 + $0x1d8] sm:$0xff] }
 0x9f5   : > { %v3352_v8 = vpop.eup %3351  ;;  %1940 = vmatprep.mubr.f32.mxu0 %v3395_v57  ;;  %2023 = vmatprep.mubr.f32.mxu1 %v3395_v57 }
 0x9f6   : > { %v4216_v9 = vadd.f32 %v2567_v33, %v1838_v7  ;;  %v1830_v61 = vmul.f32 %v3352_v8, %v4054_v49  ;;  %3209 = vmatpush3.bf16.msra.mxu0 %v3208_v4  ;;  %3241 = vmatpush3.bf16.msra.mxu1 %v3240_v5  ;;  %v915_v49 = vld [vmem:[%s4578_s16 + $0x90] sm:$0xff]  ;;  %v908_v5 = vld [vmem:[%s4578_s16 + $0x58] sm:$0xff]  ;;  %v3258_v7 = vpack.c.bf16 %v956_v3, %v955_v15 }
 0x9f7   : > { %v3210_v16 = vpack.c.bf16 %v916_v11, %v915_v49  ;;  %3243 = vmatprep.subr.bf16.mxu1 %v3242_v26  ;;  %v907_v4 = vld [vmem:[%s4578_s16 + $0x50] sm:$0xff]  ;;  %v925_v49 = vld [vmem:[%s4578_s16 + $0xe0] sm:$0xff] }
 0x9f8   : > { %1941 = vmatmul.mubr.f32.gmra.mrb[20].mxu0 %v4216_v9  ;;  %2024 = vmatmul.mubr.f32.gmra.mrb[32].mxu1 %v4216_v9  ;;  %v1839_v45 = vmul.f32 %v2566_v29, %v1830_v61  ;;  %v3254_v29 = vpack.c.bf16 %v954_v1, %v953_v63  ;;  %v3228_v8 = vpack.c.bf16 %v908_v5, %v907_v4  ;;  %v939_v61 = vld [vmem:[%s4578_s16 + $0x150] sm:$0xff]  ;;  %v909_v26 = vld [vmem:[%s4578_s16 + $0x60] sm:$0xff] }
 0x9f9   : > { %1946 = vmatprep.mubr.f32.mxu0 %v3395_v57  ;;  %2029 = vmatprep.mubr.f32.mxu1 %v3395_v57  ;;  %v3230_v23 = vpack.c.bf16 %v926_v12, %v925_v49 }
 0x9fa   : > { %v4223_v10 = vadd.f32 %v2567_v33, %v1839_v45  ;;  %3211 = vmatprep.subr.bf16.mxu0 %v3210_v16  ;;  %3245 = vmatpush3.bf16.msra.mxu1 %v3244_v32  ;;  %v937_v33 = vld [vmem:[%s4578_s16 + $0x140] sm:$0xff]  ;;  %v940_v45 = vld [vmem:[%s4578_s16 + $0x158] sm:$0xff]  ;;  %v942_v32 = vld [vmem:[%s4578_s16 + $0x168] sm:$0xff] }
 0x9fb   : > { %3213 = vmatpush3.bf16.msra.mxu0 %v3212_v28  ;;  %3247 = vmatprep.subr.bf16.mxu1 %v3246_v43  ;;  %v3256_v2 = vpack.c.bf16 %v938_v62, %v937_v33  ;;  %v3260_v11 = vpack.c.bf16 %v940_v45, %v939_v61  ;;  %v957_v16 = vld [vmem:[%s4578_s16 + $0x1e0] sm:$0xff]  ;;  %v910_v28 = vld [vmem:[%s4578_s16 + $0x68] sm:$0xff]  ;;  %v3264_v36 = vpack.c.bf16 %v942_v32, %v941_v30 }
 0x9fc   : > { %1947 = vmatmul.mubr.f32.gmra.mrb[22].mxu0 %v4223_v10  ;;  %2030 = vmatmul.mubr.f32.gmra.mrb[34].mxu1 %v4223_v10  ;;  %v3262_v25 = vpack.c.bf16 %v958_v19, %v957_v16  ;;  %v3232_v31 = vpack.c.bf16 %v910_v28, %v909_v26  ;;  %v3266_v43 = vpack.c.bf16 %v960_v40, %v959_v39 }
 0x9fd   : > { %3215 = vmatprep.subr.bf16.mxu0 %v3214_v38  ;;  %v3234_v38 = vpack.c.bf16 %v928_v35, %v927_v34 }
 0x9fe   : > { %3249 = vmatpush3.bf16.msra.mxu1 %v3248_v47 }
 0x9ff   : > { %3217 = vmatpush3.bf16.msra.mxu0 %v3216_v24  ;;  %3251 = vmatprep.subr.bf16.mxu1 %v3250_v18  ;;  %v912_v24 = vld [vmem:[%s4578_s16 + $0x78] sm:$0xff]  ;;  %v1864_v18 = vsub.s32 3, %v1851_v50 }
 0xa00   : > { %3219 = vmatprep.subr.bf16.mxu0 %v3218_v13  ;;  %v3236_v47 = vpack.c.bf16 %v912_v24, %v911_v41  ;;  %v1852_v13 = vsub.s32 0, %v1851_v50 }
 0xa02   : > { %3253 = vmatpush3.bf16.msra.mxu1 %v3252_v59  ;;  %v1865_v59 = vrot.slane %v896_v52, %v1864_v18 }
 0xa03   : > { %3221 = vmatpush3.bf16.msra.mxu0 %v3220_v53  ;;  %3255 = vmatprep.subr.bf16.mxu1 %v3254_v29  ;;  %v1853_v53 = vrot.slane %v896_v52, %v1852_v13 }
 0xa04   : > { %3223 = vmatprep.subr.bf16.mxu0 %v3222_v0 }
 0xa06   : > { %3257 = vmatpush3.bf16.msra.mxu1 %v3256_v2 }
 0xa07   : > { %3225 = vmatpush3.bf16.msra.mxu0 %v3224_v58  ;;  %3259 = vmatprep.subr.bf16.mxu1 %v3258_v7 }
 0xa08   : > { %3227 = vmatprep.subr.bf16.mxu0 %v3226_v17 }
 0xa0a   : > { %3261 = vmatpush3.bf16.msra.mxu1 %v3260_v11 }
 0xa0b   : > { %3229 = vmatpush3.bf16.msra.mxu0 %v3228_v8  ;;  %3263 = vmatprep.subr.bf16.mxu1 %v3262_v25 }
 0xa0c   : > { %3231 = vmatprep.subr.bf16.mxu0 %v3230_v23 }
 0xa0e   : > { %3265 = vmatpush3.bf16.msra.mxu1 %v3264_v36 }
 0xa0f   : > { %3233 = vmatpush3.bf16.msra.mxu0 %v3232_v31  ;;  %3267 = vmatprep.subr.bf16.mxu1 %v3266_v43 }
 0xa10   : > { %3235 = vmatprep.subr.bf16.mxu0 %v3234_v38 }
 0xa12   : > { %3269 = vmatpush3.bf16.msra.mxu1 %v3268_v48 }
 0xa13   : > { %3237 = vmatpush3.bf16.msra.mxu0 %v3236_v47 }
 0xa14   : > { %3270 = vmatprep.subr.bf16.mxu0 %v3393_v6 }
 0xac7   : > { %v1936_v60 = vpop.f32.mrb[18].mxu0  ;;  %v2019_v20 = vpop.f32.mrb[30].mxu1 }
 0xac8   : > { %v4399_v63 = vadd.f32 %v1936_v60, %v1853_v53  ;;  %v4401_v0 = vadd.f32 %v2019_v20, %v1861_v54  ;;  %v1938_v1 = vpop.f32.mrb[19].mxu0  ;;  %v2021_v21 = vpop.f32.mrb[31].mxu1 }
 0xac9   : > { %v4403_v56 = vadd.f32 %v1938_v1, %v1857_v55  ;;  %v4405_v29 = vadd.f32 %v2021_v21, %v1865_v59 }
 0xaca   : > { %v2048_v58 = vmul.f32 0.044715, %v4399_v63  ;;  %v2050_v33 = vmul.f32 0.044715, %v4401_v0 }
 0xacb   : > { %v2049_v62 = vmul.f32 0.044715, %v4403_v56  ;;  %v2051_v2 = vmul.f32 0.044715, %v4405_v29  ;;  %v1942_v14 = vpop.f32.mrb[20].mxu0  ;;  %v2025_v42 = vpop.f32.mrb[32].mxu1 }
 0xacc   : > { %v2060_v15 = vmul.f32 %v2048_v58, %v4399_v63  ;;  %v2062_v17 = vmul.f32 %v2050_v33, %v4401_v0  ;;  %v4413_v3 = vadd.f32 %v1942_v14, %v1853_v53  ;;  %v4415_v4 = vadd.f32 %v2025_v42, %v1861_v54  ;;  %v1944_v5 = vpop.f32.mrb[21].mxu0  ;;  %v2027_v7 = vpop.f32.mrb[33].mxu1 }
 0xacd   : > { %v2061_v8 = vmul.f32 %v2049_v62, %v4403_v56  ;;  %v2063_v61 = vmul.f32 %v2051_v2, %v4405_v29  ;;  %v4419_v45 = vadd.f32 %v1944_v5, %v1857_v55  ;;  %v4421_v49 = vadd.f32 %v2027_v7, %v1865_v59 }
 0xace   : > { %v2072_v11 = vmul.f32 %v2060_v15, %v4399_v63  ;;  %v2074_v12 = vmul.f32 %v2062_v17, %v4401_v0  ;;  %v2052_v16 = vmul.f32 0.044715, %v4413_v3  ;;  %v2054_v35 = vmul.f32 0.044715, %v4415_v4 }
 0xacf   : > { %v2053_v19 = vmul.f32 0.044715, %v4419_v45  ;;  %v2055_v23 = vmul.f32 0.044715, %v4421_v49  ;;  %v1948_v25 = vpop.f32.mrb[22].mxu0  ;;  %v2031_v26 = vpop.f32.mrb[34].mxu1  ;;  %v2073_v28 = vmul.f32 %v2061_v8, %v4403_v56  ;;  %v2075_v39 = vmul.f32 %v2063_v61, %v4405_v29 }
 0xad0   : > { %v2084_v30 = vadd.f32 %v2072_v11, %v4399_v63  ;;  %v2086_v31 = vadd.f32 %v2074_v12, %v4401_v0  ;;  %v1950_v32 = vpop.f32.mrb[23].mxu0  ;;  %v2033_v34 = vpop.f32.mrb[35].mxu1  ;;  %v4432_v36 = vadd.f32 %v1948_v25, %v1853_v53  ;;  %v4434_v38 = vadd.f32 %v2031_v26, %v1861_v54 }
 0xad1   : > { %v4437_v43 = vadd.f32 %v1950_v32, %v1857_v55  ;;  %v4439_v24 = vadd.f32 %v2033_v34, %v1865_v59  ;;  %v2064_v44 = vmul.f32 %v2052_v16, %v4413_v3  ;;  %v2065_v46 = vmul.f32 %v2053_v19, %v4419_v45 }
 0xad2   : > { %v2096_v40 = vmul.f32 0.7978846, %v2084_v30  ;;  %v2098_v41 = vmul.f32 0.7978846, %v2086_v31  ;;  %v2067_v47 = vmul.f32 %v2055_v23, %v4421_v49  ;;  %v2085_v48 = vadd.f32 %v2073_v28, %v4403_v56 }
 0xad3   : > { %v2056_v27 = vmul.f32 0.044715, %v4432_v36  ;;  %v2057_v50 = vmul.f32 0.044715, %v4437_v43  ;;  %v2059_v13 = vmul.f32 0.044715, %v4439_v24  ;;  %v2066_v51 = vmul.f32 %v2054_v35, %v4415_v4 }
 0xad4   : > { %3353 = vtanh.f32 %v2096_v40  ;;  %v2097_v52 = vmul.f32 0.7978846, %v2085_v48  ;;  %v2058_v37 = vmul.f32 0.044715, %v4434_v38  ;;  %v2087_v53 = vadd.f32 %v2075_v39, %v4405_v29 }
 0xad5   : > { %3355 = vtanh.f32 %v2098_v41  ;;  %v2069_v18 = vmul.f32 %v2057_v50, %v4437_v43  ;;  %v2071_v54 = vmul.f32 %v2059_v13, %v4439_v24  ;;  %v2077_v55 = vmul.f32 %v2065_v46, %v4419_v45 }
 0xad6   : > { %3357 = vtanh.f32 %v2097_v52  ;;  %v2079_v59 = vmul.f32 %v2067_v47, %v4421_v49  ;;  %v2068_v60 = vmul.f32 %v2056_v27, %v4432_v36  ;;  %v2099_v20 = vmul.f32 0.7978846, %v2087_v53 }
 0xad7   : > { %v2076_v1 = vmul.f32 %v2064_v44, %v4413_v3  ;;  %v2089_v21 = vadd.f32 %v2077_v55, %v4419_v45  ;;  %v2078_v33 = vmul.f32 %v2066_v51, %v4415_v4  ;;  %v2070_v62 = vmul.f32 %v2058_v37, %v4434_v38 }
 0xad8   : > { %v2091_v58 = vadd.f32 %v2079_v59, %v4421_v49  ;;  %3359 = vtanh.f32 %v2099_v20  ;;  %v2081_v14 = vmul.f32 %v2069_v18, %v4437_v43  ;;  %v2083_v5 = vmul.f32 %v2071_v54, %v4439_v24 }
 0xad9   : > { %v2088_v2 = vadd.f32 %v2076_v1, %v4413_v3  ;;  %v2101_v42 = vmul.f32 0.7978846, %v2089_v21  ;;  %v2090_v17 = vadd.f32 %v2078_v33, %v4415_v4  ;;  %v2080_v61 = vmul.f32 %v2068_v60, %v4432_v36 }
 0xada   : > { %v2103_v15 = vmul.f32 0.7978846, %v2091_v58  ;;  %v2093_v8 = vadd.f32 %v2081_v14, %v4437_v43  ;;  %v2095_v12 = vadd.f32 %v2083_v5, %v4439_v24  ;;  %v2082_v25 = vmul.f32 %v2070_v62, %v4434_v38 }
 0xadb   : > { %v2100_v7 = vmul.f32 0.7978846, %v2088_v2  ;;  %3361 = vtanh.f32 %v2101_v42  ;;  %v2102_v11 = vmul.f32 0.7978846, %v2090_v17  ;;  %v2092_v23 = vadd.f32 %v2080_v61, %v4432_v36 }
 0xadc   : > { %3363 = vtanh.f32 %v2103_v15  ;;  %v2105_v19 = vmul.f32 0.7978846, %v2093_v8  ;;  %v2107_v26 = vmul.f32 0.7978846, %v2095_v12  ;;  %v2094_v31 = vadd.f32 %v2082_v25, %v4434_v38 }
 0xadd   : > { %3365 = vtanh.f32 %v2100_v7  ;;  %v2104_v30 = vmul.f32 0.7978846, %v2092_v23  ;;  %v2037_v35 = vmul.f32 0.5, %v4403_v56  ;;  %v2036_v41 = vmul.f32 0.5, %v4399_v63 }
 0xade   : > { %v3354_v16 = vpop.eup %3353  ;;  %3367 = vtanh.f32 %v2102_v11  ;;  %v2106_v40 = vmul.f32 0.7978846, %v2094_v31  ;;  %v2039_v48 = vmul.f32 0.5, %v4405_v29  ;;  %v2038_v13 = vmul.f32 0.5, %v4401_v0 }
 0xadf   : > { %v3356_v28 = vpop.eup %3355  ;;  %v2120_v34 = vadd.f32 1.0, %v3354_v16  ;;  %3369 = vtanh.f32 %v2105_v19  ;;  %v2041_v18 = vmul.f32 0.5, %v4419_v45  ;;  %v2043_v54 = vmul.f32 0.5, %v4421_v49 }
 0xae0   : > { %v3358_v32 = vpop.eup %3357  ;;  %3371 = vtanh.f32 %v2107_v26  ;;  %v2122_v47 = vadd.f32 1.0, %v3356_v28  ;;  %v2040_v60 = vmul.f32 0.5, %v4413_v3  ;;  %v2042_v21 = vmul.f32 0.5, %v4415_v4 }
 0xae1   : > { %v2121_v39 = vadd.f32 1.0, %v3358_v32  ;;  %3373 = vtanh.f32 %v2104_v30  ;;  %v2132_v50 = vmul.f32 %v2120_v34, %v2036_v41  ;;  %v2045_v62 = vmul.f32 0.5, %v4437_v43 }
 0xae2   : > { %v3360_v44 = vpop.eup %3359  ;;  %3375 = vtanh.f32 %v2106_v40  ;;  %v2134_v37 = vmul.f32 %v2122_v47, %v2038_v13  ;;  %v2047_v42 = vmul.f32 0.5, %v4439_v24  ;;  %v2044_v5 = vmul.f32 0.5, %v4432_v36  ;;  %v2568_v36 = vld [vmem:[%s4579_s17] ss:$0 sm:$0xff] }
 0xae3   : > { %v2133_v46 = vmul.f32 %v2121_v39, %v2037_v35  ;;  %v2123_v27 = vadd.f32 1.0, %v3360_v44  ;;  %v2046_v8 = vmul.f32 0.5, %v4434_v38 }
 0xae5   : > { %2214 = vmatprep.mubr.f32.mxu0 %v2133_v46  ;;  %v3362_v51 = vpop.eup %3361  ;;  %v2135_v52 = vmul.f32 %v2123_v27, %v2039_v48 }
 0xae6   : > { %2215 = vmatmul.mubr.f32.vlgmr.msra.gmra.mrb[24].mxu0 %v2132_v50  ;;  %v3364_v56 = vpop.eup %3363  ;;  %v2125_v63 = vadd.f32 1.0, %v3362_v51 }
 0xae7   : > { %v3366_v53 = vpop.eup %3365  ;;  %2294 = vmatprep.mubr.f32.mxu1 %v2135_v52  ;;  %v2127_v55 = vadd.f32 1.0, %v3364_v56  ;;  %v2374_v56 = vld [vmem:[%s4582_s20] sm:$0xff] }
 0xae8   : > { %v3368_v59 = vpop.eup %3367  ;;  %2295 = vmatmul.mubr.f32.vlgmr.msra.gmra.mrb[36].mxu1 %v2134_v37  ;;  %v2137_v29 = vmul.f32 %v2125_v63, %v2041_v18  ;;  %v2124_v0 = vadd.f32 1.0, %v3366_v53  ;;  %v2375_v37 = vld [vmem:[%s4582_s20 + $0x8] sm:$0xff] }
 0xae9   : > { %v3370_v20 = vpop.eup %3369  ;;  %v2139_v1 = vmul.f32 %v2127_v55, %v2043_v54  ;;  %v2126_v58 = vadd.f32 1.0, %v3368_v59  ;;  %v3271_v18 = vpack.c.bf16 %v2375_v37, %v2374_v56 }
 0xaea   : > { %v3372_v33 = vpop.eup %3371  ;;  %2219 = vmatprep.mubr.f32.mxu0 %v2137_v29  ;;  %v2136_v45 = vmul.f32 %v2124_v0, %v2040_v60  ;;  %v2129_v2 = vadd.f32 1.0, %v3370_v20 }
 0xaeb   : > { %v3374_v14 = vpop.eup %3373  ;;  %2299 = vmatprep.mubr.f32.mxu1 %v2139_v1  ;;  %v2138_v49 = vmul.f32 %v2126_v58, %v2042_v21  ;;  %v2131_v15 = vadd.f32 1.0, %v3372_v33  ;;  %3272 = vmatpush3.bf16.msra.mxu0 %v3271_v18  ;;  %v2376_v1 = vld [vmem:[%s4582_s20 + $0x10] sm:$0xff]  ;;  %v2377_v21 = vld [vmem:[%s4582_s20 + $0x18] sm:$0xff]  ;;  %v2378_v33 = vld [vmem:[%s4582_s20 + $0x20] sm:$0xff] }
 0xaec   : > { %v3376_v17 = vpop.eup %3375  ;;  %2220 = vmatmul.mubr.f32.gmra.mrb[26].mxu0 %v2136_v45  ;;  %v2141_v3 = vmul.f32 %v2129_v2, %v2045_v62  ;;  %v2128_v7 = vadd.f32 1.0, %v3374_v14  ;;  %3273 = vmatprep.subr.bf16.mxu0 %v3393_v6  ;;  %v3274_v58 = vpack.c.bf16 %v2377_v21, %v2376_v1  ;;  %v2379_v45 = vld [vmem:[%s4582_s20 + $0x28] sm:$0xff]  ;;  %v2380_v2 = vld [vmem:[%s4582_s20 + $0x30] sm:$0xff]  ;;  %v2381_v14 = vld [vmem:[%s4582_s20 + $0x38] sm:$0xff] }
 0xaed   : > { %2300 = vmatmul.mubr.f32.gmra.mrb[38].mxu1 %v2138_v49  ;;  %v2143_v4 = vmul.f32 %v2131_v15, %v2047_v42  ;;  %v2130_v61 = vadd.f32 1.0, %v3376_v17  ;;  %v3277_v62 = vpack.c.bf16 %v2379_v45, %v2378_v33  ;;  %v3280_v49 = vpack.c.bf16 %v2381_v14, %v2380_v2  ;;  %v2382_v42 = vld [vmem:[%s4582_s20 + $0x40] sm:$0xff]  ;;  %v2383_v15 = vld [vmem:[%s4582_s20 + $0x48] sm:$0xff] }
 0xaee   : > { %2224 = vmatprep.mubr.f32.mxu0 %v2141_v3  ;;  %v2140_v43 = vmul.f32 %v2128_v7, %v2044_v5  ;;  %v3283_v17 = vpack.c.bf16 %v2383_v15, %v2382_v42  ;;  %v2384_v3 = vld [vmem:[%s4582_s20 + $0x50] sm:$0xff]  ;;  %v2385_v5 = vld [vmem:[%s4582_s20 + $0x58] sm:$0xff] }
 0xaef   : > { %2304 = vmatprep.mubr.f32.mxu1 %v2143_v4  ;;  %v2142_v11 = vmul.f32 %v2130_v61, %v2046_v8  ;;  %3275 = vmatpush3.bf16.msra.mxu0 %v3274_v58  ;;  %v3286_v7 = vpack.c.bf16 %v2385_v5, %v2384_v3  ;;  %v2386_v4 = vld [vmem:[%s4582_s20 + $0x60] sm:$0xff]  ;;  %v2387_v8 = vld [vmem:[%s4582_s20 + $0x68] sm:$0xff] }
 0xaf0   : > { %2225 = vmatmul.mubr.f32.gmra.mrb[28].mxu0 %v2140_v43  ;;  %3276 = vmatprep.subr.bf16.mxu0 %v3393_v6  ;;  %v3289_v61 = vpack.c.bf16 %v2387_v8, %v2386_v4  ;;  %v2388_v43 = vld [vmem:[%s4582_s20 + $0x70] sm:$0xff] }
 0xaf1   : > { %2305 = vmatmul.mubr.f32.gmra.mrb[40].mxu1 %v2142_v11  ;;  %3029 = vmatprep.mubr.msk.f32.mxu0 %vm3394_vm0, %v3395_v57  ;;  %v2389_v11 = vld [vmem:[%s4582_s20 + $0x78] sm:$0xff] }
 0xaf3   : > { %3278 = vmatpush3.bf16.msra.mxu0 %v3277_v62 }
 0xaf4   : > { %3279 = vmatprep.subr.bf16.mxu0 %v3393_v6 }
 0xaf7   : > { %3281 = vmatpush3.bf16.msra.mxu0 %v3280_v49 }
 0xaf8   : > { %3282 = vmatprep.subr.bf16.mxu0 %v3393_v6 }
 0xafb   : > { %3284 = vmatpush3.bf16.msra.mxu0 %v3283_v17 }
 0xafc   : > { %3285 = vmatprep.subr.bf16.mxu0 %v3393_v6 }
 0xaff   : > { %3287 = vmatpush3.bf16.msra.mxu0 %v3286_v7 }
 0xb00   : > { %3288 = vmatprep.subr.bf16.mxu0 %v3393_v6 }
 0xb03   : > { %3290 = vmatpush3.bf16.msra.mxu0 %v3289_v61 }
 0xb04   : > { %3291 = vmatprep.subr.bf16.mxu0 %v3393_v6  ;;  %v2570_v6 = vld [vmem:[%s4581_s19] ss:$0 sm:$0xff] }
 0xbb9   : > { %v2706_v24 = vpop.f32.mrb[24].mxu0 }
 0xbba   : > { %v2707_v12 = vpop.f32.mrb[25].mxu0 }
 0xbbb   : > { %v2708_v16 = vadd.f32 %v2707_v12, %v2706_v24  ;;  %v2747_v19 = vpop.f32.mrb[36].mxu1  ;;  %v3292_v24 = vpack.c.bf16 %v2389_v11, %v2388_v43 }
 0xbbc   : > { %v2748_v38 = vpop.f32.mrb[37].mxu1 }
 0xbbd   : > { %v2217_v23 = vadd.f32 %v2708_v16, %v2568_v36  ;;  %v2749_v25 = vadd.f32 %v2748_v38, %v2747_v19  ;;  %3293 = vmatpush3.bf16.msra.mxu0 %v3292_v24 }
 0xbbf   : > { %v2297_v26 = vadd.f32 %v2749_v25, %v2217_v23  ;;  %v2709_v28 = vpop.f32.mrb[26].mxu0 }
 0xbc0   : > { %v2750_v30 = vpop.f32.mrb[38].mxu1  ;;  %v2710_v31 = vpop.f32.mrb[27].mxu0 }
 0xbc1   : > { %v2711_v32 = vadd.f32 %v2710_v31, %v2709_v28  ;;  %v2751_v34 = vpop.f32.mrb[39].mxu1  ;;  %v2310_v52 = vadd.f32 %v2297_v26, %v4209_v22  ;;  %v2569_v31 = vld [vmem:[%s4580_s18] ss:$0 sm:$0xff] }
 0xbc2   : > { %v2752_v35 = vadd.f32 %v2751_v34, %v2750_v30 }
 0xbc3   : > { %v2222_v39 = vadd.f32 %v2711_v32, %v2568_v36  ;;  %v2712_v57 = vpop.f32.mrb[28].mxu0 }
 0xbc4   : > { %v2753_v40 = vpop.f32.mrb[40].mxu1  ;;  %v2713_v41 = vpop.f32.mrb[29].mxu0 }
 0xbc5   : > { %v2302_v44 = vadd.f32 %v2752_v35, %v2222_v39  ;;  %v2714_v46 = vadd.f32 %v2713_v41, %v2712_v57  ;;  %v2754_v47 = vpop.f32.mrb[41].mxu1 }
 0xbc6   : > { %v2755_v48 = vadd.f32 %v2754_v47, %v2753_v40 }
 0xbc7   : > { %v2227_v27 = vadd.f32 %v2714_v46, %v2568_v36  ;;  %v2311_v50 = vadd.f32 %v2302_v44, %v4216_v9 }
 0xbc9   : > { %v2307_v13 = vadd.f32 %v2755_v48, %v2227_v27  ;;  %2315 = vadd.xlane.f32.xlu0 %v2311_v50 }
 0xbcb   : > { %v2312_v51 = vadd.f32 %v2307_v13, %v4223_v10 }
 0xbcd   : > { %2317 = vadd.xlane.f32.xlu1 %v2312_v51  ;;  %2313 = vadd.xlane.f32.xlu0 %v2310_v52 }
 0xc56   : > { %v2316_v9 = vpop.xlane.xlu0 %2315 }
 0xc57   : > { %v2320_v63 = vmul.f32 0.0078125, %v2316_v9 }
 0xc59   : > { %v2323_v53 = vsub.f32 %v2311_v50, %v2320_v63 }
 0xc5a   : > { %v2318_v10 = vpop.xlane.xlu1 %2317  ;;  %v2314_v54 = vpop.xlane.xlu0 %2313 }
 0xc5b   : > { %v2321_v22 = vmul.f32 0.0078125, %v2318_v10  ;;  %v2319_v55 = vmul.f32 0.0078125, %v2314_v54  ;;  %v2326_v59 = vmul.f32 %v2323_v53, %v2323_v53 }
 0xc5d   : > { %v2324_v29 = vsub.f32 %v2312_v51, %v2321_v22  ;;  %v2322_v60 = vsub.f32 %v2310_v52, %v2319_v55  ;;  %2330 = vadd.xlane.f32.xlu1 %v2326_v59  ;;  %v2571_v52 = vld [vmem:[%s4583_s21] ss:$0 sm:$0xff] }
 0xc5f   : > { %v2327_v0 = vmul.f32 %v2324_v29, %v2324_v29  ;;  %v2325_v20 = vmul.f32 %v2322_v60, %v2322_v60 }
 0xc61   : > { %2332 = vadd.xlane.f32.xlu0 %v2327_v0  ;;  %2328 = vadd.xlane.f32.xlu1 %v2325_v20 }
 0xcea   : > { %v2331_v36 = vpop.xlane.xlu1 %2330 }
 0xceb   : > { %v2335_v12 = vmul.f32 0.0078125, %v2331_v36 }
 0xced   : > { %v2338_v16 = vadd.f32 1e-12, %v2335_v12 }
 0xcee   : > { %v2329_v19 = vpop.xlane.xlu1 %2328  ;;  %v2333_v23 = vpop.xlane.xlu0 %2332 }
 0xcef   : > { %3377 = vrsqrt.f32 %v2338_v16  ;;  %v2334_v38 = vmul.f32 0.0078125, %v2329_v19  ;;  %v2336_v25 = vmul.f32 0.0078125, %v2333_v23 }
 0xcf1   : > { %v2337_v26 = vadd.f32 1e-12, %v2334_v38  ;;  %v2339_v28 = vadd.f32 1e-12, %v2336_v25 }
 0xcf3   : > { %3379 = vrsqrt.f32 %v2337_v26 }
 0xcf4   : > { %3381 = vrsqrt.f32 %v2339_v28 }
 0xcf9   : > { %v3378_v30 = vpop.eup %3377 }
 0xcfa   : > { %v2344_v32 = vmul.f32 %v3378_v30, %v2323_v53 }
 0xcfc   : > { %v2353_v34 = vmul.f32 %v2569_v31, %v2344_v32 }
 0xcfd   : > { %v3380_v35 = vpop.eup %3379 }
 0xcfe   : > { %v3382_v39 = vpop.eup %3381  ;;  %v2343_v57 = vmul.f32 %v3380_v35, %v2322_v60  ;;  %v2362_v40 = vadd.f32 %v2570_v6, %v2353_v34 }
 0xcff   : > { %v2345_v41 = vmul.f32 %v3382_v39, %v2324_v29 }
 0xd00   : > { %v2352_v44 = vmul.f32 %v2569_v31, %v2343_v57  ;;  %v2365_v48 = vrot.slane %v2362_v40, 7 }
 0xd01   : > { %v2354_v46 = vmul.f32 %v2569_v31, %v2345_v41 }
 0xd02   : > { %v2361_v47 = vadd.f32 %v2570_v6, %v2352_v44 }
 0xd03   : > { %v2363_v27 = vadd.f32 %v2570_v6, %v2354_v46 }
 0xd04   : > { %v2371_v50 = vsel %vm2370_vm4, %v2361_v47, %v2365_v48 }
 0xd05   : > { %v2368_v13 = vrot.slane %v2363_v27, 6 }
 0xd07   : > { %v2373_v51 = vsel %vm2372_vm5, %v2371_v50, %v2368_v13 }
 0xd08   : > { %3030 = vmatmul.mubr.f32.vlgmr.msra.gmra.mrb[30].mxu0 %v2373_v51 }
 0xddb   : > { %v2463_v56 = vpop.f32.mrb[30].mxu0 }
 0xddc   : > { %v2464_v37 = vadd.f32 %v2571_v52, %v2463_v56  ;;  %v3031_v18 = vpop.f32.mrb[31].mxu0 }
 0xdde   : > { %3383 = vtanh.f32 %v2464_v37 }
 0xde8   : > { %v3384_v9 = vpop.eup %3383 }
 0xde9   : > { %2468 = vst [vmem:[%s701_s26] sm:$0x7] %v3384_v9 }
 0xdea PF: > { %s32_s3 = sadd.s32 1, %s3391_s3  }
 0xdeb   : > { %p29_p4 = scmp.ge.s32.totalorder %s32_s3, 4  }
 0xded   :  { %31 = sbr.rel (!%p29_p4) target bundleno = 8 (0x8), region = 141 }

// kernel: teacher_forward.5
= control target key start
LH: loop header
LB: loop body
LE: loop exit
PB: predicated region body
PF: predicated region fallthrough
CT: control target
= control target key end

     0   :  { %s4367_s0 = inlined_call_operand.vmem [shape: f32[2,4,128], index: 0, kind: input, shape index: {}]   ;;  %s4368_s1 = inlined_call_operand.vmem [shape: f32[4,128], index: 1, kind: input, shape index: {}]   ;;  %s4369_s2 = inlined_call_operand.vmem [shape: f32[1,128], index: 2, kind: input, shape index: {}]   ;;  %s4370_s3 = inlined_call_operand.vmem [shape: f32[1,128], index: 3, kind: input, shape index: {}]   ;;  %s4371_s4 = inlined_call_operand.vmem [shape: f32[128,128], index: 4, kind: input, shape index: {}]   ;;  %s4372_s5 = inlined_call_operand.vmem [shape: f32[1,128], index: 5, kind: input, shape index: {}]   ;;  %s4373_s6 = inlined_call_operand.vmem [shape: f32[128,128], index: 6, kind: input, shape index: {}]   ;;  %s4374_s7 = inlined_call_operand.vmem [shape: f32[1,128], index: 7, kind: input, shape index: {}]   ;;  %s4375_s8 = inlined_call_operand.vmem [shape: f32[128,128], index: 8, kind: input, shape index: {}]   ;;  %s4376_s9 = inlined_call_operand.vmem [shape: f32[1,128], index: 9, kind: input, shape index: {}]   ;;  %s4377_s10 = inlined_call_operand.vmem [shape: f32[128,128], index: 10, kind: input, shape index: {}]   ;;  %s4378_s11 = inlined_call_operand.vmem [shape: f32[1,128], index: 11, kind: input, shape index: {}]   ;;  %s4379_s12 = inlined_call_operand.vmem [shape: f32[1,128], index: 12, kind: input, shape index: {}]   ;;  %s4380_s13 = inlined_call_operand.vmem [shape: f32[1,128], index: 13, kind: input, shape index: {}]   ;;  %s4381_s14 = inlined_call_operand.vmem [shape: f32[128,512], index: 14, kind: input, shape index: {}]   ;;  %s4382_s15 = inlined_call_operand.vmem [shape: f32[1,512], index: 15, kind: input, shape index: {}]   ;;  %s4383_s16 = inlined_call_operand.vmem [shape: f32[512,128], index: 16, kind: input, shape index: {}]   ;;  %s4384_s17 = inlined_call_operand.vmem [shape: f32[1,128], index: 17, kind: input, shape index: {}]   ;;  %s4385_s18 = inlined_call_operand.vmem [shape: f32[1,128], index: 18, kind: input, shape index: {}]   ;;  %s4386_s19 = inlined_call_operand.vmem [shape: f32[1,128], index: 19, kind: input, shape index: {}]   ;;  %s4387_s20 = inlined_call_operand.vmem [shape: f32[128,256], index: 20, kind: input, shape index: {}]   ;;  %s4388_s21 = inlined_call_operand.vmem [shape: f32[1,256], index: 21, kind: input, shape index: {}]   ;;  %s4389_s22 = inlined_call_operand.vmem [shape: f32[256,128], index: 22, kind: input, shape index: {}]   ;;  %s4390_s23 = inlined_call_operand.vmem [shape: f32[1,128], index: 23, kind: input, shape index: {}]   ;;  %s4391_s24 = inlined_call_operand.hbm [shape: f32[2,1,128], index: 24, kind: output, shape index: {0}]   ;;  %s4392_s25 = inlined_call_operand.vmem [shape: f32[2,1,256], index: 25, kind: output, shape index: {1}]  }
   0x1   :  { %4406 = sst [smem:[#allocation12_spill]] %s4367_s0 }
   0x2   :  { %4407 = sst [smem:[#allocation13_spill]] %s4368_s1 }
   0x3   :  { %4408 = sst [smem:[#allocation14_spill]] %s4369_s2 }
   0x4   :  { %4409 = sst [smem:[#allocation15_spill]] %s4370_s3 }
   0x5   :  { %4410 = sst [smem:[#allocation16_spill]] %s4371_s4 }
   0x6   :  { %4411 = sst [smem:[#allocation17_spill]] %s4372_s5 }
   0x7   :  { %4412 = sst [smem:[#allocation18_spill]] %s4373_s6 }
   0x8   :  { %4413 = sst [smem:[#allocation19_spill]] %s4374_s7 }
   0x9   :  { %4414 = sst [smem:[#allocation20_spill]] %s4375_s8 }
   0xa   :  { %4415 = sst [smem:[#allocation21_spill]] %s4376_s9 }
   0xb   :  { %4416 = sst [smem:[#allocation22_spill]] %s4377_s10 }
   0xc   :  { %4417 = sst [smem:[#allocation23_spill]] %s4390_s23 }
   0xd   :  { %4418 = sst [smem:[#allocation24_spill]] %s4391_s24 }
   0xe   :  { %31 = vsyncpa [#allocation3], 0 }
   0xf   :  { %33 = vsyncpa [#allocation3 + $0x1], 0  ;;  %s3327_s29 = smov 0   ;;  %s3329_s2 = smov 0  }
  0x10   :  { %s3331_s6 = smov 0   ;;  %s3333_s30 = smov 0  }
  0x11 LB: > { %4419 = sst [smem:[#allocation5_spill]] %s3177_s29  ;;  %s3348_s7 = sadd.s32 4294967295, %s3189_s30   ;;  %s3189_s30 = sphi %s3333_s30, %s4448_s30   ;;  %s3185_s6 = sphi %s3331_s6, %s4450_s6   ;;  %s3181_s2 = sphi %s3329_s2, %s4452_s2   ;;  %s3177_s29 = sphi %s3327_s29, %s4451_s29  }
  0x12   : > { %4420 = sst [smem:[#allocation6_spill]] %s3185_s6  ;;  %s2404_s3 = sadd.s32 4294967294, %s3189_s30  }
  0x13   : > { %4421 = sst [smem:[#allocation7_spill]] %s3189_s30  ;;  %s3352_s26 = sadd.s32 1, %s3189_s30  }
  0x14   : > { %4422 = sst [smem:[#allocation8_spill]] %s3352_s26  ;;  %s555_s1 = sadd.s32 1, %s3185_s6 }
  0x15   : > { %s552_s8 = ssub.s32 %s3189_s30, %s3352_s26  ;;  %p565_p0 = scmp.ne.s32.totalorder %s3185_s6, %s3181_s2 }
  0x16   : > { %p553_p1 = scmp.eq.s32.totalorder %s552_s8, 0  ;;  %p566_p2 = scmp.eq.s32.totalorder %s3348_s7, 1 }
  0x17   : > { %p571_p3 = scmp.ne.s32.totalorder %s3181_s2, %s3177_s29  ;;  %p572_p4 = scmp.eq.s32.totalorder %s2404_s3, 1 }
  0x18   : > { %s3363_s27 = scalar_select %p553_p1, %s3185_s6, %s555_s1  }
  0x19   : > { %p3365_p5 = por %p566_p2, %p565_p0  ;;  %p3369_p6 = por %p572_p4, %p571_p3 }
  0x1a   : > { %4423 = sst [smem:[#allocation9_spill]] %s3363_s27  ;;  %p2407_p7 = scmp.ge.s32.totalorder %s3189_s30, 1 }
  0x1b   : > { %s4424_s4 = scalar_select %p3365_p5, 1, 0 }
  0x1c   : > { %s4426_s28 = scalar_select %p3369_p6, 1, 0 }
  0x1d   : > { %4425 = sst [smem:[#allocation10_spill]] %s4424_s4  ;;  %p692_p8 = scmp.lt.s32.totalorder %s3189_s30, 3 }
  0x1e   : > { %4427 = sst [smem:[#allocation11_spill]] %s4426_s28 }
  0x1f   : > { %p693_p9 = pnand %p2407_p7, %p692_p8 }
  0x20   : > { %p762_p10 = scmp.lt.s32.totalorder (!%p693_p9), %s3348_s7, 1  ;;  %s4428_s1 = sld [smem:[#allocation13_spill]] (!%p693_p9)  ;;  %vm775_vm0 = vcmask (!%p693_p9), 1043456   ;;  %v3191_v7 = vmov (!%p693_p9), 0.0|0.0   ;;  %vm3192_vm1 = vmmov (!%p693_p9), 0   ;;  %v3193_v45 = vmov (!%p693_p9), 0.0  }
  0x21   : > { %696 = sbr.rel (%p693_p9) target bundleno = 3317 (0xcf5), region = 116  ;;  %s4429_s6 = sld [smem:[#allocation12_spill]] (!%p693_p9)  ;;  %2773 = vmatprep.subr.bf16.mxu0 (!%p693_p9), %v3191_v7  ;;  %2797 = vmatprep.subr.bf16.mxu1 (!%p693_p9), %v3191_v7  ;;  %vm1234_vm2 = vcmask (!%p693_p9), 523264   ;;  %vm1313_vm3 = vcmask (!%p693_p9), 27648   ;;  %vm1325_vm4 = vcmask (!%p693_p9), 31744  }
  0x22   : > { %s4430_s30 = sld [smem:[#allocation16_spill]] (!%p693_p9)  ;;  %2645 = vmatprep.mubr.msk.f32.mxu0 (!%p693_p9), %vm3192_vm1, %v3193_v45  ;;  %2680 = vmatprep.mubr.msk.f32.mxu1 (!%p693_p9), %vm3192_vm1, %v3193_v45  ;;  %s4436_s8 = sld [smem:[#allocation15_spill]] (!%p693_p9) }
  0x23   : > { %s4438_s4 = sld [smem:[#allocation17_spill]] (!%p693_p9)  ;;  %s3194_s28 = smov (!%p693_p9), 64  }
  0x24   : > { %s4439_s0 = sld [smem:[#allocation21_spill]] (!%p693_p9)  ;;  %s4440_s10 = sld [smem:[#allocation22_spill]] (!%p693_p9) }
  0x25   : > { %s4443_s29 = sld [smem:[#allocation24_spill]] (!%p693_p9) }
  0x26   : > { %v771_v0 = vld [vmem:[%s4428_s1] sm:$0xf] (!%p693_p9)  ;;  %s4432_s1 = sld [smem:[#allocation18_spill]] (!%p693_p9) }
  0x28   : > { %s3377_s9 = scalar_select %p762_p10, %s3348_s7, 1  ;;  %v804_v4 = vld [vmem:[%s4430_s30] sm:$0xff] }
  0x29   : > { %s4431_s24 = smov %s4430_s30  ;;  %s4434_s30 = sld [smem:[#allocation20_spill]] }
  0x2a   : > { %s2408_s5 = sshll.u32 %s3377_s9, 2  ;;  %v805_v5 = vld [vmem:[%s4431_s24 + $0x8] sm:$0xff]  ;;  %v806_v10 = vld [vmem:[%s4431_s24 + $0x10] sm:$0xff]  ;;  %v807_v11 = vld [vmem:[%s4431_s24 + $0x18] sm:$0xff] }
  0x2b   : > { %s765_s26 = scalar_lea.vmem %s4429_s6, %s2408_s5  ;;  %v2774_v8 = vpack.c.bf16 %v805_v5, %v804_v4  ;;  %v2777_v15 = vpack.c.bf16 %v807_v11, %v806_v10  ;;  %v808_v17 = vld [vmem:[%s4431_s24 + $0x20] sm:$0xff]  ;;  %v809_v18 = vld [vmem:[%s4431_s24 + $0x28] sm:$0xff]  ;;  %v810_v28 = vld [vmem:[%s4431_s24 + $0x30] sm:$0xff]  ;;  %s4433_s6 = sld [smem:[#allocation14_spill]] }
  0x2c   : > { %v770_v1 = vld [vmem:[%s765_s26] sm:$0xf]  ;;  %v822_v9 = vld [vmem:[%s4432_s1 + $0x8] sm:$0xff]  ;;  %v823_v13 = vld [vmem:[%s4432_s1 + $0x10] sm:$0xff]  ;;  %v2780_v21 = vpack.c.bf16 %v809_v18, %v808_v17  ;;  %s2409_s26 = sshll.u32 %s3377_s9, 1  ;;  %s4442_s9 = sld [smem:[#allocation23_spill]] }
  0x2d   : > { %v772_v2 = vadd.f32 %v771_v0, %v770_v1  ;;  %v821_v6 = vld [vmem:[%s4432_s1] sm:$0xff]  ;;  %v824_v14 = vld [vmem:[%s4432_s1 + $0x18] sm:$0xff]  ;;  %2775 = vmatpush3.bf16.msra.mxu0 %v2774_v8  ;;  %v826_v20 = vld [vmem:[%s4432_s1 + $0x28] sm:$0xff]  ;;  %s769_s27 = scalar_lea.vmem %s4392_s25, %s2409_s26 }
  0x2e   : > { %v2798_v12 = vpack.c.bf16 %v822_v9, %v821_v6  ;;  %2776 = vmatprep.subr.bf16.mxu0 %v3191_v7  ;;  %v2801_v16 = vpack.c.bf16 %v824_v14, %v823_v13  ;;  %v825_v19 = vld [vmem:[%s4432_s1 + $0x20] sm:$0xff]  ;;  %v811_v29 = vld [vmem:[%s4431_s24 + $0x38] sm:$0xff]  ;;  %v827_v31 = vld [vmem:[%s4432_s1 + $0x30] sm:$0xff] }
  0x2f   : > { %v776_v3 = vsel %vm775_vm0, %v772_v2, 0.0  ;;  %v2804_v22 = vpack.c.bf16 %v826_v20, %v825_v19  ;;  %v2783_v30 = vpack.c.bf16 %v811_v29, %v810_v28  ;;  %v828_v32 = vld [vmem:[%s4432_s1 + $0x38] sm:$0xff]  ;;  %v812_v34 = vld [vmem:[%s4431_s24 + $0x40] sm:$0xff]  ;;  %v813_v35 = vld [vmem:[%s4431_s24 + $0x48] sm:$0xff]  ;;  %s4435_s23 = smov %s4434_s30 }
  0x30   : > { %777 = vadd.xlane.f32.xlu0 %v776_v3  ;;  %2799 = vmatpush3.bf16.msra.mxu1 %v2798_v12  ;;  %v2807_v33 = vpack.c.bf16 %v828_v32, %v827_v31  ;;  %v2786_v36 = vpack.c.bf16 %v813_v35, %v812_v34  ;;  %v829_v37 = vld [vmem:[%s4432_s1 + $0x40] sm:$0xff]  ;;  %v830_v38 = vld [vmem:[%s4432_s1 + $0x48] sm:$0xff]  ;;  %v814_v40 = vld [vmem:[%s4431_s24 + $0x50] sm:$0xff] }
  0x31   : > { %2800 = vmatprep.subr.bf16.mxu1 %v3191_v7  ;;  %2778 = vmatpush3.bf16.msra.mxu0 %v2777_v15  ;;  %v2810_v39 = vpack.c.bf16 %v830_v38, %v829_v37  ;;  %v815_v41 = vld [vmem:[%s4431_s24 + $0x58] sm:$0xff]  ;;  %v831_v42 = vld [vmem:[%s4432_s1 + $0x50] sm:$0xff]  ;;  %v816_v47 = vld [vmem:[%s4431_s24 + $0x60] sm:$0xff] }
  0x32   : > { %2779 = vmatprep.subr.bf16.mxu0 %v3191_v7  ;;  %v2789_v43 = vpack.c.bf16 %v815_v41, %v814_v40  ;;  %v832_v44 = vld [vmem:[%s4432_s1 + $0x58] sm:$0xff]  ;;  %v817_v48 = vld [vmem:[%s4431_s24 + $0x68] sm:$0xff]  ;;  %v833_v49 = vld [vmem:[%s4432_s1 + $0x60] sm:$0xff] }
  0x33   : > { %v2813_v46 = vpack.c.bf16 %v832_v44, %v831_v42  ;;  %v834_v50 = vld [vmem:[%s4432_s1 + $0x68] sm:$0xff]  ;;  %v2792_v51 = vpack.c.bf16 %v817_v48, %v816_v47  ;;  %v818_v53 = vld [vmem:[%s4431_s24 + $0x70] sm:$0xff]  ;;  %v819_v54 = vld [vmem:[%s4431_s24 + $0x78] sm:$0xff] }
  0x34   : > { %2802 = vmatpush3.bf16.msra.mxu1 %v2801_v16  ;;  %v2816_v52 = vpack.c.bf16 %v834_v50, %v833_v49  ;;  %v835_v55 = vld [vmem:[%s4432_s1 + $0x70] sm:$0xff]  ;;  %v836_v56 = vld [vmem:[%s4432_s1 + $0x78] sm:$0xff]  ;;  %v2795_v57 = vpack.c.bf16 %v819_v54, %v818_v53  ;;  %v2410_v63 = vld [vmem:[%s4433_s6] ss:$0 sm:$0xff] }
  0x35   : > { %2803 = vmatprep.subr.bf16.mxu1 %v3191_v7  ;;  %2781 = vmatpush3.bf16.msra.mxu0 %v2780_v21  ;;  %v2819_v58 = vpack.c.bf16 %v836_v56, %v835_v55  ;;  %v838_v1 = vld [vmem:[%s4434_s30] sm:$0xff]  ;;  %v840_v8 = vld [vmem:[%s4435_s23 + $0x10] sm:$0xff]  ;;  %v841_v9 = vld [vmem:[%s4435_s23 + $0x18] sm:$0xff]  ;;  %s4437_s30 = sld [smem:[#allocation19_spill]] }
  0x36   : > { %2782 = vmatprep.subr.bf16.mxu0 %v3191_v7  ;;  %v2411_v3 = vld [vmem:[%s4436_s8] ss:$0 sm:$0xff]  ;;  %v2825_v10 = vpack.c.bf16 %v841_v9, %v840_v8  ;;  %v843_v12 = vld [vmem:[%s4435_s23 + $0x28] sm:$0xff]  ;;  %v844_v14 = vld [vmem:[%s4435_s23 + $0x30] sm:$0xff] }
  0x37   : > { %v842_v11 = vld [vmem:[%s4435_s23 + $0x20] sm:$0xff]  ;;  %v845_v15 = vld [vmem:[%s4435_s23 + $0x38] sm:$0xff]  ;;  %v847_v18 = vld [vmem:[%s4435_s23 + $0x48] sm:$0xff] }
  0x38   : > { %2805 = vmatpush3.bf16.msra.mxu1 %v2804_v22  ;;  %v2828_v13 = vpack.c.bf16 %v843_v12, %v842_v11  ;;  %v2831_v16 = vpack.c.bf16 %v845_v15, %v844_v14  ;;  %v846_v17 = vld [vmem:[%s4435_s23 + $0x40] sm:$0xff]  ;;  %v848_v20 = vld [vmem:[%s4435_s23 + $0x50] sm:$0xff]  ;;  %v849_v21 = vld [vmem:[%s4435_s23 + $0x58] sm:$0xff] }
  0x39   : > { %2806 = vmatprep.subr.bf16.mxu1 %v3191_v7  ;;  %2784 = vmatpush3.bf16.msra.mxu0 %v2783_v30  ;;  %v2834_v19 = vpack.c.bf16 %v847_v18, %v846_v17  ;;  %v2837_v22 = vpack.c.bf16 %v849_v21, %v848_v20  ;;  %v2412_v32 = vld [vmem:[%s4438_s4] ss:$0 sm:$0xff]  ;;  %v856_v8 = vld [vmem:[%s4440_s10 + $0x8] sm:$0xff]  ;;  %v857_v9 = vld [vmem:[%s4440_s10 + $0x10] sm:$0xff]  ;;  %s754_s4 = sand.u32 1, %s3181_s2  }
  0x3a   : > { %2785 = vmatprep.subr.bf16.mxu0 %v3191_v7  ;;  %v2414_v37 = vld [vmem:[%s4439_s0] ss:$0 sm:$0xff]  ;;  %v858_v11 = vld [vmem:[%s4440_s10 + $0x18] sm:$0xff]  ;;  %v860_v14 = vld [vmem:[%s4440_s10 + $0x28] sm:$0xff]  ;;  %s2429_s0 = sshll.u32 %s3348_s7, 4  ;;  %s755_s3 = scalar_lea.vmem [#allocation2], %s754_s4 }
  0x3b   : > { %v2413_v29 = vld [vmem:[%s4437_s30] ss:$0 sm:$0xff]  ;;  %v2849_v12 = vpack.c.bf16 %v858_v11, %v857_v9  ;;  %v862_v17 = vld [vmem:[%s4440_s10 + $0x38] sm:$0xff]  ;;  %v864_v20 = vld [vmem:[%s4440_s10 + $0x48] sm:$0xff]  ;;  %s4325_s30 = scalar_lea.hbm %s4443_s29, %s2429_s0  ;;  %s3196_s7 = smov [#allocation2]  }
  0x3c   : > { %2808 = vmatpush3.bf16.msra.mxu1 %v2807_v33  ;;  %v890_v9 = vld [vmem:[%s4381_s14 + $0x80] sm:$0xff]  ;;  %s3131_s8 = sshll.u32 %s3196_s7, 4  ;;  %s3132_s8 = int_to_ptr.vmem [resolvable:$false] %s3131_s8 }
  0x3d   : > { %2809 = vmatprep.subr.bf16.mxu1 %v3191_v7  ;;  %2787 = vmatpush3.bf16.msra.mxu0 %v2786_v36  ;;  %v894_v11 = vld [vmem:[%s4381_s14 + $0xa0] sm:$0xff] }
  0x3e   : > { %2788 = vmatprep.subr.bf16.mxu0 %v3191_v7 }
  0x40   : > { %2811 = vmatpush3.bf16.msra.mxu1 %v2810_v39 }
  0x41   : > { %2812 = vmatprep.subr.bf16.mxu1 %v3191_v7  ;;  %2790 = vmatpush3.bf16.msra.mxu0 %v2789_v43 }
  0x42   : > { %2791 = vmatprep.subr.bf16.mxu0 %v3191_v7 }
  0x44   : > { %2814 = vmatpush3.bf16.msra.mxu1 %v2813_v46 }
  0x45   : > { %2815 = vmatprep.subr.bf16.mxu1 %v3191_v7  ;;  %2793 = vmatpush3.bf16.msra.mxu0 %v2792_v51 }
  0x46   : > { %2794 = vmatprep.subr.bf16.mxu0 %v3191_v7 }
  0x48   : > { %2817 = vmatpush3.bf16.msra.mxu1 %v2816_v52 }
  0x49   : > { %2818 = vmatprep.subr.bf16.mxu1 %v3191_v7  ;;  %2796 = vmatpush3.bf16.msra.mxu0 %v2795_v57 }
  0x4a   : > { %2821 = vmatprep.subr.bf16.mxu0 %v3191_v7 }
  0x4c   : > { %2820 = vmatpush3.bf16.msra.mxu1 %v2819_v58 }
  0x4d   : > { %2728 = vmatprep.subr.mxu1 %v3193_v45 }
  0xbd   : > { %v778_v23 = vpop.xlane.xlu0 %777 }
  0xbe   : > { %v780_v24 = vmul.f32 0.0078125, %v778_v23  ;;  %v850_v23 = vld [vmem:[%s4435_s23 + $0x60] sm:$0xff] }
  0xc0   : > { %v3431_v25 = vsub.f32 %v772_v2, %v780_v24  ;;  %v839_v2 = vld [vmem:[%s4435_s23 + $0x8] sm:$0xff] }
  0xc1   : > { %v2822_v5 = vpack.c.bf16 %v839_v2, %v838_v1  ;;  %v851_v24 = vld [vmem:[%s4435_s23 + $0x68] sm:$0xff] }
  0xc2   : > { %v782_v26 = vmul.f32 %v3431_v25, %v3431_v25 }
  0xc4   : > { %v783_v27 = vsel %vm775_vm0, %v782_v26, 0.0  ;;  %v852_v26 = vld [vmem:[%s4435_s23 + $0x70] sm:$0xff] }
  0xc5   : > { %784 = vadd.xlane.f32.xlu0 %v783_v27  ;;  %v853_v27 = vld [vmem:[%s4435_s23 + $0x78] sm:$0xff] }
  0xc6   : > { %v2843_v28 = vpack.c.bf16 %v853_v27, %v852_v26  ;;  %v868_v26 = vld [vmem:[%s4440_s10 + $0x68] sm:$0xff] }
 0x152   : > { %v785_v59 = vpop.xlane.xlu0 %784 }
 0x153   : > { %v786_v60 = vmul.f32 0.0078125, %v785_v59 }
 0x155   : > { %v787_v61 = vadd.f32 1e-12, %v786_v60 }
 0x157   : > { %3105 = vrsqrt.f32 %v787_v61 }
 0x161   : > { %v3106_v62 = vpop.eup %3105 }
 0x162   : > { %v789_v0 = vmul.f32 %v3106_v62, %v3431_v25  ;;  %v2840_v25 = vpack.c.bf16 %v851_v24, %v850_v23  ;;  %v866_v23 = vld [vmem:[%s4440_s10 + $0x58] sm:$0xff] }
 0x164   : > { %v796_v4 = vmul.f32 %v2410_v63, %v789_v0 }
 0x166   : > { %v3523_v6 = vadd.f32 %v2411_v3, %v796_v4 }
 0x168   : > { %2646 = vmatmul.mubr.f32.vlgmr.msra.gmra.mrb[0].mxu0 %v3523_v6  ;;  %2681 = vmatmul.mubr.f32.vlgmr.msra.gmra.mrb[0].mxu1 %v3523_v6 }
 0x169   : > { %2823 = vmatpush3.bf16.msra.mxu0 %v2822_v5  ;;  %2715 = vmatprep.mubr.msk.f32.mxu0 %vm3192_vm1, %v3193_v45  ;;  %v855_v5 = vld [vmem:[%s4440_s10] sm:$0xff] }
 0x16a   : > { %2824 = vmatprep.subr.bf16.mxu0 %v3191_v7  ;;  %2730 = vmatprep.mubr.msk.f32.mxu1 %vm3192_vm1, %v3193_v45 }
 0x16d   : > { %2826 = vmatpush3.bf16.msra.mxu0 %v2825_v10  ;;  %v2846_v10 = vpack.c.bf16 %v856_v8, %v855_v5  ;;  %v893_v5 = vld [vmem:[%s4381_s14 + $0x98] sm:$0xff] }
 0x16e   : > { %2827 = vmatprep.subr.bf16.mxu0 %v3191_v7  ;;  %v897_v8 = vld [vmem:[%s4381_s14 + $0xb8] sm:$0xff] }
 0x171   : > { %2829 = vmatpush3.bf16.msra.mxu0 %v2828_v13  ;;  %v859_v13 = vld [vmem:[%s4440_s10 + $0x20] sm:$0xff] }
 0x172   : > { %2830 = vmatprep.subr.bf16.mxu0 %v3191_v7  ;;  %v2852_v15 = vpack.c.bf16 %v860_v14, %v859_v13  ;;  %v896_v13 = vld [vmem:[%s4381_s14 + $0xb0] sm:$0xff]  ;;  %v2879_v14 = vpack.c.bf16 %v894_v11, %v890_v9  ;;  %v930_v11 = vld [vmem:[%s4381_s14 + $0x1c0] sm:$0xff] }
 0x175   : > { %2832 = vmatpush3.bf16.msra.mxu0 %v2831_v16  ;;  %v861_v16 = vld [vmem:[%s4440_s10 + $0x30] sm:$0xff] }
 0x176   : > { %2833 = vmatprep.subr.bf16.mxu0 %v3191_v7  ;;  %v2855_v18 = vpack.c.bf16 %v862_v17, %v861_v16 }
 0x179   : > { %2835 = vmatpush3.bf16.msra.mxu0 %v2834_v19  ;;  %v863_v19 = vld [vmem:[%s4440_s10 + $0x40] sm:$0xff] }
 0x17a   : > { %2836 = vmatprep.subr.bf16.mxu0 %v3191_v7  ;;  %v2858_v21 = vpack.c.bf16 %v864_v20, %v863_v19 }
 0x17d   : > { %2838 = vmatpush3.bf16.msra.mxu0 %v2837_v22  ;;  %v865_v22 = vld [vmem:[%s4440_s10 + $0x50] sm:$0xff] }
 0x17e   : > { %2839 = vmatprep.subr.bf16.mxu0 %v3191_v7  ;;  %v2861_v24 = vpack.c.bf16 %v866_v23, %v865_v22  ;;  %v903_v22 = vld [vmem:[%s4381_s14 + $0xe8] sm:$0xff]  ;;  %v901_v23 = vld [vmem:[%s4381_s14 + $0xd8] sm:$0xff] }
 0x181   : > { %2841 = vmatpush3.bf16.msra.mxu0 %v2840_v25  ;;  %v867_v25 = vld [vmem:[%s4440_s10 + $0x60] sm:$0xff] }
 0x182   : > { %2842 = vmatprep.subr.bf16.mxu0 %v3191_v7  ;;  %v2864_v27 = vpack.c.bf16 %v868_v26, %v867_v25  ;;  %v905_v25 = vld [vmem:[%s4381_s14 + $0xf8] sm:$0xff]  ;;  %v898_v26 = vld [vmem:[%s4381_s14 + $0xc0] sm:$0xff] }
 0x185   : > { %2844 = vmatpush3.bf16.msra.mxu0 %v2843_v28  ;;  %v869_v28 = vld [vmem:[%s4440_s10 + $0x70] sm:$0xff] }
 0x186   : > { %2718 = vmatprep.subr.mxu0 %v3193_v45 }
 0x188   : > { %2716 = vmatmul.mubr.f32.vlgmr.msra.gmra.mrb[2].mxu0 %v3523_v6 }
 0x189   : > { %2720 = vmatprep.mubr.msk.f32.mxu0 %vm3192_vm1, %v3193_v45 }
 0x23b   : > { %v1078_v30 = vpop.f32.mrb[0].mxu0  ;;  %v1154_v31 = vpop.f32.mrb[0].mxu1 }
 0x23c   : > { %v1155_v33 = vadd.f32 %v2413_v29, %v1154_v31  ;;  %v2647_v34 = vpop.f32.mrb[1].mxu0  ;;  %v2682_v35 = vpop.f32.mrb[1].mxu1  ;;  %v1079_v36 = vadd.f32 %v2412_v32, %v1078_v30  ;;  %v870_v29 = vld [vmem:[%s4440_s10 + $0x78] sm:$0xff]  ;;  %s4444_s10 = smov %s4443_s29 }
 0x23d   : > { %v2867_v30 = vpack.c.bf16 %v870_v29, %v869_v28  ;;  %v2913_v28 = vpack.c.bf16 %v905_v25, %v901_v23  ;;  %v988_v23 = vld [vmem:[%s4383_s16 + $0x188] sm:$0xff] }
 0x23e   : > { %1404 = vrot.lane.b32.xlu1 %v1155_v33, %s3194_s28  ;;  %2719 = vmatpush3.xpose.msk.msra.mxu0 %vm1234_vm2, %v1155_v33 }
 0x23f   : > { %2723 = vmatprep.subr.mxu0 %v3193_v45 }
 0x241   : > { %2721 = vmatmul.mubr.msk.f32.vlgmr.msra.gmra.mrb[4].mxu0 %vm1234_vm2, %v1079_v36 }
 0x242   : > { %1402 = vrot.lane.b32.xlu1 %v1079_v36, %s3194_s28  ;;  %2725 = vmatprep.mubr.msk.f32.mxu0 %vm3192_vm1, %v3193_v45 }
 0x25b   : > { %v1230_v38 = vpop.f32.mrb[2].mxu0 }
 0x25c   : > { %v1231_v39 = vadd.f32 %v2414_v37, %v1230_v38  ;;  %v2717_v40 = vpop.f32.mrb[3].mxu0  ;;  %v2423_v37 = vld [vmem:[%s4378_s11] ss:$0 sm:$0xff] }
 0x25e   : > { %2724 = vmatpush3.msk.msra.mxu0 %vm775_vm0, %v1231_v39 }
 0x2b0   : > { %v1405_v41 = vpop.permute.xlu1 %1404 }
 0x2b1   : > { %2729 = vmatpush3.xpose.msk.msra.mxu1 %vm1234_vm2, %v1405_v41 }
 0x2b2   : > { %2733 = vmatprep.subr.mxu1 %v3193_v45 }
 0x2b4   : > { %v1403_v42 = vpop.permute.xlu1 %1402 }
 0x2b5   : > { %2731 = vmatmul.mubr.msk.f32.vlgmr.msra.gmra.mrb[2].mxu1 %vm1234_vm2, %v1403_v42  ;;  %v875_v42 = vld [vmem:[%s4381_s14 + $0x8] sm:$0xff] }
 0x2b6   : > { %2735 = vmatprep.mubr.msk.f32.mxu1 %vm3192_vm1, %v3193_v45 }
 0x314   : > { %v1307_v43 = vpop.f32.mrb[4].mxu0 }
 0x315   : > { %v1311_v44 = vmul.f32 0.125, %v1307_v43  ;;  %v2722_v46 = vpop.f32.mrb[5].mxu0  ;;  %v879_v43 = vld [vmem:[%s4381_s14 + $0x28] sm:$0xff] }
 0x316   : > { %v2869_v46 = vpack.c.bf16 %v879_v43, %v875_v42  ;;  %v912_v42 = vld [vmem:[%s4381_s14 + $0x130] sm:$0xff]  ;;  %v915_v43 = vld [vmem:[%s4381_s14 + $0x148] sm:$0xff] }
 0x317   : > { %v1314_v47 = vsel %vm1313_vm3, %v1311_v44, -inf }
 0x318   : > { %1315 = vmax.xlane.f32.xlu1 %v1314_v47  ;;  %v874_v47 = vld [vmem:[%s4381_s14] sm:$0xff]  ;;  %2870 = vmatprep.subr.bf16.mxu0 %v2869_v46  ;;  %v919_v46 = vld [vmem:[%s4381_s14 + $0x168] sm:$0xff] }
 0x388   : > { %v1476_v48 = vpop.f32.mrb[2].mxu1 }
 0x389   : > { %v1480_v49 = vmul.f32 0.125, %v1476_v48  ;;  %v2732_v50 = vpop.f32.mrb[3].mxu1  ;;  %v878_v48 = vld [vmem:[%s4381_s14 + $0x20] sm:$0xff] }
 0x38a   : > { %v2871_v50 = vpack.c.bf16 %v878_v48, %v874_v47  ;;  %v921_v47 = vld [vmem:[%s4381_s14 + $0x178] sm:$0xff]  ;;  %v2889_v48 = vpack.c.bf16 %v919_v46, %v915_v43  ;;  %v941_v43 = vld [vmem:[%s4383_s16 + $0x10] sm:$0xff] }
 0x38b   : > { %v1482_v51 = vsel %vm1313_vm3, %v1480_v49, -inf }
 0x38c   : > { %1483 = vmax.xlane.f32.xlu0 %v1482_v51  ;;  %v876_v51 = vld [vmem:[%s4381_s14 + $0x10] sm:$0xff] }
 0x3a5   : > { %v1316_v57 = vpop.xlane.xlu1 %1315 }
 0x3a6   : > { %v1317_v58 = vsub.f32 %v1311_v44, %v1316_v57  ;;  %v877_v44 = vld [vmem:[%s4381_s14 + $0x18] sm:$0xff] }
 0x3a7   : > { %v889_v57 = vld [vmem:[%s4381_s14 + $0x78] sm:$0xff] }
 0x3a8   : > { %v1318_v59 = vmul.f32 1.442695, %v1317_v58 }
 0x419   : > { %v1484_v52 = vpop.xlane.xlu0 %1483 }
 0x41a   : > { %v1485_v53 = vsub.f32 %v1480_v49, %v1484_v52  ;;  %v880_v52 = vld [vmem:[%s4381_s14 + $0x30] sm:$0xff] }
 0x41c   : > { %v1486_v54 = vmul.f32 1.442695, %v1485_v53  ;;  %v883_v53 = vld [vmem:[%s4381_s14 + $0x48] sm:$0xff] }
 0x41e   : > { %3107 = vpow2.f32 %v1486_v54  ;;  %v2903_v54 = vpack.c.bf16 %v880_v52, %v876_v51  ;;  %v918_v51 = vld [vmem:[%s4381_s14 + $0x160] sm:$0xff]  ;;  %v916_v52 = vld [vmem:[%s4381_s14 + $0x150] sm:$0xff] }
 0x41f   : > { %3109 = vpow2.f32 %v1318_v59 }
 0x428   : > { %v3108_v55 = vpop.eup %3107 }
 0x429   : > { %v1488_v56 = vsel %vm1313_vm3, %v3108_v55, 0.0  ;;  %v3110_v60 = vpop.eup %3109 }
 0x42a   : > { %1489 = vadd.xlane.f32.xlu0 %v1488_v56  ;;  %v1320_v61 = vsel %vm1313_vm3, %v3110_v60, 0.0  ;;  %v885_v56 = vld [vmem:[%s4381_s14 + $0x58] sm:$0xff] }
 0x42b   : > { %v2905_v59 = vpack.c.bf16 %v889_v57, %v885_v56  ;;  %v927_v56 = vld [vmem:[%s4381_s14 + $0x1a8] sm:$0xff] }
 0x440   : > { %1493 = vrot.lane.b32.xlu0 %v1231_v39, %s3194_s28 }
 0x45f   : > { %1321 = vadd.xlane.f32.xlu0 %v1320_v61  ;;  %v886_v61 = vld [vmem:[%s4381_s14 + $0x60] sm:$0xff] }
 0x4b7   : > { %v1490_v62 = vpop.xlane.xlu0 %1489 }
 0x4b8   : > { %3111 = vrcp.f32 %v1490_v62  ;;  %v884_v62 = vld [vmem:[%s4381_s14 + $0x50] sm:$0xff] }
 0x4bb   : > { %v1494_v63 = vpop.permute.xlu0 %1493 }
 0x4bc   : > { %2734 = vmatpush3.msk.msra.mxu1 %vm775_vm0, %v1494_v63 }
 0x4bd   : > { %2845 = vmatprep.subr.bf16.mxu1 %v3191_v7 }
 0x4c2   : > { %v3112_v0 = vpop.eup %3111 }
 0x4c3   : > { %v1492_v1 = vmul.f32 %v3112_v0, %v3108_v55  ;;  %v887_v55 = vld [vmem:[%s4381_s14 + $0x68] sm:$0xff]  ;;  %v888_v0 = vld [vmem:[%s4381_s14 + $0x70] sm:$0xff] }
 0x4c4   : > { %v2873_v58 = vpack.c.bf16 %v887_v55, %v883_v53  ;;  %v923_v55 = vld [vmem:[%s4381_s14 + $0x188] sm:$0xff] }
 0x4c5   : > { %2736 = vmatmul.mubr.msk.f32.vlgmr.msra.gmra.mrb[4].mxu1 %vm1325_vm4, %v1492_v1  ;;  %v891_v1 = vld [vmem:[%s4381_s14 + $0x88] sm:$0xff] }
 0x4c6   : > { %2770 = vmatprep.mubr.msk.f32.mxu1 %vm3192_vm1, %v3193_v45  ;;  %2847 = vmatpush3.bf16.msra.mxu1 %v2846_v10  ;;  %v2909_v10 = vpack.c.bf16 %v897_v8, %v893_v5  ;;  %v933_v5 = vld [vmem:[%s4381_s14 + $0x1d8] sm:$0xff] }
 0x4c7   : > { %2848 = vmatprep.subr.bf16.mxu1 %v3191_v7 }
 0x4ca   : > { %2850 = vmatpush3.bf16.msra.mxu1 %v2849_v12  ;;  %v892_v12 = vld [vmem:[%s4381_s14 + $0x90] sm:$0xff] }
 0x4cb   : > { %2851 = vmatprep.subr.bf16.mxu1 %v3191_v7 }
 0x4ce   : > { %2853 = vmatpush3.bf16.msra.mxu1 %v2852_v15  ;;  %v2911_v15 = vpack.c.bf16 %v896_v13, %v892_v12  ;;  %v934_v12 = vld [vmem:[%s4381_s14 + $0x1e0] sm:$0xff] }
 0x4cf   : > { %2854 = vmatprep.subr.bf16.mxu1 %v3191_v7 }
 0x4d2   : > { %2856 = vmatpush3.bf16.msra.mxu1 %v2855_v18 }
 0x4d3   : > { %2857 = vmatprep.subr.bf16.mxu1 %v3191_v7 }
 0x4d6   : > { %2859 = vmatpush3.bf16.msra.mxu1 %v2858_v21  ;;  %v899_v21 = vld [vmem:[%s4381_s14 + $0xc8] sm:$0xff] }
 0x4d7   : > { %2860 = vmatprep.subr.bf16.mxu1 %v3191_v7 }
 0x4da   : > { %2862 = vmatpush3.bf16.msra.mxu1 %v2861_v24  ;;  %v2881_v24 = vpack.c.bf16 %v903_v22, %v899_v21  ;;  %v987_v21 = vld [vmem:[%s4383_s16 + $0x180] sm:$0xff] }
 0x4db   : > { %2863 = vmatprep.subr.bf16.mxu1 %v3191_v7 }
 0x4de   : > { %2865 = vmatpush3.bf16.msra.mxu1 %v2864_v27  ;;  %v902_v27 = vld [vmem:[%s4381_s14 + $0xe0] sm:$0xff] }
 0x4df   : > { %2866 = vmatprep.subr.bf16.mxu1 %v3191_v7  ;;  %v2883_v29 = vpack.c.bf16 %v902_v27, %v898_v26 }
 0x4e2   : > { %2868 = vmatpush3.bf16.msra.mxu1 %v2867_v30  ;;  %v900_v30 = vld [vmem:[%s4381_s14 + $0xd0] sm:$0xff] }
 0x4ec   : > { %v1322_v2 = vpop.xlane.xlu0 %1321 }
 0x4ed   : > { %3113 = vrcp.f32 %v1322_v2  ;;  %v895_v2 = vld [vmem:[%s4381_s14 + $0xa8] sm:$0xff] }
 0x4f7   : > { %v3114_v3 = vpop.eup %3113 }
 0x4f8   : > { %v1324_v4 = vmul.f32 %v3114_v3, %v3110_v60  ;;  %v882_v60 = vld [vmem:[%s4381_s14 + $0x40] sm:$0xff]  ;;  %v2907_v3 = vpack.c.bf16 %v888_v0, %v884_v62  ;;  %v924_v0 = vld [vmem:[%s4381_s14 + $0x190] sm:$0xff] }
 0x4f9   : > { %v2875_v63 = vpack.c.bf16 %v886_v61, %v882_v60  ;;  %v929_v60 = vld [vmem:[%s4381_s14 + $0x1b8] sm:$0xff]  ;;  %v922_v61 = vld [vmem:[%s4381_s14 + $0x180] sm:$0xff] }
 0x4fa   : > { %2726 = vmatmul.mubr.msk.f32.vlgmr.msra.gmra.mrb[6].mxu0 %vm1325_vm4, %v1324_v4  ;;  %v2877_v4 = vpack.c.bf16 %v895_v2, %v891_v1  ;;  %v928_v1 = vld [vmem:[%s4381_s14 + $0x1b0] sm:$0xff] }
 0x4fb   : > { %1764 = vmatprep.mubr.f32.mxu0 %v3193_v45  ;;  %2872 = vmatpush1.bf16.msra.mxu0 %v2871_v50  ;;  %v914_v50 = vld [vmem:[%s4381_s14 + $0x140] sm:$0xff]  ;;  %v2927_v8 = vpack.c.bf16 %v928_v1, %v924_v0  ;;  %v993_v0 = vld [vmem:[%s4383_s16 + $0x1b0] sm:$0xff] }
 0x4fc   : > { %2874 = vmatprep.subr.bf16.mxu0 %v2873_v58  ;;  %v2891_v53 = vpack.c.bf16 %v918_v51, %v914_v50  ;;  %v2893_v58 = vpack.c.bf16 %v927_v56, %v923_v55  ;;  %v959_v50 = vld [vmem:[%s4383_s16 + $0xa0] sm:$0xff]  ;;  %v960_v51 = vld [vmem:[%s4383_s16 + $0xa8] sm:$0xff] }
 0x4fd   : > { %v943_v55 = vld [vmem:[%s4383_s16 + $0x20] sm:$0xff]  ;;  %v944_v56 = vld [vmem:[%s4383_s16 + $0x28] sm:$0xff] }
 0x4ff   : > { %2876 = vmatpush1.bf16.msra.mxu0 %v2875_v63  ;;  %v926_v63 = vld [vmem:[%s4381_s14 + $0x1a0] sm:$0xff] }
 0x500   : > { %2878 = vmatprep.subr.bf16.mxu0 %v2877_v4  ;;  %v2895_v2 = vpack.c.bf16 %v926_v63, %v922_v61  ;;  %v935_v4 = vld [vmem:[%s4381_s14 + $0x1e8] sm:$0xff]  ;;  %v962_v63 = vld [vmem:[%s4383_s16 + $0xb8] sm:$0xff] }
 0x503   : > { %2880 = vmatpush1.bf16.msra.mxu0 %v2879_v14  ;;  %v932_v14 = vld [vmem:[%s4381_s14 + $0x1d0] sm:$0xff] }
 0x504   : > { %2882 = vmatprep.subr.bf16.mxu0 %v2881_v24  ;;  %v2965_v24 = vpack.c.bf16 %v988_v23, %v987_v21  ;;  %v979_v21 = vld [vmem:[%s4383_s16 + $0x140] sm:$0xff]  ;;  %v980_v23 = vld [vmem:[%s4383_s16 + $0x148] sm:$0xff] }
 0x507   : > { %2884 = vmatpush1.bf16.msra.mxu0 %v2883_v29  ;;  %v2424_v29 = vld [vmem:[%s4379_s12] ss:$0 sm:$0xff] }
 0x598   : > { %v1566_v31 = vpop.f32.mrb[4].mxu1 }
 0x599   : > { %v2737_v32 = vpop.f32.mrb[5].mxu1  ;;  %1571 = vrot.lane.b32.xlu1 %v1566_v31, %s3194_s28  ;;  %v904_v31 = vld [vmem:[%s4381_s14 + $0xf0] sm:$0xff]  ;;  %s2322_s28 = sshll.u32 %s755_s3, 4  ;;  %s4327_s28 = int_to_ptr.vmem [resolvable:$true] %s2322_s28 }
 0x59a   : > { %v2915_v32 = vpack.c.bf16 %v904_v31, %v900_v30  ;;  %v939_v30 = vld [vmem:[%s4383_s16] sm:$0xff]  ;;  %s3127_s5 = scalar_lea.vmem %s4327_s28, 16  ;;  %p3134_p0 = scmp.lt.s32.totalorder %s4327_s28, %s3132_s8 }
 0x59b   : > { %p3128_p11 = scmp.ne.s32.totalorder %s4327_s28, %s3127_s5 }
 0x59d   : > { %p3129_p12 = pnand %p3128_p11, %p3365_p5 }
 0x59f   : > { %p3130_p13 = pneg %p3129_p12 }
 0x5cd   : > { %v1398_v33 = vpop.f32.mrb[6].mxu0 }
 0x5ce   : > { %v2727_v34 = vpop.f32.mrb[7].mxu0 }
 0x5cf   : > { %v911_v34 = vld [vmem:[%s4381_s14 + $0x128] sm:$0xff] }
 0x60b   : > { %v1572_v35 = vpop.permute.xlu1 %1571 }
 0x60c   : > { %v1574_v36 = vsel %vm1234_vm2, %v1398_v33, %v1572_v35  ;;  %v907_v33 = vld [vmem:[%s4381_s14 + $0x108] sm:$0xff]  ;;  %v909_v35 = vld [vmem:[%s4381_s14 + $0x118] sm:$0xff] }
 0x60d   : > { %2771 = vmatmul.mubr.f32.vlgmr.msra.gmra.mrb[6].mxu1 %v1574_v36  ;;  %v2885_v36 = vpack.c.bf16 %v911_v34, %v907_v33  ;;  %v971_v33 = vld [vmem:[%s4383_s16 + $0x100] sm:$0xff]  ;;  %v972_v34 = vld [vmem:[%s4383_s16 + $0x108] sm:$0xff] }
 0x60e   : > { %1835 = vmatprep.mubr.f32.mxu1 %v3193_v45 }
 0x60f   : > { %2886 = vmatprep.subr.bf16.mxu0 %v2885_v36 }
 0x6e0   : > { %v1647_v38 = vpop.f32.mrb[6].mxu1 }
 0x6e1   : > { %v1648_v39 = vadd.f32 %v2423_v37, %v1647_v38  ;;  %v2772_v7 = vpop.f32.mrb[7].mxu1  ;;  %v913_v37 = vld [vmem:[%s4381_s14 + $0x138] sm:$0xff]  ;;  %v906_v38 = vld [vmem:[%s4381_s14 + $0x100] sm:$0xff] }
 0x6e2   : > { %v2917_v7 = vpack.c.bf16 %v913_v37, %v909_v35  ;;  %v2425_v35 = vld [vmem:[%s4380_s13] ss:$0 sm:$0xff] }
 0x6e3   : > { %v1651_v40 = vadd.f32 %v1648_v39, %v3523_v6  ;;  %v881_v6 = vld [vmem:[%s4381_s14 + $0x38] sm:$0xff]  ;;  %v910_v39 = vld [vmem:[%s4381_s14 + $0x120] sm:$0xff] }
 0x6e4   : > { %v2901_v49 = vpack.c.bf16 %v881_v6, %v877_v44  ;;  %v917_v6 = vld [vmem:[%s4381_s14 + $0x158] sm:$0xff] }
 0x6e5   : > { %v1652_v41 = vsel %vm775_vm0, %v1651_v40, 0.0 }
 0x6e6   : > { %1653 = vadd.xlane.f32.xlu1 %v1652_v41  ;;  %2902 = vmatprep.subr.bf16.mxu1 %v2901_v49  ;;  %v908_v41 = vld [vmem:[%s4381_s14 + $0x110] sm:$0xff]  ;;  %v2921_v49 = vpack.c.bf16 %v921_v47, %v917_v6 }
 0x6e7   : > { %2904 = vmatpush1.bf16.msra.mxu1 %v2903_v54  ;;  %v2919_v44 = vpack.c.bf16 %v912_v42, %v908_v41  ;;  %v920_v54 = vld [vmem:[%s4381_s14 + $0x170] sm:$0xff]  ;;  %v990_v42 = vld [vmem:[%s4383_s16 + $0x198] sm:$0xff] }
 0x6e8   : > { %2906 = vmatprep.subr.bf16.mxu1 %v2905_v59  ;;  %v2923_v57 = vpack.c.bf16 %v920_v54, %v916_v52  ;;  %v925_v59 = vld [vmem:[%s4381_s14 + $0x198] sm:$0xff]  ;;  %v973_v47 = vld [vmem:[%s4383_s16 + $0x110] sm:$0xff]  ;;  %v991_v52 = vld [vmem:[%s4383_s16 + $0x1a0] sm:$0xff] }
 0x6e9   : > { %v2925_v62 = vpack.c.bf16 %v929_v60, %v925_v59  ;;  %v992_v54 = vld [vmem:[%s4383_s16 + $0x1a8] sm:$0xff]  ;;  %v975_v59 = vld [vmem:[%s4383_s16 + $0x120] sm:$0xff] }
 0x6ea   : > { %v976_v60 = vld [vmem:[%s4383_s16 + $0x128] sm:$0xff] }
 0x6eb   : > { %2908 = vmatpush1.bf16.msra.mxu1 %v2907_v3  ;;  %v931_v3 = vld [vmem:[%s4381_s14 + $0x1c8] sm:$0xff]  ;;  %v2975_v61 = vpack.c.bf16 %v976_v60, %v975_v59  ;;  %v1680_v60 = vlaneseq }
 0x6ec   : > { %2910 = vmatprep.subr.bf16.mxu1 %v2909_v10  ;;  %v2897_v9 = vpack.c.bf16 %v935_v4, %v931_v3  ;;  %v937_v10 = vld [vmem:[%s4381_s14 + $0x1f8] sm:$0xff]  ;;  %v945_v3 = vld [vmem:[%s4383_s16 + $0x30] sm:$0xff] }
 0x6ed   : > { %v2929_v13 = vpack.c.bf16 %v937_v10, %v933_v5  ;;  %v946_v4 = vld [vmem:[%s4383_s16 + $0x38] sm:$0xff]  ;;  %vm2196_vm5 = vcmp.lt.s32.totalorder %v1680_v60, 256 }
 0x6ee   : > { %v978_v10 = vld [vmem:[%s4383_s16 + $0x138] sm:$0xff] }
 0x6ef   : > { %2912 = vmatpush1.bf16.msra.mxu1 %v2911_v15  ;;  %v936_v15 = vld [vmem:[%s4381_s14 + $0x1f0] sm:$0xff] }
 0x6f0   : > { %2914 = vmatprep.subr.bf16.mxu1 %v2913_v28 }
 0x6f3   : > { %2916 = vmatpush1.bf16.msra.mxu1 %v2915_v32  ;;  %v940_v32 = vld [vmem:[%s4383_s16 + $0x8] sm:$0xff] }
 0x6f4   : > { %2918 = vmatprep.subr.bf16.mxu1 %v2917_v7  ;;  %v2935_v37 = vpack.c.bf16 %v940_v32, %v939_v30  ;;  %v958_v7 = vld [vmem:[%s4383_s16 + $0x98] sm:$0xff]  ;;  %v949_v30 = vld [vmem:[%s4383_s16 + $0x50] sm:$0xff] }
 0x6f5   : > { %v950_v32 = vld [vmem:[%s4383_s16 + $0x58] sm:$0xff] }
 0x6f7   : > { %2920 = vmatpush1.bf16.msra.mxu1 %v2919_v44  ;;  %v942_v44 = vld [vmem:[%s4383_s16 + $0x18] sm:$0xff] }
 0x6f8   : > { %2922 = vmatprep.subr.bf16.mxu1 %v2921_v49  ;;  %v2939_v6 = vpack.c.bf16 %v942_v44, %v941_v43  ;;  %v983_v44 = vld [vmem:[%s4383_s16 + $0x160] sm:$0xff] }
 0x6fb   : > { %2924 = vmatpush1.bf16.msra.mxu1 %v2923_v57  ;;  %v2973_v57 = vpack.c.bf16 %v992_v54, %v991_v52  ;;  %v954_v54 = vld [vmem:[%s4383_s16 + $0x78] sm:$0xff] }
 0x6fc   : > { %2926 = vmatprep.subr.bf16.mxu1 %v2925_v62  ;;  %v961_v62 = vld [vmem:[%s4383_s16 + $0xb0] sm:$0xff] }
 0x6fd   : > { %v2945_v1 = vpack.c.bf16 %v962_v63, %v961_v62 }
 0x6ff   : > { %2928 = vmatpush1.bf16.msra.mxu1 %v2927_v8  ;;  %v2947_v8 = vpack.c.bf16 %v946_v4, %v945_v3 }
 0x700   : > { %2930 = vmatprep.subr.bf16.mxu1 %v2929_v13  ;;  %v964_v13 = vld [vmem:[%s4383_s16 + $0xc8] sm:$0xff] }
 0x773   : > { %v1654_v16 = vpop.xlane.xlu1 %1653 }
 0x774   : > { %v1655_v17 = vmul.f32 0.0078125, %v1654_v16  ;;  %v2899_v16 = vpack.c.bf16 %v934_v12, %v930_v11  ;;  %v963_v11 = vld [vmem:[%s4383_s16 + $0xc0] sm:$0xff] }
 0x776   : > { %v3751_v18 = vsub.f32 %v1651_v40, %v1655_v17  ;;  %v2887_v40 = vpack.c.bf16 %v910_v39, %v906_v38  ;;  %v2931_v17 = vpack.c.bf16 %v936_v15, %v932_v14  ;;  %v2967_v38 = vpack.c.bf16 %v972_v34, %v971_v33  ;;  %v957_v39 = vld [vmem:[%s4383_s16 + $0x90] sm:$0xff]  ;;  %v995_v14 = vld [vmem:[%s4383_s16 + $0x1c0] sm:$0xff]  ;;  %v996_v15 = vld [vmem:[%s4383_s16 + $0x1c8] sm:$0xff] }
 0x777   : > { %v2937_v41 = vpack.c.bf16 %v958_v7, %v957_v39  ;;  %v981_v33 = vld [vmem:[%s4383_s16 + $0x150] sm:$0xff]  ;;  %v982_v34 = vld [vmem:[%s4383_s16 + $0x158] sm:$0xff] }
 0x778   : > { %v1657_v19 = vmul.f32 %v3751_v18, %v3751_v18  ;;  %2888 = vmatpush1.bf16.msra.mxu0 %v2887_v40  ;;  %2932 = vmatpush1.bf16.msra.mxu1 %v2931_v17  ;;  %v989_v40 = vld [vmem:[%s4383_s16 + $0x190] sm:$0xff]  ;;  %v2981_v17 = vpack.c.bf16 %v996_v15, %v995_v14  ;;  %v2987_v39 = vpack.c.bf16 %v982_v34, %v981_v33 }
 0x779   : > { %2890 = vmatprep.subr.bf16.mxu0 %v2889_v48  ;;  %2966 = vmatprep.subr.bf16.mxu1 %v2965_v24  ;;  %v2969_v46 = vpack.c.bf16 %v990_v42, %v989_v40  ;;  %v974_v48 = vld [vmem:[%s4383_s16 + $0x118] sm:$0xff]  ;;  %v965_v24 = vld [vmem:[%s4383_s16 + $0xd0] sm:$0xff]  ;;  %v1000_v40 = vld [vmem:[%s4383_s16 + $0x1e8] sm:$0xff] }
 0x77a   : > { %v1658_v20 = vsel %vm775_vm0, %v1657_v19, 0.0  ;;  %v955_v19 = vld [vmem:[%s4383_s16 + $0x80] sm:$0xff]  ;;  %v2971_v49 = vpack.c.bf16 %v974_v48, %v973_v47  ;;  %v952_v42 = vld [vmem:[%s4383_s16 + $0x68] sm:$0xff]  ;;  %v970_v47 = vld [vmem:[%s4383_s16 + $0xf8] sm:$0xff] }
 0x77b   : > { %1659 = vadd.xlane.f32.xlu0 %v1658_v20  ;;  %v956_v20 = vld [vmem:[%s4383_s16 + $0x88] sm:$0xff]  ;;  %v1001_v48 = vld [vmem:[%s4383_s16 + $0x1f0] sm:$0xff] }
 0x77c   : > { %2892 = vmatpush1.bf16.msra.mxu0 %v2891_v53  ;;  %v2933_v22 = vpack.c.bf16 %v956_v20, %v955_v19  ;;  %v2941_v53 = vpack.c.bf16 %v960_v51, %v959_v50  ;;  %v947_v19 = vld [vmem:[%s4383_s16 + $0x40] sm:$0xff]  ;;  %v948_v20 = vld [vmem:[%s4383_s16 + $0x48] sm:$0xff] }
 0x77d   : > { %2894 = vmatprep.subr.bf16.mxu0 %v2893_v58  ;;  %v2943_v58 = vpack.c.bf16 %v944_v56, %v943_v55  ;;  %v985_v56 = vld [vmem:[%s4383_s16 + $0x170] sm:$0xff] }
 0x780   : > { %2896 = vmatpush1.bf16.msra.mxu0 %v2895_v2  ;;  %v994_v2 = vld [vmem:[%s4383_s16 + $0x1b8] sm:$0xff] }
 0x781   : > { %2898 = vmatprep.subr.bf16.mxu0 %v2897_v9  ;;  %v2977_v5 = vpack.c.bf16 %v994_v2, %v993_v0  ;;  %v977_v9 = vld [vmem:[%s4383_s16 + $0x130] sm:$0xff]  ;;  %v938_v0 = vld [vmem:[%s4382_s15] sm:$0xf] }
 0x782   : > { %v2979_v12 = vpack.c.bf16 %v978_v10, %v977_v9 }
 0x784   : > { %2900 = vmatpush1.bf16.msra.mxu0 %v2899_v16  ;;  %v2949_v16 = vpack.c.bf16 %v964_v13, %v963_v11 }
 0x785   : > { %2934 = vmatprep.subr.bf16.mxu0 %v2933_v22  ;;  %v2951_v22 = vpack.c.bf16 %v948_v20, %v947_v19 }
 0x808   : > { %v1660_v25 = vpop.xlane.xlu0 %1659 }
 0x809   : > { %v1661_v26 = vmul.f32 0.0078125, %v1660_v25  ;;  %v966_v25 = vld [vmem:[%s4383_s16 + $0xd8] sm:$0xff] }
 0x80b   : > { %v1662_v27 = vadd.f32 1e-12, %v1661_v26  ;;  %v2983_v26 = vpack.c.bf16 %v980_v23, %v979_v21 }
 0x80d   : > { %3115 = vrsqrt.f32 %v1662_v27  ;;  %v2953_v27 = vpack.c.bf16 %v966_v25, %v965_v24 }
 0x817   : > { %v3116_v28 = vpop.eup %3115 }
 0x818   : > { %v1664_v31 = vmul.f32 %v3116_v28, %v3751_v18  ;;  %v997_v28 = vld [vmem:[%s4383_s16 + $0x1d0] sm:$0xff] }
 0x81a   : > { %v1671_v36 = vmul.f32 %v2424_v29, %v1664_v31  ;;  %v998_v29 = vld [vmem:[%s4383_s16 + $0x1d8] sm:$0xff] }
 0x81b   : > { %v2985_v31 = vpack.c.bf16 %v998_v29, %v997_v28 }
 0x81c   : > { %v3907_v18 = vadd.f32 %v2425_v35, %v1671_v36  ;;  %v2955_v35 = vpack.c.bf16 %v950_v32, %v949_v30  ;;  %v967_v36 = vld [vmem:[%s4383_s16 + $0xe0] sm:$0xff] }
 0x81e   : > { %1765 = vmatmul.mubr.f32.vlgmr.msra.gmra.mrb[8].mxu0 %v3907_v18  ;;  %1836 = vmatmul.mubr.f32.vlgmr.msra.gmra.mrb[8].mxu1 %v3907_v18 }
 0x81f   : > { %2936 = vmatpush3.bf16.msra.mxu0 %v2935_v37  ;;  %2968 = vmatpush3.bf16.msra.mxu1 %v2967_v38  ;;  %v968_v37 = vld [vmem:[%s4383_s16 + $0xe8] sm:$0xff]  ;;  %v999_v38 = vld [vmem:[%s4383_s16 + $0x1e0] sm:$0xff] }
 0x820   : > { %2938 = vmatprep.subr.bf16.mxu0 %v2937_v41  ;;  %2970 = vmatprep.subr.bf16.mxu1 %v2969_v46  ;;  %v2957_v7 = vpack.c.bf16 %v968_v37, %v967_v36  ;;  %v951_v41 = vld [vmem:[%s4383_s16 + $0x60] sm:$0xff]  ;;  %v2989_v43 = vpack.c.bf16 %v1000_v40, %v999_v38  ;;  %v984_v46 = vld [vmem:[%s4383_s16 + $0x168] sm:$0xff] }
 0x821   : > { %v2959_v50 = vpack.c.bf16 %v952_v42, %v951_v41  ;;  %v2991_v51 = vpack.c.bf16 %v984_v46, %v983_v44 }
 0x823   : > { %2940 = vmatpush3.bf16.msra.mxu0 %v2939_v6  ;;  %2972 = vmatpush3.bf16.msra.mxu1 %v2971_v49  ;;  %v969_v6 = vld [vmem:[%s4383_s16 + $0xf0] sm:$0xff]  ;;  %v1002_v49 = vld [vmem:[%s4383_s16 + $0x1f8] sm:$0xff] }
 0x824   : > { %2942 = vmatprep.subr.bf16.mxu0 %v2941_v53  ;;  %2974 = vmatprep.subr.bf16.mxu1 %v2973_v57  ;;  %v2961_v52 = vpack.c.bf16 %v970_v47, %v969_v6  ;;  %v953_v53 = vld [vmem:[%s4383_s16 + $0x70] sm:$0xff]  ;;  %v2993_v55 = vpack.c.bf16 %v1002_v49, %v1001_v48  ;;  %v986_v57 = vld [vmem:[%s4383_s16 + $0x178] sm:$0xff] }
 0x825   : > { %v2995_v59 = vpack.c.bf16 %v986_v57, %v985_v56 }
 0x827   : > { %2944 = vmatpush3.bf16.msra.mxu0 %v2943_v58  ;;  %2976 = vmatpush3.bf16.msra.mxu1 %v2975_v61  ;;  %v2963_v58 = vpack.c.bf16 %v954_v54, %v953_v53  ;;  %v4080_v61 = vshrl.u32 %v1680_v60, 7 }
 0x828   : > { %2946 = vmatprep.subr.bf16.mxu0 %v2945_v1  ;;  %2978 = vmatprep.subr.bf16.mxu1 %v2977_v5 }
 0x829   : > { %v1682_v62 = vsub.s32 0, %v4080_v61  ;;  %v1690_v63 = vsub.s32 2, %v4080_v61  ;;  %v1686_v1 = vsub.s32 1, %v4080_v61  ;;  %v1694_v2 = vsub.s32 3, %v4080_v61 }
 0x82b   : > { %2948 = vmatpush3.bf16.msra.mxu0 %v2947_v8  ;;  %2980 = vmatpush3.bf16.msra.mxu1 %v2979_v12  ;;  %v1683_v3 = vrot.slane %v938_v0, %v1682_v62  ;;  %v1691_v4 = vrot.slane %v938_v0, %v1690_v63  ;;  %v1687_v5 = vrot.slane %v938_v0, %v1686_v1 }
 0x82c   : > { %2950 = vmatprep.subr.bf16.mxu0 %v2949_v16  ;;  %2982 = vmatprep.subr.bf16.mxu1 %v2981_v17  ;;  %v1695_v8 = vrot.slane %v938_v0, %v1694_v2 }
 0x82f   : > { %2952 = vmatpush3.bf16.msra.mxu0 %v2951_v22  ;;  %2984 = vmatpush3.bf16.msra.mxu1 %v2983_v26 }
 0x830   : > { %2954 = vmatprep.subr.bf16.mxu0 %v2953_v27  ;;  %2986 = vmatprep.subr.bf16.mxu1 %v2985_v31 }
 0x833   : > { %2956 = vmatpush3.bf16.msra.mxu0 %v2955_v35  ;;  %2988 = vmatpush3.bf16.msra.mxu1 %v2987_v39 }
 0x834   : > { %2958 = vmatprep.subr.bf16.mxu0 %v2957_v7  ;;  %2990 = vmatprep.subr.bf16.mxu1 %v2989_v43 }
 0x837   : > { %2960 = vmatpush3.bf16.msra.mxu0 %v2959_v50  ;;  %2992 = vmatpush3.bf16.msra.mxu1 %v2991_v51 }
 0x838   : > { %2962 = vmatprep.subr.bf16.mxu0 %v2961_v52  ;;  %2994 = vmatprep.subr.bf16.mxu1 %v2993_v55  ;;  %v2426_v55 = vld [vmem:[%s4384_s17] ss:$0 sm:$0xff] }
 0x83b   : > { %2964 = vmatpush3.bf16.msra.mxu0 %v2963_v58  ;;  %2996 = vmatpush3.bf16.msra.mxu1 %v2995_v59 }
 0x8f1   : > { %v1766_v9 = vpop.f32.mrb[8].mxu0  ;;  %v1837_v10 = vpop.f32.mrb[8].mxu1 }
 0x8f2   : > { %v1767_v11 = vadd.f32 %v1766_v9, %v1683_v3  ;;  %v1838_v12 = vadd.f32 %v1837_v10, %v1691_v4  ;;  %v1768_v13 = vpop.f32.mrb[9].mxu0  ;;  %v1839_v14 = vpop.f32.mrb[9].mxu1  ;;  %v2062_v10 = vld [vmem:[%s4387_s20 + $0x8] sm:$0xff] }
 0x8f3   : > { %v1769_v15 = vadd.f32 %v1768_v13, %v1687_v5  ;;  %v1840_v16 = vadd.f32 %v1839_v14, %v1695_v8  ;;  %v2063_v13 = vld [vmem:[%s4387_s20 + $0x10] sm:$0xff] }
 0x8f4   : > { %v1846_v17 = vmul.f32 0.044715, %v1767_v11  ;;  %v1848_v19 = vmul.f32 0.044715, %v1838_v12  ;;  %v1842_v6 = vmul.f32 0.5, %v1767_v11  ;;  %v1844_v48 = vmul.f32 0.5, %v1838_v12 }
 0x8f5   : > { %v1847_v20 = vmul.f32 0.044715, %v1769_v15  ;;  %v1849_v21 = vmul.f32 0.044715, %v1840_v16  ;;  %v1843_v41 = vmul.f32 0.5, %v1769_v15  ;;  %v1845_v44 = vmul.f32 0.5, %v1840_v16 }
 0x8f6   : > { %v1850_v22 = vmul.f32 %v1846_v17, %v1767_v11  ;;  %v1852_v23 = vmul.f32 %v1848_v19, %v1838_v12  ;;  %v2065_v19 = vld [vmem:[%s4387_s20 + $0x20] sm:$0xff] }
 0x8f7   : > { %v1851_v24 = vmul.f32 %v1847_v20, %v1769_v15  ;;  %v1853_v25 = vmul.f32 %v1849_v21, %v1840_v16  ;;  %v2067_v20 = vld [vmem:[%s4387_s20 + $0x30] sm:$0xff] }
 0x8f8   : > { %v1854_v26 = vmul.f32 %v1850_v22, %v1767_v11  ;;  %v1856_v27 = vmul.f32 %v1852_v23, %v1838_v12  ;;  %v3003_v21 = vpack.c.bf16 %v2067_v20, %v2065_v19  ;;  %v2070_v22 = vld [vmem:[%s4387_s20 + $0x48] sm:$0xff]  ;;  %v2072_v23 = vld [vmem:[%s4387_s20 + $0x58] sm:$0xff]  ;;  %v2207_v20 = vld [vmem:[%s4389_s22 + $0x30] sm:$0xff] }
 0x8f9   : > { %v1855_v28 = vmul.f32 %v1851_v24, %v1769_v15  ;;  %v1857_v29 = vmul.f32 %v1853_v25, %v1840_v16  ;;  %v3005_v24 = vpack.c.bf16 %v2072_v23, %v2070_v22  ;;  %v2069_v25 = vld [vmem:[%s4387_s20 + $0x40] sm:$0xff]  ;;  %v2226_v23 = vld [vmem:[%s4389_s22 + $0xc8] sm:$0xff] }
 0x8fa   : > { %v1858_v30 = vadd.f32 %v1854_v26, %v1767_v11  ;;  %v1860_v31 = vadd.f32 %v1856_v27, %v1838_v12  ;;  %v2061_v12 = vld [vmem:[%s4387_s20] sm:$0xff]  ;;  %v2071_v26 = vld [vmem:[%s4387_s20 + $0x50] sm:$0xff] }
 0x8fb   : > { %v1859_v32 = vadd.f32 %v1855_v28, %v1769_v15  ;;  %v1861_v33 = vadd.f32 %v1857_v29, %v1840_v16  ;;  %v2999_v14 = vpack.c.bf16 %v2063_v13, %v2061_v12  ;;  %v2066_v15 = vld [vmem:[%s4387_s20 + $0x28] sm:$0xff]  ;;  %v2068_v16 = vld [vmem:[%s4387_s20 + $0x38] sm:$0xff]  ;;  %v3007_v27 = vpack.c.bf16 %v2071_v26, %v2069_v25  ;;  %v2205_v13 = vld [vmem:[%s4389_s22 + $0x20] sm:$0xff] }
 0x8fc   : > { %v1862_v34 = vmul.f32 0.7978846, %v1858_v30  ;;  %v1864_v37 = vmul.f32 0.7978846, %v1860_v31  ;;  %v3001_v17 = vpack.c.bf16 %v2068_v16, %v2066_v15  ;;  %v2074_v28 = vld [vmem:[%s4387_s20 + $0x68] sm:$0xff]  ;;  %v2076_v29 = vld [vmem:[%s4387_s20 + $0x78] sm:$0xff] }
 0x8fd   : > { %v1863_v35 = vmul.f32 0.7978846, %v1859_v32  ;;  %v1865_v36 = vmul.f32 0.7978846, %v1861_v33  ;;  %v3009_v30 = vpack.c.bf16 %v2076_v29, %v2074_v28  ;;  %v2073_v31 = vld [vmem:[%s4387_s20 + $0x60] sm:$0xff]  ;;  %v2075_v32 = vld [vmem:[%s4387_s20 + $0x70] sm:$0xff] }
 0x8fe   : > { %3117 = vtanh.f32 %v1862_v34  ;;  %v2078_v33 = vld [vmem:[%s4387_s20 + $0x88] sm:$0xff]  ;;  %v3011_v34 = vpack.c.bf16 %v2075_v32, %v2073_v31  ;;  %v2223_v15 = vld [vmem:[%s4389_s22 + $0xb0] sm:$0xff]  ;;  %v2224_v16 = vld [vmem:[%s4389_s22 + $0xb8] sm:$0xff] }
 0x8ff   : > { %3119 = vtanh.f32 %v1863_v35  ;;  %v2080_v35 = vld [vmem:[%s4387_s20 + $0x98] sm:$0xff]  ;;  %v3041_v19 = vpack.c.bf16 %v2224_v16, %v2223_v15  ;;  %v2225_v22 = vld [vmem:[%s4389_s22 + $0xc0] sm:$0xff]  ;;  %v2227_v28 = vld [vmem:[%s4389_s22 + $0xd0] sm:$0xff] }
 0x900   : > { %3121 = vtanh.f32 %v1865_v36  ;;  %v2077_v36 = vld [vmem:[%s4387_s20 + $0x80] sm:$0xff]  ;;  %v3045_v25 = vpack.c.bf16 %v2226_v23, %v2225_v22  ;;  %v2228_v29 = vld [vmem:[%s4389_s22 + $0xd8] sm:$0xff]  ;;  %v2211_v32 = vld [vmem:[%s4389_s22 + $0x50] sm:$0xff] }
 0x901   : > { %3123 = vtanh.f32 %v1864_v37  ;;  %v2079_v37 = vld [vmem:[%s4387_s20 + $0x90] sm:$0xff]  ;;  %v2209_v26 = vld [vmem:[%s4389_s22 + $0x40] sm:$0xff]  ;;  %v3049_v31 = vpack.c.bf16 %v2228_v29, %v2227_v28 }
 0x908   : > { %v3118_v38 = vpop.eup %3117 }
 0x909   : > { %v3120_v39 = vpop.eup %3119  ;;  %v1870_v7 = vadd.f32 1.0, %v3118_v38  ;;  %v3013_v38 = vpack.c.bf16 %v2080_v35, %v2078_v33  ;;  %v2212_v33 = vld [vmem:[%s4389_s22 + $0x58] sm:$0xff]  ;;  %v2230_v35 = vld [vmem:[%s4389_s22 + $0xe8] sm:$0xff] }
 0x90a   : > { %v3122_v40 = vpop.eup %3121  ;;  %v1871_v42 = vadd.f32 1.0, %v3120_v39  ;;  %v2082_v39 = vld [vmem:[%s4387_s20 + $0xa8] sm:$0xff] }
 0x90b   : > { %v3124_v43 = vpop.eup %3123  ;;  %v1873_v46 = vadd.f32 1.0, %v3122_v40  ;;  %v1874_v51 = vmul.f32 %v1870_v7, %v1842_v6  ;;  %v2084_v7 = vld [vmem:[%s4387_s20 + $0xb8] sm:$0xff]  ;;  %v3015_v40 = vpack.c.bf16 %v2079_v37, %v2077_v36  ;;  %v3051_v36 = vpack.c.bf16 %v2212_v33, %v2211_v32 }
 0x90c   : > { %v1875_v47 = vmul.f32 %v1871_v42, %v1843_v41  ;;  %v1872_v49 = vadd.f32 1.0, %v3124_v43  ;;  %v3017_v41 = vpack.c.bf16 %v2084_v7, %v2082_v39  ;;  %v2081_v42 = vld [vmem:[%s4387_s20 + $0xa0] sm:$0xff]  ;;  %v2083_v43 = vld [vmem:[%s4387_s20 + $0xb0] sm:$0xff] }
 0x90d   : > { %v1877_v50 = vmul.f32 %v1873_v46, %v1845_v44  ;;  %v2086_v44 = vld [vmem:[%s4387_s20 + $0xc8] sm:$0xff]  ;;  %v2088_v46 = vld [vmem:[%s4387_s20 + $0xd8] sm:$0xff]  ;;  %v3019_v6 = vpack.c.bf16 %v2083_v43, %v2081_v42  ;;  %v2428_v43 = vld [vmem:[%s4386_s19] ss:$0 sm:$0xff] }
 0x90e   : > { %1948 = vmatprep.mubr.f32.mxu0 %v1875_v47  ;;  %v1876_v52 = vmul.f32 %v1872_v49, %v1844_v48  ;;  %v3021_v47 = vpack.c.bf16 %v2088_v46, %v2086_v44  ;;  %v2085_v48 = vld [vmem:[%s4387_s20 + $0xc0] sm:$0xff]  ;;  %v2087_v49 = vld [vmem:[%s4387_s20 + $0xd0] sm:$0xff] }
 0x90f   : > { %2018 = vmatprep.mubr.f32.mxu1 %v1877_v50  ;;  %1949 = vmatmul.mubr.f32.vlgmr.msra.gmra.mrb[10].mxu0 %v1874_v51  ;;  %v2090_v50 = vld [vmem:[%s4387_s20 + $0xe8] sm:$0xff]  ;;  %v2092_v51 = vld [vmem:[%s4387_s20 + $0xf8] sm:$0xff] }
 0x910   : > { %2019 = vmatmul.mubr.f32.vlgmr.msra.gmra.mrb[10].mxu1 %v1876_v52  ;;  %2169 = vmatprep.mubr.f32.mxu0 %v3193_v45  ;;  %v3023_v52 = vpack.c.bf16 %v2087_v49, %v2085_v48 }
 0x9e2   : > { %v2540_v53 = vpop.f32.mrb[10].mxu0 }
 0x9e3   : > { %v2575_v54 = vpop.f32.mrb[10].mxu1  ;;  %v2541_v56 = vpop.f32.mrb[11].mxu0 }
 0x9e4   : > { %v2542_v57 = vadd.f32 %v2541_v56, %v2540_v53  ;;  %v2576_v58 = vpop.f32.mrb[11].mxu1  ;;  %v3025_v53 = vpack.c.bf16 %v2092_v51, %v2090_v50 }
 0x9e5   : > { %v2577_v59 = vadd.f32 %v2576_v58, %v2575_v54  ;;  %v2089_v54 = vld [vmem:[%s4387_s20 + $0xe0] sm:$0xff]  ;;  %v2218_v58 = vld [vmem:[%s4389_s22 + $0x88] sm:$0xff] }
 0x9e6   : > { %v1951_v63 = vadd.f32 %v2542_v57, %v2426_v55  ;;  %v2091_v55 = vld [vmem:[%s4387_s20 + $0xf0] sm:$0xff]  ;;  %v2217_v57 = vld [vmem:[%s4389_s22 + $0x80] sm:$0xff] }
 0x9e7   : > { %v3027_v56 = vpack.c.bf16 %v2091_v55, %v2089_v54  ;;  %v2214_v54 = vld [vmem:[%s4389_s22 + $0x68] sm:$0xff] }
 0x9e8   : > { %v2021_v0 = vadd.f32 %v2577_v59, %v1951_v63  ;;  %v2201_v59 = vld [vmem:[%s4389_s22] sm:$0xff]  ;;  %v3029_v63 = vpack.c.bf16 %v2218_v58, %v2217_v57  ;;  %v2232_v57 = vld [vmem:[%s4389_s22 + $0xf8] sm:$0xff] }
 0x9ea   : > { %v2024_v2 = vadd.f32 %v2021_v0, %v3907_v18  ;;  %v2064_v18 = vld [vmem:[%s4387_s20 + $0x18] sm:$0xff]  ;;  %v2202_v0 = vld [vmem:[%s4389_s22 + $0x8] sm:$0xff]  ;;  %3030 = vmatprep.subr.bf16.mxu1 %v3029_v63 }
 0x9eb   : > { %v2997_v11 = vpack.c.bf16 %v2064_v18, %v2062_v10  ;;  %v2221_v10 = vld [vmem:[%s4389_s22 + $0xa0] sm:$0xff]  ;;  %v2222_v18 = vld [vmem:[%s4389_s22 + $0xa8] sm:$0xff]  ;;  %v2216_v63 = vld [vmem:[%s4389_s22 + $0x78] sm:$0xff] }
 0x9ec   : > { %v2025_v3 = vsel %vm775_vm0, %v2024_v2, 0.0  ;;  %v3037_v12 = vpack.c.bf16 %v2222_v18, %v2221_v10 }
 0x9ed   : > { %2026 = vadd.xlane.f32.xlu0 %v2025_v3  ;;  %2998 = vmatprep.subr.bf16.mxu0 %v2997_v11  ;;  %v2220_v3 = vld [vmem:[%s4389_s22 + $0x98] sm:$0xff] }
 0x9ee   : > { %3000 = vmatpush1.bf16.msra.mxu0 %v2999_v14  ;;  %v2206_v14 = vld [vmem:[%s4389_s22 + $0x28] sm:$0xff] }
 0x9ef   : > { %3002 = vmatprep.subr.bf16.mxu0 %v3001_v17  ;;  %v3039_v17 = vpack.c.bf16 %v2206_v14, %v2205_v13 }
 0x9f2   : > { %3004 = vmatpush1.bf16.msra.mxu0 %v3003_v21  ;;  %v2208_v21 = vld [vmem:[%s4389_s22 + $0x38] sm:$0xff] }
 0x9f3   : > { %3006 = vmatprep.subr.bf16.mxu0 %v3005_v24  ;;  %v3043_v24 = vpack.c.bf16 %v2208_v21, %v2207_v20 }
 0x9f6   : > { %3008 = vmatpush1.bf16.msra.mxu0 %v3007_v27  ;;  %v2210_v27 = vld [vmem:[%s4389_s22 + $0x48] sm:$0xff] }
 0x9f7   : > { %3010 = vmatprep.subr.bf16.mxu0 %v3009_v30  ;;  %v3047_v30 = vpack.c.bf16 %v2210_v27, %v2209_v26 }
 0x9fa   : > { %3012 = vmatpush1.bf16.msra.mxu0 %v3011_v34  ;;  %v2229_v34 = vld [vmem:[%s4389_s22 + $0xe0] sm:$0xff] }
 0x9fb   : > { %3014 = vmatprep.subr.bf16.mxu0 %v3013_v38  ;;  %v3053_v37 = vpack.c.bf16 %v2230_v35, %v2229_v34 }
 0x9fe   : > { %3016 = vmatpush1.bf16.msra.mxu0 %v3015_v40 }
 0x9ff   : > { %3018 = vmatprep.subr.bf16.mxu0 %v3017_v41  ;;  %v2427_v41 = vld [vmem:[%s4385_s18] ss:$0 sm:$0xff] }
 0xa02   : > { %3020 = vmatpush1.bf16.msra.mxu0 %v3019_v6 }
 0xa03   : > { %3022 = vmatprep.subr.bf16.mxu0 %v3021_v47 }
 0xa06   : > { %3024 = vmatpush1.bf16.msra.mxu0 %v3023_v52 }
 0xa07   : > { %3026 = vmatprep.subr.bf16.mxu0 %v3025_v53 }
 0xa0a   : > { %3028 = vmatpush1.bf16.msra.mxu0 %v3027_v56  ;;  %v2231_v56 = vld [vmem:[%s4389_s22 + $0xf0] sm:$0xff] }
 0xa0b   : > { %v3057_v58 = vpack.c.bf16 %v2232_v57, %v2231_v56 }
 0xa7a   : > { %v2027_v4 = vpop.xlane.xlu0 %2026 }
 0xa7b   : > { %v2028_v5 = vmul.f32 0.0078125, %v2027_v4  ;;  %v3031_v4 = vpack.c.bf16 %v2202_v0, %v2201_v59  ;;  %v2215_v59 = vld [vmem:[%s4389_s22 + $0x70] sm:$0xff] }
 0xa7c   : > { %v3059_v0 = vpack.c.bf16 %v2216_v63, %v2215_v59 }
 0xa7d   : > { %v4099_v45 = vsub.f32 %v2024_v2, %v2028_v5  ;;  %v2219_v2 = vld [vmem:[%s4389_s22 + $0x90] sm:$0xff]  ;;  %3032 = vmatpush3.bf16.msra.mxu1 %v3031_v4 }
 0xa7e   : > { %v3033_v5 = vpack.c.bf16 %v2220_v3, %v2219_v2  ;;  %v2093_v2 = vld [vmem:[%s4388_s21] sm:$0x3]  ;;  %v3195_v3 = vmov 1966171168  }
 0xa7f   : > { %v2030_v8 = vmul.f32 %v4099_v45, %v4099_v45  ;;  %v2180_v4 = vunpack.c.l.s4 %v3195_v3 }
 0xa80   : > { %3034 = vmatprep.subr.bf16.mxu1 %v3033_v5  ;;  %v2098_v5 = vrot.slane %v2093_v2, %v1682_v62 }
 0xa81   : > { %v2031_v9 = vsel %vm775_vm0, %v2030_v8, 0.0  ;;  %v2203_v8 = vld [vmem:[%s4389_s22 + $0x10] sm:$0xff] }
 0xa82   : > { %2032 = vadd.xlane.f32.xlu0 %v2031_v9  ;;  %v2204_v9 = vld [vmem:[%s4389_s22 + $0x18] sm:$0xff] }
 0xa83   : > { %v3035_v11 = vpack.c.bf16 %v2204_v9, %v2203_v8  ;;  %v2102_v8 = vrot.slane %v2093_v2, %v1686_v1  ;;  %v2181_v9 = vunpack.c.0.s8 %v2180_v4 }
 0xa85   : > { %3036 = vmatpush3.bf16.msra.mxu1 %v3035_v11  ;;  %v2184_v13 = vsub.s32 %v2181_v9, %v4080_v61  ;;  %v2233_v61 = vld [vmem:[%s4442_s9] sm:$0x1]  ;;  %s3133_s9 = scalar_lea.vmem %s3132_s8, 32 }
 0xa86   : > { %3038 = vmatprep.subr.bf16.mxu1 %v3037_v12  ;;  %p3135_p1 = scmp.lt.s32.totalorder %s3133_s9, %s3127_s5 }
 0xa88   : > { %p3136_p2 = por %p3135_p1, %p3134_p0 }
 0xa89   : > { %3040 = vmatpush3.bf16.msra.mxu1 %v3039_v17 }
 0xa8a   : > { %3042 = vmatprep.subr.bf16.mxu1 %v3041_v19  ;;  %p3137_p3 = pnand %p3136_p2, %p3130_p13 }
 0xa8d   : > { %3044 = vmatpush3.bf16.msra.mxu1 %v3043_v24 }
 0xa8e   : > { %3046 = vmatprep.subr.bf16.mxu1 %v3045_v25 }
 0xa91   : > { %3048 = vmatpush3.bf16.msra.mxu1 %v3047_v30 }
 0xa92   : > { %3050 = vmatprep.subr.bf16.mxu1 %v3049_v31 }
 0xa95   : > { %3052 = vmatpush3.bf16.msra.mxu1 %v3051_v36 }
 0xa96   : > { %3054 = vmatprep.subr.bf16.mxu1 %v3053_v37 }
 0xb0f   : > { %v2033_v38 = vpop.xlane.xlu0 %2032 }
 0xb10   : > { %v2034_v39 = vmul.f32 0.0078125, %v2033_v38 }
 0xb12   : > { %v2035_v7 = vadd.f32 1e-12, %v2034_v39 }
 0xb14   : > { %3125 = vrsqrt.f32 %v2035_v7 }
 0xb1e   : > { %v3126_v40 = vpop.eup %3125 }
 0xb1f   : > { %v2037_v42 = vmul.f32 %v3126_v40, %v4099_v45  ;;  %v2213_v45 = vld [vmem:[%s4389_s22 + $0x60] sm:$0xff] }
 0xb20   : > { %v3055_v55 = vpack.c.bf16 %v2214_v54, %v2213_v45 }
 0xb21   : > { %v2044_v44 = vmul.f32 %v2427_v41, %v2037_v42 }
 0xb22   : > { %3056 = vmatpush3.bf16.msra.mxu1 %v3055_v55 }
 0xb23   : > { %v2051_v46 = vadd.f32 %v2428_v43, %v2044_v44  ;;  %3058 = vmatprep.subr.bf16.mxu1 %v3057_v58 }
 0xb25   : > { %v2052_v6 = vsel %vm775_vm0, %v2051_v46, 0.0 }
 0xb26   : > { %v2053_v47 = vrot.slane %v2052_v6, 4  ;;  %3060 = vmatpush3.bf16.msra.mxu1 %v3059_v0 }
 0xb28   : > { %v2054_v48 = vadd.f32 %v2053_v47, %v2052_v6 }
 0xb2a   : > { %v2055_v49 = vrot.slane %v2054_v48, 2 }
 0xb2c   : > { %v2056_v50 = vadd.f32 %v2055_v49, %v2054_v48 }
 0xb2e   : > { %v2057_v51 = vrot.slane %v2056_v50, 1 }
 0xb30   : > { %v2058_v52 = vadd.f32 %v2057_v51, %v2056_v50 }
 0xb32   : > { %v2060_v53 = vmul.f32 0.25, %v2058_v52 }
 0xb34   : > { %2170 = vmatmul.mubr.f32.vlgmr.msra.gmra.mrb[12].mxu0 %v2060_v53 }
 0xc07   : > { %v2171_v10 = vpop.f32.mrb[12].mxu0 }
 0xc08   : > { %v2172_v18 = vadd.f32 %v2171_v10, %v2098_v5  ;;  %v2173_v11 = vpop.f32.mrb[13].mxu0 }
 0xc09   : > { %v2174_v12 = vadd.f32 %v2173_v11, %v2102_v8 }
 0xc0a   : > { %v2199_v16 = vmax.f32 %v2172_v18, 0.0 }
 0xc0b   : > { %v2178_v14 = vcombine.low %v2172_v18, %v2174_v12  ;;  %v2200_v15 = vmax.f32 %v2174_v12, 0.0 }
 0xc0d   : > { %v2185_v17 = vrot.slane %v2178_v14, %v2184_v13  ;;  %2298 = vmatprep.mubr.f32.mxu1 %v2200_v15 }
 0xc0e   : > { %2299 = vmatmul.mubr.f32.vlgmr.msra.gmra.mrb[12].mxu1 %v2199_v16 }
 0xc0f   : > { %v2192_v62 = vrot.slane %v2185_v17, %v2184_v13 }
 0xc11   : > { %2198 = vst.msk [vmem:[%s769_s27] sm:$0x3] %vm2196_vm5, %v2192_v62  ;;  %s2306_s27 = scalar_lea.sflag [#allocation3], %s754_s4 }
 0xce1   : > { %v2610_v1 = vpop.f32.mrb[12].mxu1 }
 0xce2   : > { %v2611_v19 = vpop.f32.mrb[13].mxu1 }
 0xce3   : > { %v2612_v20 = vadd.f32 %v2611_v19, %v2610_v1 }
 0xce5   : > { %v2301_v21 = vadd.f32 %v2612_v20, %v2233_v61 }
 0xce7   : > { %2304 = vst [vmem:[%s755_s3] sm:$0x1] %v2301_v21 }
 0xce8   : > { %3140 = shalt.err (!%p3137_p3)
}
 0xce9   : > { %s3141_s4 = scalar_lea.hbm %s4325_s30, 16  ;;  %s3145_s6 = scalar_lea.hbm %s4444_s10, 32 }
 0xcea   : > { %p3142_p4 = scmp.ne.s32.totalorder %s4325_s30, %s3141_s4  ;;  %p3146_p9 = scmp.lt.u32.totalorder %s4325_s30, %s4444_s10 }
 0xceb   : > { %p3147_p10 = scmp.lt.u32.totalorder %s3145_s6, %s3141_s4  ;;  %p3149_p12 = scmp.lt.u32.totalorder %s3141_s4, %s4325_s30 }
 0xcec   : > { %p3143_p7 = pnand %p3142_p4, %p3365_p5 }
 0xced   : > { %p3148_p11 = por %p3147_p10, %p3146_p9 }
 0xcee   : > { %p3144_p8 = pneg %p3143_p7 }
 0xcef   : > { %p3150_p13 = por %p3149_p12, %p3148_p11 }
 0xcf1   : > { %p3151_p0 = pnand %p3150_p13, %p3144_p8 }
 0xcf3   : > { %3154 = shalt.err (!%p3151_p0)
}
 0xcf4   : > { %3061 = dma.vmem_to_hbm [thread:$0]  (%p3365_p5), %s4327_s28, 16, %s4325_s30, %s2306_s27  }
 0xcf5 PF: > { %s4445_s5 = sld [smem:[#allocation7_spill]]  ;;  %s4446_s7 = sld [smem:[#allocation5_spill]] }
 0xcfb   : > { %p3067_p1 = scmp.ge.s32.totalorder %s4445_s5, 2  ;;  %s2337_s9 = sand.u32 1, %s4446_s7  }
 0xcfc   : > { %s2338_s0 = scalar_lea.sflag [#allocation3], %s2337_s9 }
 0xcfd   : > { %p3064_p2 = pnand %p3067_p1, %p3369_p6 }
 0xcff   : > { %3172 = dma.done.wait (!%p3064_p2), %s2338_s0, 16  }
 0xd00   : > { %3174 = vsyncadd (!%p3064_p2), %s2338_s0, 4294967280  ;;  %s4448_s30 = sld [smem:[#allocation8_spill]]  ;;  %s4449_s4 = sld [smem:[#allocation6_spill]] }
 0xd01   : > { %s4450_s6 = sld [smem:[#allocation9_spill]]  ;;  %s4451_s29 = smov %s3181_s2 }
 0xd06   : > { %p36_p3 = scmp.ge.s32.totalorder %s4448_s30, 4   ;;  %s4452_s2 = smov %s4449_s4 }
 0xd08   :  { %38 = sbr.rel (!%p36_p3) target bundleno = 17 (0x11), region = 163 }
 0xd0f   :  { %2349 = vsyncpa [#allocation3], 1 }
 0xd10   :  { %2351 = vsyncpa [#allocation3 + $0x1], 1 }

</bundles_post_ra>
